<compile_context>
chip_gen: v7x
topology: tpu7x:2x2x1
jax: 0.10.0
libtpu: 0.0.40
codegen_flags: <defaults>
</compile_context>

<pallas_src>
import functools

import jax
import jax.numpy as jnp
from jax.experimental import pallas as pl
from jax.experimental.pallas import tpu as pltpu


# ----------------------------------------------------------------------------
# Pallas kernel: per-modality MLP, ensemble reduction pre-folded into w2t/b2c.
# ----------------------------------------------------------------------------
def ensemble_kernel(x_ref, w1_ref, b1_ref, w2t_ref, b2c_ref, o_ref, *,
                    num_modalities, hid, matmul_dtype):
    # x_ref:   [M, TV]          voxels on the lane axis (lane-dense)
    # w1_ref:  [M, HID, 1]      first-layer weights, one column per modality
    # b1_ref:  [M, HID, 1]
    # w2t_ref: [M, C, HID]      second-layer weights, comb already folded in
    # b2c_ref: [C, 1]           sum_m comb[m] * b2[m]
    # o_ref:   [C, TV]
    x = x_ref[...]                                        # [M, TV] (tiny load)
    tv = x.shape[-1]

    acc = None
    # Unrolled per-modality loop: the [HID, TV] hidden tile is produced and
    # consumed per modality — never an [M*HID, TV] materialization.
    for m in range(num_modalities):
        # Sublane broadcast of modality row m, consumed immediately (no concat).
        xm = jnp.broadcast_to(x[m:m + 1, :], (hid, tv))   # [HID, TV]
        w1m = w1_ref[m]                                   # [HID, 1]
        b1m = b1_ref[m]                                   # [HID, 1]
        hm = jnp.maximum(xm * w1m + b1m, 0.0)             # [HID, TV] f32 (VPU)

        # Small MXU dot per modality (K = HID); accumulate in f32.
        w2m = w2t_ref[m]                                  # [C, HID]
        ym = jnp.dot(w2m, hm.astype(matmul_dtype),
                     preferred_element_type=jnp.float32)  # [C, TV] f32
        acc = ym if acc is None else acc + ym

    o_ref[...] = (acc + b2c_ref[...]).astype(o_ref.dtype)


# ----------------------------------------------------------------------------
# Wrapper
# ----------------------------------------------------------------------------
def ensemble_forward(x, params, channel=(), weights=None, *, tv=8192,
                     matmul_dtype=jnp.float32, out_dtype=jnp.float32):
    """x: [N, M, W, H, D] -> [N, C, W, H, D]."""
    w1, b1, w2, b2 = params["w1"], params["b1"], params["w2"], params["b2"]
    N, M, W, H, D = x.shape
    HID, C = w2.shape[1], w2.shape[2]
    Vs = W * H * D                                   # voxels per batch element

    # --- ensemble combination weights (matches torch mean / weighted einsum) -
    preserved = [m for m in range(M) if m not in channel]
    if not preserved:
        raise ValueError("Ensemble: all modalities were dropped via `channel`")
    mask = jnp.zeros((M,), jnp.float32).at[jnp.asarray(preserved)].set(1.0)
    if weights is None:
        comb = mask / float(len(preserved))
    else:
        wm = mask * weights.astype(jnp.float32)
        comb = wm / jnp.sum(wm)

    # --- fold comb into layer 2 (exact: the combination is linear) ----------
    #   w2t[m, c, j] = comb[m] * w2[m, j, c],   b2c[c] = sum_m comb[m]*b2[m, c]
    w1c = w1.reshape(M, HID, 1).astype(jnp.float32)
    b1c = b1.reshape(M, HID, 1).astype(jnp.float32)
    w2t = (comb[:, None, None] * w2.astype(jnp.float32)).transpose(0, 2, 1)
    w2t = w2t.astype(matmul_dtype)                                   # [M, C, HID]
    b2c = jnp.sum(comb[:, None] * b2.astype(jnp.float32), axis=0)[:, None]  # [C,1]

    # --- voxel tiling: lane-dense, padded to a tile multiple -----------------
    tv = min(int(tv), pl.cdiv(Vs, 128) * 128)
    tv = max(128, (tv // 128) * 128)
    n_tiles = pl.cdiv(Vs, tv)
    vs_pad = n_tiles * tv

    # Pure reshape (no transpose): [N, M, W, H, D] -> [N, M, Vs] (+ zero pad).
    x3 = x.reshape(N, M, Vs).astype(jnp.float32)
    if vs_pad != Vs:
        x3 = jnp.pad(x3, ((0, 0), (0, 0), (0, vs_pad - Vs)))

    kernel = functools.partial(ensemble_kernel, num_modalities=M, hid=HID,
                               matmul_dtype=matmul_dtype)

    out3 = pl.pallas_call(
        kernel,
        out_shape=jax.ShapeDtypeStruct((N, C, vs_pad), out_dtype),
        grid=(N, n_tiles),
        in_specs=[
            pl.BlockSpec((pl.Squeezed(), M, tv), lambda n, i: (n, 0, i)),   # x
            pl.BlockSpec((M, HID, 1), lambda n, i: (0, 0, 0)),              # w1
            pl.BlockSpec((M, HID, 1), lambda n, i: (0, 0, 0)),              # b1
            pl.BlockSpec((M, C, HID), lambda n, i: (0, 0, 0)),              # w2t
            pl.BlockSpec((C, 1), lambda n, i: (0, 0)),                      # b2c
        ],
        out_specs=pl.BlockSpec((pl.Squeezed(), C, tv), lambda n, i: (n, 0, i)),
        compiler_params=pltpu.CompilerParams(
            dimension_semantics=("parallel", "parallel"),
            vmem_limit_bytes=48 * 1024 * 1024),
    )(x3, w1c, b1c, w2t, b2c)

    if vs_pad != Vs:
        out3 = out3[:, :, :Vs]
    # Pure reshape (no transpose): [N, C, Vs] -> [N, C, W, H, D]
    return out3.reshape(N, C, W, H, D)


# ----------------------------------------------------------------------------
# Pure-JAX reference (same math) for a correctness check
# ----------------------------------------------------------------------------
def ensemble_reference(x, params, channel=(), weights=None):
    w1, b1, w2, b2 = params["w1"], params["b1"], params["w2"], params["b2"]
    N, M, W, H, D = x.shape
    preserved = [m for m in range(M) if m not in channel]
    if weights is None:
        comb = {m: 1.0 / len(preserved) for m in preserved}
    else:
        s = jnp.sum(weights[jnp.asarray(preserved)])
        comb = {m: weights[m] / s for m in preserved}
    acc = 0.0
    for m in preserved:
        xm = x[:, m][..., None]                                   # [N,W,H,D,1]
        h = jax.nn.relu(xm * w1[m] + b1[m])                       # [N,W,H,D,HID]
        y = jnp.tensordot(h, w2[m], axes=([-1], [0])) + b2[m]     # [N,W,H,D,C]
        acc = acc + comb[m] * y
    return jnp.transpose(acc, (0, 4, 1, 2, 3))                    # [N,C,W,H,D]


if __name__ == "__main__":
    # Small shapes: batch=2, in_channels(modalities)=4, spatial 16^3,
    # hidden=32, out_channels=16.
    N, M, W, H, D = 2, 4, 16, 16, 16
    HID, C = 32, 16

    key = jax.random.PRNGKey(0)
    kx, k1, k2, k3, k4, kw = jax.random.split(key, 6)

    x = jax.random.normal(kx, (N, M, W, H, D), dtype=jnp.float32)

    # Deterministic per-modality ("modality_specific") parameters.
    params = {
        "w1": 0.5 * jax.random.normal(k1, (M, HID), dtype=jnp.float32),
        "b1": 0.1 * jax.random.normal(k2, (M, HID), dtype=jnp.float32),
        "w2": 0.25 * jax.random.normal(k3, (M, HID, C), dtype=jnp.float32),
        "b2": 0.1 * jax.random.normal(k4, (M, C), dtype=jnp.float32),
    }

    # Case 1: default — mean over all modalities (channel=(), weights=None).
    out_mean = ensemble_forward(x, params)
    jax.block_until_ready(out_mean)
    ref_mean = ensemble_reference(x, params)

    # Case 2: weighted ensemble with one dropped channel.
    wts = jnp.abs(jax.random.normal(kw, (M,), dtype=jnp.float32)) + 0.1
    out_w = ensemble_forward(x, params, channel=(1,), weights=wts)
    jax.block_until_ready(out_w)
    ref_w = ensemble_reference(x, params, channel=(1,), weights=wts)

    assert out_mean.shape == (N, C, W, H, D)
    assert jnp.allclose(out_mean, ref_mean, atol=1e-4, rtol=1e-4)
    assert jnp.allclose(out_w, ref_w, atol=1e-4, rtol=1e-4)

    # Case 3: bf16 MXU operands + bf16 output (bandwidth-optimized path);
    # bf16-appropriate tolerance, accumulation stays f32.
    out_bf = ensemble_forward(x, params, matmul_dtype=jnp.bfloat16,
                              out_dtype=jnp.bfloat16)
    jax.block_until_ready(out_bf)
    assert jnp.allclose(out_bf.astype(jnp.float32), ref_mean,
                        atol=5e-2, rtol=5e-2)

    print("KERNEL_OK")
</pallas_src>

<mosaic_0001>
module attributes {stable_mosaic.version = 11 : i64} {
  func.func @ensemble_kernel(%arg0: i32, %arg1: i32, %arg2: memref<1x4x4096xf32, #tpu.memory_space<vmem>>, %arg3: memref<4x32x1xf32, #tpu.memory_space<vmem>>, %arg4: memref<4x32x1xf32, #tpu.memory_space<vmem>>, %arg5: memref<4x16x32xf32, #tpu.memory_space<vmem>>, %arg6: memref<16x1xf32, #tpu.memory_space<vmem>>, %arg7: memref<1x16x4096xf32, #tpu.memory_space<vmem>>) attributes {dimension_semantics = [#tpu.dimension_semantics<parallel>, #tpu.dimension_semantics<parallel>], iteration_bounds = array<i64: 2, 1>, scalar_prefetch = 0 : i64, scratch_operands = 0 : i64, tpu.core_type = #tpu.core_type<tc>, window_params = [{transform_indices = @transform_0, window_bounds = array<i64: 1, 4, 4096>}, {pipeline_mode = #tpu.pipeline_mode<synchronous>, transform_indices = @transform_1, window_bounds = array<i64: 4, 32, 1>}, {pipeline_mode = #tpu.pipeline_mode<synchronous>, transform_indices = @transform_2, window_bounds = array<i64: 4, 32, 1>}, {pipeline_mode = #tpu.pipeline_mode<synchronous>, transform_indices = @transform_3, window_bounds = array<i64: 4, 16, 32>}, {pipeline_mode = #tpu.pipeline_mode<synchronous>, transform_indices = @transform_4, window_bounds = array<i64: 16, 1>}, {transform_indices = @transform_5, window_bounds = array<i64: 1, 16, 4096>}]} {
    %c0 = arith.constant 0 : index
    %c0_0 = arith.constant 0 : index
    %c0_1 = arith.constant 0 : index
    %0 = vector.load %arg2[%c0, %c0_0, %c0_1] : memref<1x4x4096xf32, #tpu.memory_space<vmem>>, vector<1x4x4096xf32>
    %1 = vector.shape_cast %0 : vector<1x4x4096xf32> to vector<4x4096xf32>
    %2 = vector.extract_strided_slice %1 {offsets = [0, 0], sizes = [1, 4096], strides = [1, 1]} : vector<4x4096xf32> to vector<1x4096xf32>
    %3 = vector.shape_cast %2 : vector<1x4096xf32> to vector<1x4096xf32>
    %4 = vector.broadcast %3 : vector<1x4096xf32> to vector<32x4096xf32>
    %c0_2 = arith.constant 0 : index
    %c0_3 = arith.constant 0 : index
    %c0_4 = arith.constant 0 : index
    %5 = vector.load %arg3[%c0_2, %c0_3, %c0_4] : memref<4x32x1xf32, #tpu.memory_space<vmem>>, vector<1x32x1xf32>
    %6 = vector.shape_cast %5 : vector<1x32x1xf32> to vector<32x1xf32>
    %c0_5 = arith.constant 0 : index
    %c0_6 = arith.constant 0 : index
    %c0_7 = arith.constant 0 : index
    %7 = vector.load %arg4[%c0_5, %c0_6, %c0_7] : memref<4x32x1xf32, #tpu.memory_space<vmem>>, vector<1x32x1xf32>
    %8 = vector.shape_cast %7 : vector<1x32x1xf32> to vector<32x1xf32>
    %9 = vector.broadcast %6 : vector<32x1xf32> to vector<32x4096xf32>
    %10 = arith.mulf %4, %9 : vector<32x4096xf32>
    %11 = vector.broadcast %8 : vector<32x1xf32> to vector<32x4096xf32>
    %12 = arith.addf %10, %11 : vector<32x4096xf32>
    %cst = arith.constant 0.000000e+00 : f32
    %13 = vector.broadcast %cst : f32 to vector<32x4096xf32>
    %14 = arith.maximumf %12, %13 : vector<32x4096xf32>
    %c0_8 = arith.constant 0 : index
    %c0_9 = arith.constant 0 : index
    %c0_10 = arith.constant 0 : index
    %15 = vector.load %arg5[%c0_8, %c0_9, %c0_10] : memref<4x16x32xf32, #tpu.memory_space<vmem>>, vector<1x16x32xf32>
    %16 = vector.shape_cast %15 : vector<1x16x32xf32> to vector<16x32xf32>
    %cst_11 = arith.constant dense<0.000000e+00> : vector<16x4096xf32>
    %17 = tpu.matmul %16, %14, %cst_11 {dimension_numbers = #tpu.dot_dimension_numbers<[1], [0], [0], [1], [0, 0, 1, 1], [], []>} : vector<16x32xf32>, vector<32x4096xf32>, vector<16x4096xf32> -> vector<16x4096xf32>
    %18 = vector.extract_strided_slice %1 {offsets = [1, 0], sizes = [1, 4096], strides = [1, 1]} : vector<4x4096xf32> to vector<1x4096xf32>
    %19 = vector.shape_cast %18 : vector<1x4096xf32> to vector<1x4096xf32>
    %20 = vector.broadcast %19 : vector<1x4096xf32> to vector<32x4096xf32>
    %c1 = arith.constant 1 : index
    %c0_12 = arith.constant 0 : index
    %c0_13 = arith.constant 0 : index
    %21 = vector.load %arg3[%c1, %c0_12, %c0_13] : memref<4x32x1xf32, #tpu.memory_space<vmem>>, vector<1x32x1xf32>
    %22 = vector.shape_cast %21 : vector<1x32x1xf32> to vector<32x1xf32>
    %c1_14 = arith.constant 1 : index
    %c0_15 = arith.constant 0 : index
    %c0_16 = arith.constant 0 : index
    %23 = vector.load %arg4[%c1_14, %c0_15, %c0_16] : memref<4x32x1xf32, #tpu.memory_space<vmem>>, vector<1x32x1xf32>
    %24 = vector.shape_cast %23 : vector<1x32x1xf32> to vector<32x1xf32>
    %25 = vector.broadcast %22 : vector<32x1xf32> to vector<32x4096xf32>
    %26 = arith.mulf %20, %25 : vector<32x4096xf32>
    %27 = vector.broadcast %24 : vector<32x1xf32> to vector<32x4096xf32>
    %28 = arith.addf %26, %27 : vector<32x4096xf32>
    %cst_17 = arith.constant 0.000000e+00 : f32
    %29 = vector.broadcast %cst_17 : f32 to vector<32x4096xf32>
    %30 = arith.maximumf %28, %29 : vector<32x4096xf32>
    %c1_18 = arith.constant 1 : index
    %c0_19 = arith.constant 0 : index
    %c0_20 = arith.constant 0 : index
    %31 = vector.load %arg5[%c1_18, %c0_19, %c0_20] : memref<4x16x32xf32, #tpu.memory_space<vmem>>, vector<1x16x32xf32>
    %32 = vector.shape_cast %31 : vector<1x16x32xf32> to vector<16x32xf32>
    %cst_21 = arith.constant dense<0.000000e+00> : vector<16x4096xf32>
    %33 = tpu.matmul %32, %30, %cst_21 {dimension_numbers = #tpu.dot_dimension_numbers<[1], [0], [0], [1], [0, 0, 1, 1], [], []>} : vector<16x32xf32>, vector<32x4096xf32>, vector<16x4096xf32> -> vector<16x4096xf32>
    %34 = arith.addf %17, %33 : vector<16x4096xf32>
    %35 = vector.extract_strided_slice %1 {offsets = [2, 0], sizes = [1, 4096], strides = [1, 1]} : vector<4x4096xf32> to vector<1x4096xf32>
    %36 = vector.shape_cast %35 : vector<1x4096xf32> to vector<1x4096xf32>
    %37 = vector.broadcast %36 : vector<1x4096xf32> to vector<32x4096xf32>
    %c2 = arith.constant 2 : index
    %c0_22 = arith.constant 0 : index
    %c0_23 = arith.constant 0 : index
    %38 = vector.load %arg3[%c2, %c0_22, %c0_23] : memref<4x32x1xf32, #tpu.memory_space<vmem>>, vector<1x32x1xf32>
    %39 = vector.shape_cast %38 : vector<1x32x1xf32> to vector<32x1xf32>
    %c2_24 = arith.constant 2 : index
    %c0_25 = arith.constant 0 : index
    %c0_26 = arith.constant 0 : index
    %40 = vector.load %arg4[%c2_24, %c0_25, %c0_26] : memref<4x32x1xf32, #tpu.memory_space<vmem>>, vector<1x32x1xf32>
    %41 = vector.shape_cast %40 : vector<1x32x1xf32> to vector<32x1xf32>
    %42 = vector.broadcast %39 : vector<32x1xf32> to vector<32x4096xf32>
    %43 = arith.mulf %37, %42 : vector<32x4096xf32>
    %44 = vector.broadcast %41 : vector<32x1xf32> to vector<32x4096xf32>
    %45 = arith.addf %43, %44 : vector<32x4096xf32>
    %cst_27 = arith.constant 0.000000e+00 : f32
    %46 = vector.broadcast %cst_27 : f32 to vector<32x4096xf32>
    %47 = arith.maximumf %45, %46 : vector<32x4096xf32>
    %c2_28 = arith.constant 2 : index
    %c0_29 = arith.constant 0 : index
    %c0_30 = arith.constant 0 : index
    %48 = vector.load %arg5[%c2_28, %c0_29, %c0_30] : memref<4x16x32xf32, #tpu.memory_space<vmem>>, vector<1x16x32xf32>
    %49 = vector.shape_cast %48 : vector<1x16x32xf32> to vector<16x32xf32>
    %cst_31 = arith.constant dense<0.000000e+00> : vector<16x4096xf32>
    %50 = tpu.matmul %49, %47, %cst_31 {dimension_numbers = #tpu.dot_dimension_numbers<[1], [0], [0], [1], [0, 0, 1, 1], [], []>} : vector<16x32xf32>, vector<32x4096xf32>, vector<16x4096xf32> -> vector<16x4096xf32>
    %51 = arith.addf %34, %50 : vector<16x4096xf32>
    %52 = vector.extract_strided_slice %1 {offsets = [3, 0], sizes = [1, 4096], strides = [1, 1]} : vector<4x4096xf32> to vector<1x4096xf32>
    %53 = vector.shape_cast %52 : vector<1x4096xf32> to vector<1x4096xf32>
    %54 = vector.broadcast %53 : vector<1x4096xf32> to vector<32x4096xf32>
    %c3 = arith.constant 3 : index
    %c0_32 = arith.constant 0 : index
    %c0_33 = arith.constant 0 : index
    %55 = vector.load %arg3[%c3, %c0_32, %c0_33] : memref<4x32x1xf32, #tpu.memory_space<vmem>>, vector<1x32x1xf32>
    %56 = vector.shape_cast %55 : vector<1x32x1xf32> to vector<32x1xf32>
    %c3_34 = arith.constant 3 : index
    %c0_35 = arith.constant 0 : index
    %c0_36 = arith.constant 0 : index
    %57 = vector.load %arg4[%c3_34, %c0_35, %c0_36] : memref<4x32x1xf32, #tpu.memory_space<vmem>>, vector<1x32x1xf32>
    %58 = vector.shape_cast %57 : vector<1x32x1xf32> to vector<32x1xf32>
    %59 = vector.broadcast %56 : vector<32x1xf32> to vector<32x4096xf32>
    %60 = arith.mulf %54, %59 : vector<32x4096xf32>
    %61 = vector.broadcast %58 : vector<32x1xf32> to vector<32x4096xf32>
    %62 = arith.addf %60, %61 : vector<32x4096xf32>
    %cst_37 = arith.constant 0.000000e+00 : f32
    %63 = vector.broadcast %cst_37 : f32 to vector<32x4096xf32>
    %64 = arith.maximumf %62, %63 : vector<32x4096xf32>
    %c3_38 = arith.constant 3 : index
    %c0_39 = arith.constant 0 : index
    %c0_40 = arith.constant 0 : index
    %65 = vector.load %arg5[%c3_38, %c0_39, %c0_40] : memref<4x16x32xf32, #tpu.memory_space<vmem>>, vector<1x16x32xf32>
    %66 = vector.shape_cast %65 : vector<1x16x32xf32> to vector<16x32xf32>
    %cst_41 = arith.constant dense<0.000000e+00> : vector<16x4096xf32>
    %67 = tpu.matmul %66, %64, %cst_41 {dimension_numbers = #tpu.dot_dimension_numbers<[1], [0], [0], [1], [0, 0, 1, 1], [], []>} : vector<16x32xf32>, vector<32x4096xf32>, vector<16x4096xf32> -> vector<16x4096xf32>
    %68 = arith.addf %51, %67 : vector<16x4096xf32>
    %c0_42 = arith.constant 0 : index
    %c0_43 = arith.constant 0 : index
    %69 = vector.load %arg6[%c0_42, %c0_43] : memref<16x1xf32, #tpu.memory_space<vmem>>, vector<16x1xf32>
    %70 = vector.broadcast %69 : vector<16x1xf32> to vector<16x4096xf32>
    %71 = arith.addf %68, %70 : vector<16x4096xf32>
    %c0_44 = arith.constant 0 : index
    %c0_45 = arith.constant 0 : index
    %c0_46 = arith.constant 0 : index
    %72 = vector.load %arg7[%c0_44, %c0_45, %c0_46] : memref<1x16x4096xf32, #tpu.memory_space<vmem>>, vector<1x16x4096xf32>
    %73 = vector.shape_cast %72 : vector<1x16x4096xf32> to vector<16x4096xf32>
    %74 = vector.shape_cast %71 : vector<16x4096xf32> to vector<1x16x4096xf32>
    tpu.vector_store %arg7[%c0_44, %c0_45, %c0_46], %74 {strides = array<i32>} : memref<1x16x4096xf32, #tpu.memory_space<vmem>>, vector<1x16x4096xf32>,
    return
  }
  func.func @transform_0(%arg0: i32, %arg1: i32) -> (i32, i32, i32) {
    %c0_i32 = arith.constant 0 : i32
    %c0_i32_0 = arith.constant 0 : i32
    return %arg0, %c0_i32, %arg1 : i32, i32, i32
  }
  func.func @transform_1(%arg0: i32, %arg1: i32) -> (i32, i32, i32) {
    %c0_i32 = arith.constant 0 : i32
    %c0_i32_0 = arith.constant 0 : i32
    %c0_i32_1 = arith.constant 0 : i32
    %c0_i32_2 = arith.constant 0 : i32
    return %c0_i32, %c0_i32_0, %c0_i32_1 : i32, i32, i32
  }
  func.func @transform_2(%arg0: i32, %arg1: i32) -> (i32, i32, i32) {
    %c0_i32 = arith.constant 0 : i32
    %c0_i32_0 = arith.constant 0 : i32
    %c0_i32_1 = arith.constant 0 : i32
    %c0_i32_2 = arith.constant 0 : i32
    return %c0_i32, %c0_i32_0, %c0_i32_1 : i32, i32, i32
  }
  func.func @transform_3(%arg0: i32, %arg1: i32) -> (i32, i32, i32) {
    %c0_i32 = arith.constant 0 : i32
    %c0_i32_0 = arith.constant 0 : i32
    %c0_i32_1 = arith.constant 0 : i32
    %c0_i32_2 = arith.constant 0 : i32
    return %c0_i32, %c0_i32_0, %c0_i32_1 : i32, i32, i32
  }
  func.func @transform_4(%arg0: i32, %arg1: i32) -> (i32, i32) {
    %c0_i32 = arith.constant 0 : i32
    %c0_i32_0 = arith.constant 0 : i32
    %c0_i32_1 = arith.constant 0 : i32
    return %c0_i32, %c0_i32_0 : i32, i32
  }
  func.func @transform_5(%arg0: i32, %arg1: i32) -> (i32, i32, i32) {
    %c0_i32 = arith.constant 0 : i32
    %c0_i32_0 = arith.constant 0 : i32
    return %arg0, %c0_i32, %arg1 : i32, i32, i32
  }
}

</mosaic_0001>

<bundles_post_ra>
// kernel: tpu_custom_call.1
= control target key start
LH: loop header
LB: loop body
LE: loop exit
PB: predicated region body
PF: predicated region fallthrough
CT: control target
= control target key end

     0   :  { %10 = vsyncpa [#allocation3], 0  ;;  %s12193_s0 = inlined_call_operand.vmem [shape: f32[2,4,4096], index: 0, kind: input, shape index: {}]   ;;  %s12194_s1 = inlined_call_operand.vmem [shape: f32[4,32,1], index: 1, kind: input, shape index: {}]   ;;  %s12195_s2 = inlined_call_operand.vmem [shape: f32[4,32,1], index: 2, kind: input, shape index: {}]   ;;  %s12196_s3 = inlined_call_operand.hbm [shape: f32[4,16,32], index: 3, kind: input, shape index: {}]   ;;  %s12197_s4 = inlined_call_operand.vmem [shape: f32[16,1], index: 4, kind: input, shape index: {}]   ;;  %s12198_s5 = inlined_call_operand.hbm [shape: f32[2,16,4096], index: 5, kind: output, shape index: {}]  }
   0x1   :  { %11 = vsyncpa [#allocation4], 0 }
   0x2   :  { %13 = vsyncpa [#allocation4 + $0x1], 0  ;;  %s9675_s18 = smov 0   ;;  %s9677_s19 = smov 0  }
   0x3   :  { %s9679_s20 = smov 0   ;;  %s9681_s21 = smov 0  }
   0x4   :  { %s9683_s22 = smov 0   ;;  %s9685_s23 = smov 0  }
   0x5 LB: > { %s8526_s24 = sadd.s32 4294967295, %s9635_s23   ;;  %s8527_s25 = sadd.s32 4294967294, %s9635_s23   ;;  %s9635_s23 = sphi %s9685_s23, %s19_s23   ;;  %s9631_s22 = sphi %s9683_s22, %s12262_s22   ;;  %s9627_s21 = sphi %s9681_s21, %s12261_s21   ;;  %s9623_s20 = sphi %s9679_s20, %s12260_s20   ;;  %s9619_s19 = sphi %s9677_s19, %s12259_s19   ;;  %s9615_s18 = sphi %s9675_s18, %s12258_s18  }
   0x6   : > { %s31_s26 = sadd.s32 1, %s9631_s22  ;;  %s152_s27 = sadd.s32 1, %s9623_s20 }
   0x7   : > { %p33_p0 = scmp.ge.s32.totalorder %s31_s26, 2  ;;  %p162_p1 = scmp.ne.s32.totalorder %s9623_s20, %s9619_s19 }
   0x8   : > { %p163_p2 = scmp.eq.s32.totalorder %s8526_s24, 1  ;;  %p168_p3 = scmp.ne.s32.totalorder %s9619_s19, %s9615_s18 }
   0x9   : > { %s12264_s26 = smov (%p33_p0, %s31_s26), 0  ;;  %p169_p5 = scmp.eq.s32.totalorder %s8527_s25, 1 }
   0xa   : > { %p9715_p4 = por %p163_p2, %p162_p1  ;;  %s147_s29 = ssub.s32 %s9631_s22, %s12264_s26 }
   0xb   : > { %p8528_p6 = scmp.ge.s32.totalorder %s9635_s23, 1  ;;  %p150_p7 = scmp.eq.s32.totalorder %s147_s29, 0 }
   0xc   : > { %s12221_s28 = scalar_select %p9715_p4, 1, 0 }
   0xd   : > { %p9722_p8 = por %p169_p5, %p168_p3  ;;  %p176_p9 = scmp.lt.s32.totalorder %s9635_s23, 3 }
   0xe   : > { %s9728_s6 = scalar_select %p150_p7, %s9623_s20, %s152_s27  }
   0xf   : > { %s12222_s30 = scalar_select %p9722_p8, 1, 0 }
  0x10   : > { %p9730_p10 = pnand %p8528_p6, %p176_p9  ;;  %p9734_p11 = scmp.eq.s32.totalorder %s8526_s24, 0 }
  0x11   : > { %s9637_s9 = smov [#allocation2]   ;;  %s9525_s14 = scalar_lea.hbm %s12196_s3, 1024 }
  0x12   : > { %s12223_s7 = scalar_select %p9730_p10, 1, 0 }
  0x13   : > { %s12224_s8 = scalar_select %p9734_p11, 1, 0 }
  0x14   : > { %p9405_p12 = pneg %p9730_p10  ;;  %s194_s10 = sshll.u32 %s9637_s9, 4  ;;  %s195_s10 = int_to_ptr.vmem [resolvable:$true] %s194_s10 }
  0x15   : > { %p9526_p0 = scmp.ne.s32.totalorder %s12196_s3, %s9525_s14  ;;  %p9532_p5 = scmp.lt.u32.totalorder %s9525_s14, %s12196_s3 }
  0x16   : > { %p9742_p13 = pnand %p9734_p11, %p9405_p12 }
  0x18   : > { %p9527_p1 = pneg %p9742_p13 }
  0x1a   : > { %p9528_p2 = pnand %p9527_p1, %p9526_p0 }
  0x1c   : > { %p9529_p3 = pneg %p9528_p2 }
  0x1e   : > { %p9534_p6 = pnand %p9532_p5, %p9529_p3 }
  0x20   : > { %9537 = shalt.err (!%p9534_p6)
}
  0x21   : > { %s9538_s25 = scalar_lea.vmem %s195_s10, 1024  ;;  %p9546_p8 = scmp.lt.s32.totalorder %s195_s10, %s195_s10 }
  0x22   : > { %p9539_p7 = scmp.ne.s32.totalorder %s195_s10, %s9538_s25  ;;  %p9547_p4 = scmp.lt.s32.totalorder %s9538_s25, %s9538_s25 }
  0x24   : > { %p9541_p9 = pnand %p9539_p7, %p9527_p1  ;;  %p9548_p11 = por %p9547_p4, %p9546_p8 }
  0x26   : > { %p9542_p12 = pneg %p9541_p9 }
  0x28   : > { %p9549_p10 = pnand %p9548_p11, %p9542_p12 }
  0x2a   : > { %9552 = shalt.err (!%p9549_p10)
}
  0x2b   : > { %s9638_s27 = smov 128   ;;  %s9639_s29 = smov 8  }
  0x2c   : > { %9408 = dma.hbm_to_vmem [thread:$0]  (!%p9742_p13), %s12196_s3, 1024, %s195_s10, [#allocation3], %s9638_s27, %s9638_s27, %s9639_s29  }
  0x2d   : > { %p12226_p0 = scmp.ne.s32.totalorder %s12223_s7, 0 }
  0x2f   : > { %226 = sbr.rel (%p12226_p0) target bundleno = 927 (0x39f), region = 40 }
  0x36   : > { %p12227_p2 = scmp.ne.s32.totalorder %s12224_s8, 0 }
  0x38   : > { %9606 = dma.done.wait (%p12227_p2), [#allocation3], 1024  }
  0x39   : > { %9608 = vsyncadd (%p12227_p2), [#allocation3], 4294966272  ;;  %v9640_v0 = vmov 0   ;;  %v8540_v1 = vld [vmem:[%s12195_s2 + $0x20] sm:$0xff]  ;;  %v8541_v3 = vld [vmem:[%s12195_s2 + $0x28] sm:$0xff]  ;;  %v12203_v15 = vmov 0.0   ;;  %v301_v36 = vlaneseq }
  0x3a   : > { %9472 = vset.pattern.permute.xlu1 %v9640_v0  ;;  %9471 = vset.pattern.permute.xlu0 %v9640_v0  ;;  %v8536_v2 = vld [vmem:[%s12194_s1 + $0x20] sm:$0xff]  ;;  %v8537_v4 = vld [vmem:[%s12194_s1 + $0x28] sm:$0xff]  ;;  %v8539_v5 = vld [vmem:[%s12194_s1 + $0x38] sm:$0xff]  ;;  %p259_p4 = scmp.lt.s32.totalorder %s9627_s21, 1  ;;  %vm1748_vm0 = vcmask 261120   ;;  %s255_s9 = sand.u32 1, %s9619_s19  }
  0x3b   : > { %1471 = vperm.xlu1 %9472, %v8540_v1   ;;  %1323 = vperm.xlu0 %9471, %v8536_v2   ;;  %v8538_v6 = vld [vmem:[%s12194_s1 + $0x30] sm:$0xff]  ;;  %v8543_v7 = vld [vmem:[%s12195_s2 + $0x38] sm:$0xff]  ;;  %v590_v9 = vld [vmem:[%s12194_s1 + $0x8] sm:$0xff]  ;;  %v9874_v37 = vshrl.u32 %v301_v36, 7  ;;  %s8533_s12 = sshll.u32 %s255_s9, 9  ;;  %s8694_s14 = sshll.u32 %s9627_s21, 13 }
  0x3c   : > { %v8542_v8 = vld [vmem:[%s12195_s2 + $0x30] sm:$0xff]  ;;  %v589_v10 = vld [vmem:[%s12194_s1] sm:$0xff]  ;;  %v594_v11 = vld [vmem:[%s12195_s2 + $0x8] sm:$0xff]  ;;  %1819 = vmatprep.mubr.f32.mxu0 %v12203_v15  ;;  %1896 = vmatprep.mubr.f32.mxu1 %v12203_v15  ;;  %s260_s17 = scalar_select %p259_p4, %s9627_s21, 1 }
  0x3d   : > { %v593_v12 = vld [vmem:[%s12195_s2] sm:$0xff]  ;;  %v592_v13 = vld [vmem:[%s12194_s1 + $0x18] sm:$0xff]  ;;  %v591_v14 = vld [vmem:[%s12194_s1 + $0x10] sm:$0xff]  ;;  %12228 = vst [vmem:[#allocation8_spill] sm:$0xff] %v9874_v37  ;;  %v9882_v38 = vsub.s32 1, %v9874_v37  ;;  %v9885_v39 = vsub.s32 5, %v9874_v37  ;;  %s12137_s21 = scalar_lea.hbm %s12198_s5, %s8694_s14 }
  0x3e   : > { %v596_v16 = vld [vmem:[%s12195_s2 + $0x18] sm:$0xff]  ;;  %v595_v17 = vld [vmem:[%s12195_s2 + $0x10] sm:$0xff]  ;;  %v8609_v18 = vld [vmem:[%s12194_s1 + $0x48] sm:$0xff]  ;;  %s8693_s24 = sshll.u32 %s260_s17, 7  ;;  %v9915_v52 = vsub.s32 0, %v9874_v37  ;;  %v10003_v36 = vsub.s32 4, %v9874_v37 }
  0x3f   : > { %1476 = vperm.xlu1 %9472, %v8541_v3   ;;  %1328 = vperm.xlu0 %9471, %v8537_v4   ;;  %v8608_v19 = vld [vmem:[%s12194_s1 + $0x40] sm:$0xff]  ;;  %v8613_v20 = vld [vmem:[%s12195_s2 + $0x48] sm:$0xff]  ;;  %v8611_v22 = vld [vmem:[%s12194_s1 + $0x58] sm:$0xff]  ;;  %s9879_s29 = scalar_lea.vmem %s12193_s0, %s8693_s24  ;;  %s12006_s13 = scalar_lea.vmem [#allocation5], %s8533_s12 }
  0x40   : > { %v8612_v21 = vld [vmem:[%s12195_s2 + $0x40] sm:$0xff]  ;;  %v8610_v23 = vld [vmem:[%s12194_s1 + $0x50] sm:$0xff]  ;;  %v8615_v24 = vld [vmem:[%s12195_s2 + $0x58] sm:$0xff]  ;;  %12230 = vst [vmem:[#allocation10_spill] sm:$0xff] %v9915_v52  ;;  %s8435_s11 = sshll.u32 %s12006_s13, 4  ;;  %s12147_s10 = scalar_lea.sflag [#allocation4], %s255_s9  ;;  %s12139_s11 = int_to_ptr.vmem [resolvable:$true] %s8435_s11 }
  0x41   : > { %v8614_v25 = vld [vmem:[%s12195_s2 + $0x50] sm:$0xff]  ;;  %v8649_v26 = vld [vmem:[%s12194_s1 + $0x68] sm:$0xff]  ;;  %v8648_v27 = vld [vmem:[%s12194_s1 + $0x60] sm:$0xff]  ;;  %12231 = vst [vmem:[#allocation11_spill] sm:$0xff] %v10003_v36  ;;  %s9553_s16 = scalar_lea.vmem %s12139_s11, 8192  ;;  %p12256_p10 = scmp.ne.s32.totalorder %s12221_s28, 0 }
  0x42   : > { %v8653_v28 = vld [vmem:[%s12195_s2 + $0x68] sm:$0xff]  ;;  %v8652_v29 = vld [vmem:[%s12195_s2 + $0x60] sm:$0xff]  ;;  %v8651_v30 = vld [vmem:[%s12194_s1 + $0x78] sm:$0xff]  ;;  %p9554_p8 = scmp.ne.s32.totalorder %s12139_s11, %s9553_s16  ;;  %s9642_s8 = smov [#allocation5]  }
  0x43   : > { %1338 = vperm.xlu1 %9472, %v8539_v5   ;;  %1333 = vperm.xlu0 %9471, %v8538_v6   ;;  %v8650_v31 = vld [vmem:[%s12194_s1 + $0x70] sm:$0xff]  ;;  %v8655_v32 = vld [vmem:[%s12195_s2 + $0x78] sm:$0xff]  ;;  %v8280_v34 = vld [vmem:[%s12197_s4 + $0x8] sm:$0xff]  ;;  %s9557_s17 = sshll.u32 %s9642_s8, 4  ;;  %s9558_s17 = int_to_ptr.vmem [resolvable:$false] %s9557_s17 }
  0x44   : > { %v8654_v33 = vld [vmem:[%s12195_s2 + $0x70] sm:$0xff]  ;;  %v8279_v35 = vld [vmem:[%s12197_s4] sm:$0xff]  ;;  %v9891_v41 = vld [vmem:[%s9879_s29 + $0x8] sm:$0xff]  ;;  %p9555_p11 = pnand %p9554_p8, %p12256_p10  ;;  %s9559_s24 = scalar_lea.vmem %s9558_s17, 16384 }
  0x45   : > { %v9888_v40 = vld [vmem:[%s9879_s29] sm:$0xff]  ;;  %v9894_v42 = vld [vmem:[%s9879_s29 + $0x10] sm:$0xff]  ;;  %v9897_v43 = vld [vmem:[%s9879_s29 + $0x18] sm:$0xff]  ;;  %v1038_v45 = vrot.slane %v9891_v41, %v9885_v39  ;;  %v1034_v47 = vrot.slane %v9891_v41, %v9882_v38  ;;  %p9560_p1 = scmp.lt.s32.totalorder %s12139_s11, %s9558_s17  ;;  %p9561_p3 = scmp.lt.s32.totalorder %s9559_s24, %s9553_s16 }
  0x46   : > { %12229 = vst [vmem:[#allocation9_spill] sm:$0xff] %v9897_v43  ;;  %v1030_v44 = vrot.slane %v9888_v40, %v9885_v39  ;;  %v1026_v46 = vrot.slane %v9888_v40, %v9882_v38  ;;  %v1046_v48 = vrot.slane %v9894_v42, %v9885_v39  ;;  %v1054_v49 = vrot.slane %v9897_v43, %v9885_v39  ;;  %v273_v51 = vld [vmem:[%s9879_s29 + $0x20] sm:$0xff]  ;;  %v274_v53 = vld [vmem:[%s9879_s29 + $0x28] sm:$0xff]  ;;  %v275_v58 = vld [vmem:[%s9879_s29 + $0x30] sm:$0xff]  ;;  %p9556_p13 = pneg %p9555_p11 }
  0x47   : > { %1486 = vperm.xlu1 %9472, %v8543_v7   ;;  %1481 = vperm.xlu0 %9471, %v8542_v8   ;;  %v1042_v50 = vrot.slane %v9894_v42, %v9882_v38  ;;  %v9922_v55 = vrot.slane %v1038_v45, %v9882_v38  ;;  %v1050_v57 = vrot.slane %v9897_v43, %v9882_v38  ;;  %v276_v59 = vld [vmem:[%s9879_s29 + $0x38] sm:$0xff]  ;;  %v277_v0 = vld [vmem:[%s9879_s29 + $0x40] sm:$0xff]  ;;  %v278_v1 = vld [vmem:[%s9879_s29 + $0x48] sm:$0xff]  ;;  %p9562_p5 = por %p9561_p3, %p9560_p1 }
  0x48   : > { %v9919_v54 = vrot.slane %v1030_v44, %v9882_v38  ;;  %v9925_v56 = vrot.slane %v1026_v46, %v9882_v38  ;;  %v9932_v60 = vrot.slane %v1034_v47, %v9882_v38  ;;  %v9935_v61 = vrot.slane %v1046_v48, %v9882_v38  ;;  %v279_v6 = vld [vmem:[%s9879_s29 + $0x50] sm:$0xff]  ;;  %v280_v7 = vld [vmem:[%s9879_s29 + $0x58] sm:$0xff] }
  0x49   : > { %v9938_v62 = vrot.slane %v1054_v49, %v9882_v38  ;;  %v1062_v63 = vrot.slane %v273_v51, %v9885_v39  ;;  %v9944_v2 = vrot.slane %v1042_v50, %v9882_v38  ;;  %v1070_v3 = vrot.slane %v274_v53, %v9885_v39  ;;  %p9563_p6 = pnand %p9562_p5, %p9556_p13 }
  0x4a   : > { %v1058_v4 = vrot.slane %v273_v51, %v9882_v38  ;;  %v1066_v5 = vrot.slane %v274_v53, %v9882_v38  ;;  %v1078_v8 = vrot.slane %v275_v58, %v9885_v39  ;;  %v1114_v47 = vrot.slane %v280_v7, %v9882_v38 }
  0x4b   : > { %604 = vperm.xlu1 %9472, %v590_v9   ;;  %599 = vperm.xlu0 %9471, %v589_v10   ;;  %v1086_v9 = vrot.slane %v276_v59, %v9885_v39  ;;  %v1074_v10 = vrot.slane %v275_v58, %v9882_v38 }
  0x4f   : > { %752 = vperm.xlu1 %9472, %v594_v11   ;;  %747 = vperm.xlu0 %9471, %v593_v12   ;;  %v1082_v11 = vrot.slane %v276_v59, %v9882_v38  ;;  %v9956_v12 = vrot.slane %v1050_v57, %v9882_v38 }
  0x53   : > { %614 = vperm.xlu1 %9472, %v592_v13   ;;  %609 = vperm.xlu0 %9471, %v591_v14   ;;  %v1094_v13 = vrot.slane %v277_v0, %v9885_v39  ;;  %v1102_v14 = vrot.slane %v278_v1, %v9885_v39 }
  0x57   : > { %762 = vperm.xlu1 %9472, %v596_v16   ;;  %757 = vperm.xlu0 %9471, %v595_v17   ;;  %v1090_v16 = vrot.slane %v277_v0, %v9882_v38  ;;  %v9962_v17 = vrot.slane %v1062_v63, %v9882_v38  ;;  %v308_v0 = vrot.slane %v9888_v40, %v10003_v36 }
  0x5b   : > { %4530 = vperm.xlu1 %9472, %v8609_v18   ;;  %4525 = vperm.xlu0 %9471, %v8608_v19   ;;  %v1098_v18 = vrot.slane %v278_v1, %v9882_v38  ;;  %v1110_v19 = vrot.slane %v279_v6, %v9885_v39  ;;  %v316_v1 = vrot.slane %v9891_v41, %v10003_v36 }
  0x5d   : > { %v10006_v44 = vrot.slane %v1098_v18, %v9882_v38  ;;  %v10009_v45 = vrot.slane %v1110_v19, %v9882_v38 }
  0x5f   : > { %4678 = vperm.xlu1 %9472, %v8613_v20   ;;  %4673 = vperm.xlu0 %9471, %v8612_v21   ;;  %v1118_v20 = vrot.slane %v280_v7, %v9885_v39  ;;  %v9968_v21 = vrot.slane %v1070_v3, %v9882_v38  ;;  %v304_v3 = vrot.slane %v9888_v40, %v9915_v52 }
  0x61   : > { %v10012_v46 = vrot.slane %v1118_v20, %v9882_v38  ;;  %v10074_v18 = vrot.slane %v304_v3, %v9915_v52 }
  0x63   : > { %4540 = vperm.xlu1 %9472, %v8611_v22   ;;  %4535 = vperm.xlu0 %9471, %v8610_v23   ;;  %v9971_v22 = vrot.slane %v1058_v4, %v9882_v38  ;;  %v9974_v23 = vrot.slane %v1066_v5, %v9882_v38  ;;  %v10033_v4 = vrot.slane %v1114_v47, %v9882_v38 }
  0x64   : > { %v312_v5 = vrot.slane %v9891_v41, %v9915_v52  ;;  %12236 = vst [vmem:[#allocation16_spill] sm:$0xff] %v10074_v18 }
  0x67   : > { %4688 = vperm.xlu1 %9472, %v8615_v24   ;;  %4683 = vperm.xlu0 %9471, %v8614_v25   ;;  %v1106_v24 = vrot.slane %v279_v6, %v9882_v38  ;;  %v9978_v25 = vrot.slane %v1078_v8, %v9882_v38  ;;  %v332_v6 = vrot.slane %v9897_v43, %v10003_v36 }
  0x69   : > { %v10016_v48 = vrot.slane %v1106_v24, %v9882_v38  ;;  %v10081_v24 = vrot.slane %v312_v5, %v9915_v52 }
  0x6b   : > { %6557 = vperm.xlu1 %9472, %v8649_v26   ;;  %6552 = vperm.xlu0 %9471, %v8648_v27   ;;  %v9981_v26 = vrot.slane %v1086_v9, %v9882_v38  ;;  %v9984_v27 = vrot.slane %v1074_v10, %v9882_v38  ;;  %v320_v9 = vrot.slane %v9894_v42, %v9915_v52 }
  0x6c   : > { %12237 = vst [vmem:[#allocation17_spill] sm:$0xff] %v10081_v24 }
  0x6f   : > { %6705 = vperm.xlu1 %9472, %v8653_v28   ;;  %6700 = vperm.xlu0 %9471, %v8652_v29   ;;  %v9987_v28 = vrot.slane %v1082_v11, %v9882_v38  ;;  %v281_v29 = vld [vmem:[%s9879_s29 + $0x60] sm:$0xff] }
  0x70   : > { %v1126_v49 = vrot.slane %v281_v29, %v9885_v39  ;;  %v1122_v51 = vrot.slane %v281_v29, %v9882_v38 }
  0x72   : > { %v10042_v7 = vrot.slane %v1126_v49, %v9882_v38  ;;  %v10048_v40 = vrot.slane %v1122_v51, %v9882_v38 }
  0x73   : > { %6567 = vperm.xlu1 %9472, %v8651_v30   ;;  %6562 = vperm.xlu0 %9471, %v8650_v31   ;;  %v282_v30 = vld [vmem:[%s9879_s29 + $0x68] sm:$0xff]  ;;  %v9992_v31 = vrot.slane %v1094_v13, %v9882_v38 }
  0x74   : > { %v1134_v50 = vrot.slane %v282_v30, %v9885_v39  ;;  %v1130_v53 = vrot.slane %v282_v30, %v9882_v38  ;;  %v10090_v30 = vrot.slane %v320_v9, %v9915_v52 }
  0x76   : > { %v10045_v8 = vrot.slane %v1134_v50, %v9882_v38  ;;  %v10053_v41 = vrot.slane %v1130_v53, %v9882_v38  ;;  %12240 = vst [vmem:[#allocation20_spill] sm:$0xff] %v10090_v30 }
  0x77   : > { %6715 = vperm.xlu1 %9472, %v8655_v32   ;;  %6710 = vperm.xlu0 %9471, %v8654_v33   ;;  %v9995_v32 = vrot.slane %v1102_v14, %v9882_v38  ;;  %v9998_v33 = vrot.slane %v1090_v16, %v9882_v38  ;;  %v10068_v16 = vrot.slane %v308_v0, %v9915_v52 }
  0x79   : > { %12234 = vst [vmem:[#allocation14_spill] sm:$0xff] %v10068_v16 }
  0x7b   : > { %8288 = vperm.xlu1 %9472, %v8280_v34   ;;  %8283 = vperm.xlu0 %9471, %v8279_v35   ;;  %v283_v34 = vld [vmem:[%s9879_s29 + $0x70] sm:$0xff]  ;;  %v284_v35 = vld [vmem:[%s9879_s29 + $0x78] sm:$0xff] }
  0x7c   : > { %v1142_v57 = vrot.slane %v283_v34, %v9885_v39  ;;  %v1150_v58 = vrot.slane %v284_v35, %v9885_v39  ;;  %v1138_v59 = vrot.slane %v283_v34, %v9882_v38  ;;  %v1146_v63 = vrot.slane %v284_v35, %v9882_v38 }
  0x7d   : > { %v324_v39 = vrot.slane %v9894_v42, %v10003_v36  ;;  %v10071_v42 = vrot.slane %v316_v1, %v9915_v52 }
  0x7e   : > { %v10056_v10 = vrot.slane %v1142_v57, %v9882_v38  ;;  %v10059_v11 = vrot.slane %v1150_v58, %v9882_v38  ;;  %v10062_v13 = vrot.slane %v1138_v59, %v9882_v38  ;;  %v10065_v14 = vrot.slane %v1146_v63, %v9882_v38 }
  0x7f   : > { %12235 = vst [vmem:[#allocation15_spill] sm:$0xff] %v10071_v42  ;;  %v10084_v29 = vrot.slane %v324_v39, %v9915_v52  ;;  %v10087_v38 = vrot.slane %v332_v6, %v9915_v52 }
  0x80   : > { %12232 = vst [vmem:[#allocation12_spill] sm:$0xff] %v10062_v13  ;;  %12233 = vst [vmem:[#allocation13_spill] sm:$0xff] %v10065_v14 }
  0x81   : > { %12238 = vst [vmem:[#allocation18_spill] sm:$0xff] %v10084_v29  ;;  %12239 = vst [vmem:[#allocation19_spill] sm:$0xff] %v10087_v38 }
  0xba   : > { %v10076_v19 = vpop.permute.xlu1 %1471  ;;  %v10078_v20 = vpop.permute.xlu0 %1323 }
  0xbb   : > { %v1342_v34 = vmul.f32 %v10078_v20, %v9919_v54  ;;  %v1344_v35 = vmul.f32 %v10078_v20, %v9922_v55  ;;  %v1341_v47 = vmul.f32 %v10078_v20, %v9925_v56  ;;  %v1343_v49 = vmul.f32 %v10078_v20, %v9932_v60 }
  0xbc   : > { %v1346_v50 = vmul.f32 %v10078_v20, %v9935_v61  ;;  %v1348_v51 = vmul.f32 %v10078_v20, %v9938_v62  ;;  %v1345_v53 = vmul.f32 %v10078_v20, %v9944_v2  ;;  %v1347_v57 = vmul.f32 %v10078_v20, %v9956_v12 }
  0xbd   : > { %v1490_v58 = vadd.f32 %v10076_v19, %v1342_v34  ;;  %v1492_v59 = vadd.f32 %v10076_v19, %v1344_v35  ;;  %v1489_v63 = vadd.f32 %v10076_v19, %v1341_v47  ;;  %v1491_v0 = vadd.f32 %v10076_v19, %v1343_v49 }
  0xbe   : > { %v10112_v1 = vpop.permute.xlu1 %1476  ;;  %v10114_v3 = vpop.permute.xlu0 %1328  ;;  %v10117_v5 = vadd.f32 %v10076_v19, %v1346_v50  ;;  %v10120_v39 = vadd.f32 %v10076_v19, %v1348_v51  ;;  %v10123_v6 = vadd.f32 %v10076_v19, %v1345_v53  ;;  %v10132_v49 = vadd.f32 %v10076_v19, %v1347_v57 }
  0xbf   : > { %v1374_v34 = vmul.f32 %v10114_v3, %v9919_v54  ;;  %v1618_v35 = vmax.f32 %v1490_v58, 0.0  ;;  %v1376_v47 = vmul.f32 %v10114_v3, %v9922_v55  ;;  %v1620_v50 = vmax.f32 %v1492_v59, 0.0 }
  0xc0   : > { %v1373_v51 = vmul.f32 %v10114_v3, %v9925_v56  ;;  %v1617_v15 = vmax.f32 %v1489_v63, 0.0  ;;  %v1375_v53 = vmul.f32 %v10114_v3, %v9932_v60  ;;  %v1619_v36 = vmax.f32 %v1491_v0, 0.0 }
  0xc1   : > { %v1522_v9 = vadd.f32 %v10112_v1, %v1374_v34  ;;  %v1524_v37 = vadd.f32 %v10112_v1, %v1376_v47  ;;  %v1378_v58 = vmul.f32 %v10114_v3, %v9935_v61  ;;  %v1622_v63 = vmax.f32 %v10117_v5, 0.0 }
  0xc2   : > { %v10142_v43 = vpop.permute.xlu1 %1338  ;;  %v10144_v57 = vpop.permute.xlu0 %1333  ;;  %v1521_v59 = vadd.f32 %v10112_v1, %v1373_v51  ;;  %v1523_v52 = vadd.f32 %v10112_v1, %v1375_v53  ;;  %v1380_v30 = vmul.f32 %v10114_v3, %v9938_v62 }
  0xc3   : > { %v1650_v34 = vmax.f32 %v1522_v9, 0.0  ;;  %v1652_v38 = vmax.f32 %v1524_v37, 0.0  ;;  %v1406_v0 = vmul.f32 %v10144_v57, %v9919_v54  ;;  %v1438_v47 = vmul.f32 %v10142_v43, %v9919_v54 }
  0xc4   : > { %v1649_v29 = vmax.f32 %v1521_v59, 0.0  ;;  %v1651_v24 = vmax.f32 %v1523_v52, 0.0  ;;  %v1408_v51 = vmul.f32 %v10144_v57, %v9922_v55  ;;  %v1440_v53 = vmul.f32 %v10142_v43, %v9922_v55 }
  0xc5   : > { %v8695_v5 = vpack.c.bf16 %v1650_v34, %v1618_v35  ;;  %v8703_v18 = vpack.c.bf16 %v1652_v38, %v1620_v50  ;;  %v1405_v9 = vmul.f32 %v10144_v57, %v9925_v56  ;;  %v1437_v37 = vmul.f32 %v10142_v43, %v9925_v56 }
  0xc6   : > { %v10163_v42 = vpop.permute.xlu1 %1486  ;;  %v10165_v16 = vpop.permute.xlu0 %1481  ;;  %v8697_v54 = vpack.c.bf16 %v1649_v29, %v1617_v15  ;;  %v8705_v52 = vpack.c.bf16 %v1651_v24, %v1619_v36  ;;  %v1407_v59 = vmul.f32 %v10144_v57, %v9932_v60  ;;  %v1439_v55 = vmul.f32 %v10142_v43, %v9932_v60 }
  0xc7   : > { %8696 = vmatprep.subr.bf16.mxu0 %v8695_v5  ;;  %8704 = vmatprep.subr.bf16.mxu1 %v8703_v18  ;;  %v1554_v38 = vadd.f32 %v10165_v16, %v1406_v0  ;;  %v1586_v35 = vadd.f32 %v10163_v42, %v1438_v47  ;;  %v1556_v56 = vadd.f32 %v10165_v16, %v1408_v51  ;;  %v1624_v50 = vmax.f32 %v10120_v39, 0.0 }
  0xc8   : > { %8698 = vmatpush1.bf16.msra.mxu0 %v8697_v54  ;;  %8706 = vmatpush1.bf16.msra.mxu1 %v8705_v52  ;;  %v1588_v15 = vadd.f32 %v10163_v42, %v1440_v53  ;;  %v1553_v36 = vadd.f32 %v10165_v16, %v1405_v9  ;;  %v1585_v24 = vadd.f32 %v10163_v42, %v1437_v37  ;;  %v1621_v60 = vmax.f32 %v10123_v6, 0.0 }
  0xc9   : > { %v1682_v18 = vmax.f32 %v1554_v38, 0.0  ;;  %v1714_v29 = vmax.f32 %v1586_v35, 0.0  ;;  %v1684_v34 = vmax.f32 %v1556_v56, 0.0  ;;  %v1555_v0 = vadd.f32 %v10165_v16, %v1407_v59 }
  0xca   : > { %v1716_v47 = vmax.f32 %v1588_v15, 0.0  ;;  %v1681_v51 = vmax.f32 %v1553_v36, 0.0  ;;  %v1713_v5 = vmax.f32 %v1585_v24, 0.0  ;;  %v1587_v39 = vadd.f32 %v10163_v42, %v1439_v55 }
  0xcb   : > { %v8699_v54 = vpack.c.bf16 %v1714_v29, %v1682_v18  ;;  %v1683_v52 = vmax.f32 %v1555_v0, 0.0  ;;  %v1526_v53 = vadd.f32 %v10112_v1, %v1378_v58  ;;  %v1528_v9 = vadd.f32 %v10112_v1, %v1380_v30  ;;  %v10193_v18 = vld [vmem:[#allocation2 + $0x10] sm:$0xff] }
  0xcc   : > { %v8707_v14 = vpack.c.bf16 %v1716_v47, %v1684_v34  ;;  %v8701_v37 = vpack.c.bf16 %v1713_v5, %v1681_v51  ;;  %v1715_v13 = vmax.f32 %v1587_v39, 0.0  ;;  %v1377_v6 = vmul.f32 %v10114_v3, %v9944_v2 }
  0xcd   : > { %8700 = vmatprep.subr.bf16.mxu0 %v8699_v54  ;;  %v1654_v38 = vmax.f32 %v1526_v53, 0.0  ;;  %v1656_v59 = vmax.f32 %v1528_v9, 0.0  ;;  %v1379_v35 = vmul.f32 %v10114_v3, %v9956_v12  ;;  %v1410_v55 = vmul.f32 %v10144_v57, %v9935_v61  ;;  %v10213_v53 = vld [vmem:[#allocation2 + $0x18] sm:$0xff] }
  0xce   : > { %8708 = vmatprep.subr.bf16.mxu1 %v8707_v14  ;;  %8702 = vmatpush1.bf16.msra.mxu0 %v8701_v37  ;;  %v8709_v58 = vpack.c.bf16 %v1715_v13, %v1683_v52  ;;  %v1525_v30 = vadd.f32 %v10112_v1, %v1377_v6  ;;  %v1623_v56 = vmax.f32 %v10132_v49, 0.0  ;;  %v1442_v15 = vmul.f32 %v10142_v43, %v9935_v61 }
  0xcf   : > { %v8711_v36 = vpack.c.bf16 %v1654_v38, %v1622_v63  ;;  %v8719_v24 = vpack.c.bf16 %v1656_v59, %v1624_v50  ;;  %v1527_v29 = vadd.f32 %v10112_v1, %v1379_v35  ;;  %v1558_v34 = vadd.f32 %v10165_v16, %v1410_v55 }
  0xd0   : > { %8710 = vmatpush1.bf16.msra.mxu1 %v8709_v58  ;;  %v1653_v0 = vmax.f32 %v1525_v30, 0.0  ;;  %v1590_v14 = vadd.f32 %v10163_v42, %v1442_v15  ;;  %v1412_v13 = vmul.f32 %v10144_v57, %v9938_v62  ;;  %v1444_v49 = vmul.f32 %v10142_v43, %v9938_v62 }
  0xd1   : > { %8712 = vmatprep.subr.bf16.mxu0 %v8711_v36  ;;  %8720 = vmatprep.subr.bf16.mxu1 %v8719_v24  ;;  %v1655_v61 = vmax.f32 %v1527_v29, 0.0  ;;  %v1686_v63 = vmax.f32 %v1558_v34, 0.0  ;;  %v1409_v50 = vmul.f32 %v10144_v57, %v9944_v2  ;;  %v1441_v47 = vmul.f32 %v10142_v43, %v9944_v2 }
  0xd2   : > { %8544 = vmatmul.mubr.msk.f32.vlgmr.msra.gmra.mrb[0].mxu0 %vm1748_vm0, %v10193_v18  ;;  %v8713_v51 = vpack.c.bf16 %v1653_v0, %v1621_v60  ;;  %v1718_v5 = vmax.f32 %v1590_v14, 0.0  ;;  %v1560_v39 = vadd.f32 %v10165_v16, %v1412_v13  ;;  %v1592_v54 = vadd.f32 %v10163_v42, %v1444_v49 }
  0xd3   : > { %8546 = vmatmul.mubr.msk.f32.vlgmr.msra.gmra.mrb[0].mxu1 %vm1748_vm0, %v10193_v18  ;;  %v8721_v62 = vpack.c.bf16 %v1655_v61, %v1623_v56  ;;  %v12241_v52 = vmov 0.0   ;;  %v1557_v9 = vadd.f32 %v10165_v16, %v1409_v50  ;;  %v1589_v2 = vadd.f32 %v10163_v42, %v1441_v47 }
  0xd4   : > { %1825 = vmatprep.mubr.f32.mxu0 %v12241_v52  ;;  %8714 = vmatpush1.bf16.msra.mxu0 %v8713_v51  ;;  %v8715_v37 = vpack.c.bf16 %v1718_v5, %v1686_v63  ;;  %v1688_v60 = vmax.f32 %v1560_v39, 0.0  ;;  %v1720_v6 = vmax.f32 %v1592_v54, 0.0  ;;  %v1411_v38 = vmul.f32 %v10144_v57, %v9956_v12 }
  0xd5   : > { %1902 = vmatprep.mubr.f32.mxu1 %v12241_v52  ;;  %8722 = vmatpush1.bf16.msra.mxu1 %v8721_v62  ;;  %v1685_v59 = vmax.f32 %v1557_v9, 0.0  ;;  %v1717_v35 = vmax.f32 %v1589_v2, 0.0  ;;  %v1443_v55 = vmul.f32 %v10142_v43, %v9956_v12  ;;  %v1350_v58 = vmul.f32 %v10078_v20, %v9962_v17 }
  0xd6   : > { %8716 = vmatprep.subr.bf16.mxu0 %v8715_v37  ;;  %v8723_v30 = vpack.c.bf16 %v1720_v6, %v1688_v60  ;;  %8545 = vmatmul.mubr.msk.f32.gmra.mrb[2].mxu0 %vm1748_vm0, %v10213_v53  ;;  %v1559_v56 = vadd.f32 %v10165_v16, %v1411_v38  ;;  %v1382_v15 = vmul.f32 %v10114_v3, %v9962_v17 }
  0xd7   : > { %8547 = vmatmul.mubr.msk.f32.gmra.mrb[2].mxu1 %vm1748_vm0, %v10213_v53  ;;  %v8717_v36 = vpack.c.bf16 %v1717_v35, %v1685_v59  ;;  %v1591_v24 = vadd.f32 %v10163_v42, %v1443_v55  ;;  %v1498_v12 = vadd.f32 %v10076_v19, %v1350_v58  ;;  %v1352_v29 = vmul.f32 %v10078_v20, %v9968_v21 }
  0xd8   : > { %8724 = vmatprep.subr.bf16.mxu1 %v8723_v30  ;;  %v1687_v34 = vmax.f32 %v1559_v56, 0.0  ;;  %v1530_v0 = vadd.f32 %v10112_v1, %v1382_v15  ;;  %v1384_v14 = vmul.f32 %v10114_v3, %v9968_v21  ;;  %1973 = vmatprep.mubr.f32.mxu0 %v12241_v52  ;;  %v1349_v13 = vmul.f32 %v10078_v20, %v9971_v22 }
  0xd9   : > { %8718 = vmatpush1.bf16.msra.mxu0 %v8717_v36  ;;  %v1719_v49 = vmax.f32 %v1591_v24, 0.0  ;;  %v1626_v61 = vmax.f32 %v1498_v12, 0.0  ;;  %v1500_v63 = vadd.f32 %v10076_v19, %v1352_v29  ;;  %2050 = vmatprep.mubr.f32.mxu1 %v12241_v52  ;;  %v1381_v50 = vmul.f32 %v10114_v3, %v9971_v22 }
  0xda   : > { %v1658_v47 = vmax.f32 %v1530_v0, 0.0  ;;  %v1532_v51 = vadd.f32 %v10112_v1, %v1384_v14  ;;  %v1497_v5 = vadd.f32 %v10076_v19, %v1349_v13  ;;  %v1351_v39 = vmul.f32 %v10078_v20, %v9974_v23 }
  0xdb   : > { %v8725_v54 = vpack.c.bf16 %v1719_v49, %v1687_v34  ;;  %v1628_v62 = vmax.f32 %v1500_v63, 0.0  ;;  %v1529_v9 = vadd.f32 %v10112_v1, %v1381_v50  ;;  %v1383_v2 = vmul.f32 %v10114_v3, %v9974_v23 }
  0xdc   : > { %v8727_v37 = vpack.c.bf16 %v1658_v47, %v1626_v61  ;;  %v1660_v60 = vmax.f32 %v1532_v51, 0.0  ;;  %8548 = vmatmul.mubr.msk.f32.vlgmr.msra.gmra.mrb[4].mxu0 %vm1748_vm0, %v10193_v18  ;;  %v1625_v6 = vmax.f32 %v1497_v5, 0.0  ;;  %v1499_v38 = vadd.f32 %v10076_v19, %v1351_v39 }
  0xdd   : > { %8726 = vmatpush1.bf16.msra.mxu1 %v8725_v54  ;;  %v1657_v59 = vmax.f32 %v1529_v9, 0.0  ;;  %v1531_v35 = vadd.f32 %v10112_v1, %v1383_v2  ;;  %v1414_v55 = vmul.f32 %v10144_v57, %v9962_v17  ;;  %v1446_v58 = vmul.f32 %v10142_v43, %v9962_v17  ;;  %1979 = vmatprep.mubr.f32.mxu0 %v12241_v52 }
  0xde   : > { %8728 = vmatprep.subr.bf16.mxu0 %v8727_v37  ;;  %v8735_v30 = vpack.c.bf16 %v1660_v60, %v1628_v62  ;;  %v1627_v56 = vmax.f32 %v1499_v38, 0.0  ;;  %v1416_v15 = vmul.f32 %v10144_v57, %v9968_v21  ;;  %v1448_v36 = vmul.f32 %v10142_v43, %v9968_v21 }
  0xdf   : > { %v8729_v24 = vpack.c.bf16 %v1657_v59, %v1625_v6  ;;  %v1659_v12 = vmax.f32 %v1531_v35, 0.0  ;;  %v1562_v29 = vadd.f32 %v10165_v16, %v1414_v55  ;;  %v1594_v34 = vadd.f32 %v10163_v42, %v1446_v58 }
  0xe0   : > { %8736 = vmatprep.subr.bf16.mxu1 %v8735_v30  ;;  %8550 = vmatmul.mubr.msk.f32.vlgmr.msra.gmra.mrb[4].mxu1 %vm1748_vm0, %v10193_v18  ;;  %v1564_v17 = vadd.f32 %v10165_v16, %v1416_v15  ;;  %v1596_v0 = vadd.f32 %v10163_v42, %v1448_v36  ;;  %v1413_v14 = vmul.f32 %v10144_v57, %v9971_v22 }
  0xe1   : > { %8730 = vmatpush1.bf16.msra.mxu0 %v8729_v24  ;;  %v8737_v13 = vpack.c.bf16 %v1659_v12, %v1627_v56  ;;  %v1690_v21 = vmax.f32 %v1562_v29, 0.0  ;;  %v1722_v49 = vmax.f32 %v1594_v34, 0.0  ;;  %2056 = vmatprep.mubr.f32.mxu1 %v12241_v52  ;;  %v1445_v61 = vmul.f32 %v10142_v43, %v9971_v22 }
  0xe2   : > { %v1692_v63 = vmax.f32 %v1564_v17, 0.0  ;;  %v1724_v50 = vmax.f32 %v1596_v0, 0.0  ;;  %8549 = vmatmul.mubr.msk.f32.gmra.mrb[6].mxu0 %vm1748_vm0, %v10213_v53  ;;  %v1561_v47 = vadd.f32 %v10165_v16, %v1413_v14  ;;  %v1415_v51 = vmul.f32 %v10144_v57, %v9974_v23 }
  0xe3   : > { %8738 = vmatpush1.bf16.msra.mxu1 %v8737_v13  ;;  %v8731_v5 = vpack.c.bf16 %v1722_v49, %v1690_v21  ;;  %v1593_v39 = vadd.f32 %v10163_v42, %v1445_v61  ;;  %v1447_v54 = vmul.f32 %v10142_v43, %v9974_v23  ;;  %v1354_v22 = vmul.f32 %v10078_v20, %v9978_v25 }
  0xe4   : > { %v8739_v62 = vpack.c.bf16 %v1724_v50, %v1692_v63  ;;  %8551 = vmatmul.mubr.msk.f32.gmra.mrb[6].mxu1 %vm1748_vm0, %v10213_v53  ;;  %v1689_v9 = vmax.f32 %v1561_v47, 0.0  ;;  %v1563_v2 = vadd.f32 %v10165_v16, %v1415_v51  ;;  %v1386_v37 = vmul.f32 %v10114_v3, %v9978_v25  ;;  %2127 = vmatprep.mubr.f32.mxu0 %v12241_v52 }
  0xe5   : > { %8732 = vmatprep.subr.bf16.mxu0 %v8731_v5  ;;  %v1721_v60 = vmax.f32 %v1593_v39, 0.0  ;;  %v1595_v6 = vadd.f32 %v10163_v42, %v1447_v54  ;;  %v1502_v23 = vadd.f32 %v10076_v19, %v1354_v22  ;;  %v1356_v38 = vmul.f32 %v10078_v20, %v9981_v26  ;;  %2204 = vmatprep.mubr.f32.mxu1 %v12241_v52 }
  0xe6   : > { %8740 = vmatprep.subr.bf16.mxu1 %v8739_v62  ;;  %v1691_v59 = vmax.f32 %v1563_v2, 0.0  ;;  %v1534_v35 = vadd.f32 %v10112_v1, %v1386_v37  ;;  %v1388_v55 = vmul.f32 %v10114_v3, %v9981_v26  ;;  %v1353_v58 = vmul.f32 %v10078_v20, %v9984_v27 }
  0xe7   : > { %v8733_v30 = vpack.c.bf16 %v1721_v60, %v1689_v9  ;;  %v1723_v56 = vmax.f32 %v1595_v6, 0.0  ;;  %v1630_v15 = vmax.f32 %v1502_v23, 0.0  ;;  %v1504_v36 = vadd.f32 %v10076_v19, %v1356_v38 }
  0xe8   : > { %v1662_v24 = vmax.f32 %v1534_v35, 0.0  ;;  %v1536_v12 = vadd.f32 %v10112_v1, %v1388_v55  ;;  %v1385_v29 = vmul.f32 %v10114_v3, %v9984_v27  ;;  %v1501_v34 = vadd.f32 %v10076_v19, %v1353_v58 }
  0xe9   : > { %8734 = vmatpush1.bf16.msra.mxu0 %v8733_v30  ;;  %v8741_v17 = vpack.c.bf16 %v1723_v56, %v1691_v59  ;;  %v1632_v0 = vmax.f32 %v1504_v36, 0.0  ;;  %v1355_v14 = vmul.f32 %v10078_v20, %v9987_v28  ;;  %v1387_v13 = vmul.f32 %v10114_v3, %v9987_v28 }
  0xea   : > { %v8743_v21 = vpack.c.bf16 %v1662_v24, %v1630_v15  ;;  %v1664_v49 = vmax.f32 %v1536_v12, 0.0  ;;  %v1533_v61 = vadd.f32 %v10112_v1, %v1385_v29  ;;  %v1629_v63 = vmax.f32 %v1501_v34, 0.0 }
  0xeb   : > { %8742 = vmatpush1.bf16.msra.mxu1 %v8741_v17  ;;  %v1503_v50 = vadd.f32 %v10076_v19, %v1355_v14  ;;  %v1535_v47 = vadd.f32 %v10112_v1, %v1387_v13  ;;  %v1418_v51 = vmul.f32 %v10144_v57, %v9978_v25  ;;  %v1450_v5 = vmul.f32 %v10142_v43, %v9978_v25 }
  0xec   : > { %8744 = vmatprep.subr.bf16.mxu0 %v8743_v21  ;;  %v8751_v39 = vpack.c.bf16 %v1664_v49, %v1632_v0  ;;  %8552 = vmatmul.mubr.msk.f32.vlgmr.msra.gmra.mrb[8].mxu0 %vm1748_vm0, %v10193_v18  ;;  %v1661_v54 = vmax.f32 %v1533_v61, 0.0  ;;  %v1420_v22 = vmul.f32 %v10144_v57, %v9981_v26  ;;  %v1452_v62 = vmul.f32 %v10142_v43, %v9981_v26 }
  0xed   : > { %v1631_v9 = vmax.f32 %v1503_v50, 0.0  ;;  %v1663_v2 = vmax.f32 %v1535_v47, 0.0  ;;  %v1566_v37 = vadd.f32 %v10165_v16, %v1418_v51  ;;  %v1598_v60 = vadd.f32 %v10163_v42, %v1450_v5  ;;  %2133 = vmatprep.mubr.f32.mxu0 %v12241_v52 }
  0xee   : > { %8752 = vmatprep.subr.bf16.mxu1 %v8751_v39  ;;  %8554 = vmatmul.mubr.msk.f32.vlgmr.msra.gmra.mrb[8].mxu1 %vm1748_vm0, %v10193_v18  ;;  %v8745_v25 = vpack.c.bf16 %v1661_v54, %v1629_v63  ;;  %v1568_v6 = vadd.f32 %v10165_v16, %v1420_v22  ;;  %v1600_v23 = vadd.f32 %v10163_v42, %v1452_v62 }
  0xef   : > { %v8753_v38 = vpack.c.bf16 %v1663_v2, %v1631_v9  ;;  %v1694_v59 = vmax.f32 %v1566_v37, 0.0  ;;  %v1726_v26 = vmax.f32 %v1598_v60, 0.0  ;;  %2210 = vmatprep.mubr.f32.mxu1 %v12241_v52  ;;  %v1417_v35 = vmul.f32 %v10144_v57, %v9984_v27 }
  0xf0   : > { %8746 = vmatpush1.bf16.msra.mxu0 %v8745_v25  ;;  %v1696_v55 = vmax.f32 %v1568_v6, 0.0  ;;  %v1728_v58 = vmax.f32 %v1600_v23, 0.0  ;;  %v1449_v30 = vmul.f32 %v10142_v43, %v9984_v27  ;;  %v1419_v56 = vmul.f32 %v10144_v57, %v9987_v28 }
  0xf1   : > { %8754 = vmatpush1.bf16.msra.mxu1 %v8753_v38  ;;  %v8747_v15 = vpack.c.bf16 %v1726_v26, %v1694_v59  ;;  %8553 = vmatmul.mubr.msk.f32.gmra.mrb[10].mxu0 %vm1748_vm0, %v10213_v53  ;;  %v1565_v36 = vadd.f32 %v10165_v16, %v1417_v35  ;;  %v1451_v24 = vmul.f32 %v10142_v43, %v9987_v28 }
  0xf2   : > { %v8755_v12 = vpack.c.bf16 %v1728_v58, %v1696_v55  ;;  %8555 = vmatmul.mubr.msk.f32.gmra.mrb[10].mxu1 %vm1748_vm0, %v10213_v53  ;;  %v1597_v29 = vadd.f32 %v10163_v42, %v1449_v30  ;;  %v1567_v27 = vadd.f32 %v10165_v16, %v1419_v56  ;;  %v1358_v34 = vmul.f32 %v10078_v20, %v9992_v31 }
  0xf3   : > { %8748 = vmatprep.subr.bf16.mxu0 %v8747_v15  ;;  %v1693_v17 = vmax.f32 %v1565_v36, 0.0  ;;  %v1599_v0 = vadd.f32 %v10163_v42, %v1451_v24  ;;  %v1390_v14 = vmul.f32 %v10114_v3, %v9992_v31  ;;  %v1360_v28 = vmul.f32 %v10078_v20, %v9995_v32  ;;  %2281 = vmatprep.mubr.f32.mxu0 %v12241_v52 }
  0xf4   : > { %8756 = vmatprep.subr.bf16.mxu1 %v8755_v12  ;;  %v1725_v13 = vmax.f32 %v1597_v29, 0.0  ;;  %v1695_v21 = vmax.f32 %v1567_v27, 0.0  ;;  %v1506_v49 = vadd.f32 %v10076_v19, %v1358_v34  ;;  %v1392_v61 = vmul.f32 %v10114_v3, %v9995_v32  ;;  %2358 = vmatprep.mubr.f32.mxu1 %v12241_v52 }
  0xf5   : > { %v1727_v63 = vmax.f32 %v1599_v0, 0.0  ;;  %v1538_v50 = vadd.f32 %v10112_v1, %v1390_v14  ;;  %v1508_v47 = vadd.f32 %v10076_v19, %v1360_v28  ;;  %v1357_v51 = vmul.f32 %v10078_v20, %v9998_v33 }
  0xf6   : > { %v8749_v5 = vpack.c.bf16 %v1725_v13, %v1693_v17  ;;  %v1634_v39 = vmax.f32 %v1506_v49, 0.0  ;;  %v1540_v54 = vadd.f32 %v10112_v1, %v1392_v61  ;;  %v1389_v22 = vmul.f32 %v10114_v3, %v9998_v33 }
  0xf7   : > { %v8757_v62 = vpack.c.bf16 %v1727_v63, %v1695_v21  ;;  %v1666_v9 = vmax.f32 %v1538_v50, 0.0  ;;  %v1636_v2 = vmax.f32 %v1508_v47, 0.0  ;;  %v1505_v37 = vadd.f32 %v10076_v19, %v1357_v51 }
  0xf8   : > { %8750 = vmatpush1.bf16.msra.mxu0 %v8749_v5  ;;  %v1668_v60 = vmax.f32 %v1540_v54, 0.0  ;;  %v1537_v25 = vadd.f32 %v10112_v1, %v1389_v22  ;;  %v1359_v6 = vmul.f32 %v10078_v20, %v10006_v44  ;;  %v1391_v23 = vmul.f32 %v10114_v3, %v10006_v44 }
  0xf9   : > { %8758 = vmatpush1.bf16.msra.mxu1 %v8757_v62  ;;  %v8759_v38 = vpack.c.bf16 %v1666_v9, %v1634_v39  ;;  %v1633_v59 = vmax.f32 %v1505_v37, 0.0  ;;  %v1422_v26 = vmul.f32 %v10144_v57, %v9992_v31  ;;  %v1454_v35 = vmul.f32 %v10142_v43, %v9992_v31 }
  0xfa   : > { %v8767_v55 = vpack.c.bf16 %v1668_v60, %v1636_v2  ;;  %v1665_v58 = vmax.f32 %v1537_v25, 0.0  ;;  %v1507_v30 = vadd.f32 %v10076_v19, %v1359_v6  ;;  %v1539_v56 = vadd.f32 %v10112_v1, %v1391_v23 }
  0xfb   : > { %8760 = vmatprep.subr.bf16.mxu0 %v8759_v38  ;;  %8556 = vmatmul.mubr.msk.f32.vlgmr.msra.gmra.mrb[12].mxu0 %vm1748_vm0, %v10193_v18  ;;  %v1570_v15 = vadd.f32 %v10165_v16, %v1422_v26  ;;  %v1602_v36 = vadd.f32 %v10163_v42, %v1454_v35  ;;  %v1424_v24 = vmul.f32 %v10144_v57, %v9995_v32 }
  0xfc   : > { %8768 = vmatprep.subr.bf16.mxu1 %v8767_v55  ;;  %8558 = vmatmul.mubr.msk.f32.vlgmr.msra.gmra.mrb[12].mxu1 %vm1748_vm0, %v10193_v18  ;;  %v8761_v31 = vpack.c.bf16 %v1665_v58, %v1633_v59  ;;  %v1635_v12 = vmax.f32 %v1507_v30, 0.0  ;;  %v1667_v29 = vmax.f32 %v1539_v56, 0.0  ;;  %v1456_v27 = vmul.f32 %v10142_v43, %v9995_v32 }
  0xfd   : > { %v1698_v34 = vmax.f32 %v1570_v15, 0.0  ;;  %v1730_v17 = vmax.f32 %v1602_v36, 0.0  ;;  %v1572_v0 = vadd.f32 %v10165_v16, %v1424_v24  ;;  %2287 = vmatprep.mubr.f32.mxu0 %v12241_v52  ;;  %2364 = vmatprep.mubr.f32.mxu1 %v12241_v52  ;;  %v1421_v14 = vmul.f32 %v10144_v57, %v9998_v33 }
  0xfe   : > { %8762 = vmatpush1.bf16.msra.mxu0 %v8761_v31  ;;  %v8769_v28 = vpack.c.bf16 %v1667_v29, %v1635_v12  ;;  %v1604_v13 = vadd.f32 %v10163_v42, %v1456_v27  ;;  %v1453_v21 = vmul.f32 %v10142_v43, %v9998_v33  ;;  %v1423_v32 = vmul.f32 %v10144_v57, %v10006_v44 }
  0xff   : > { %v8763_v49 = vpack.c.bf16 %v1730_v17, %v1698_v34  ;;  %v1700_v61 = vmax.f32 %v1572_v0, 0.0  ;;  %8557 = vmatmul.mubr.msk.f32.gmra.mrb[14].mxu0 %vm1748_vm0, %v10213_v53  ;;  %v1569_v63 = vadd.f32 %v10165_v16, %v1421_v14  ;;  %v1455_v50 = vmul.f32 %v10142_v43, %v10006_v44 }
 0x100   : > { %8770 = vmatpush1.bf16.msra.mxu1 %v8769_v28  ;;  %v1732_v47 = vmax.f32 %v1604_v13, 0.0  ;;  %v1601_v51 = vadd.f32 %v10163_v42, %v1453_v21  ;;  %v1571_v5 = vadd.f32 %v10165_v16, %v1423_v32  ;;  %v1362_v33 = vmul.f32 %v10078_v20, %v10009_v45  ;;  %2435 = vmatprep.mubr.f32.mxu0 %v12241_v52 }
 0x101   : > { %8764 = vmatprep.subr.bf16.mxu0 %v8763_v49  ;;  %8559 = vmatmul.mubr.msk.f32.gmra.mrb[14].mxu1 %vm1748_vm0, %v10213_v53  ;;  %v1697_v39 = vmax.f32 %v1569_v63, 0.0  ;;  %v1603_v54 = vadd.f32 %v10163_v42, %v1455_v50  ;;  %v1394_v44 = vmul.f32 %v10114_v3, %v10009_v45  ;;  %v1364_v22 = vmul.f32 %v10078_v20, %v10012_v46 }
 0x102   : > { %v8771_v62 = vpack.c.bf16 %v1732_v47, %v1700_v61  ;;  %v1729_v9 = vmax.f32 %v1601_v51, 0.0  ;;  %v1699_v2 = vmax.f32 %v1571_v5, 0.0  ;;  %v1510_v37 = vadd.f32 %v10076_v19, %v1362_v33  ;;  %2512 = vmatprep.mubr.f32.mxu1 %v12241_v52 }
 0x103   : > { %v1731_v60 = vmax.f32 %v1603_v54, 0.0  ;;  %v1542_v25 = vadd.f32 %v10112_v1, %v1394_v44  ;;  %v1396_v6 = vmul.f32 %v10114_v3, %v10012_v46  ;;  %v1512_v23 = vadd.f32 %v10076_v19, %v1364_v22 }
 0x104   : > { %8772 = vmatprep.subr.bf16.mxu1 %v8771_v62  ;;  %v8765_v38 = vpack.c.bf16 %v1729_v9, %v1697_v39  ;;  %v1638_v59 = vmax.f32 %v1510_v37, 0.0  ;;  %v1361_v26 = vmul.f32 %v10078_v20, %v10016_v48  ;;  %v1393_v35 = vmul.f32 %v10114_v3, %v10016_v48 }
 0x105   : > { %v8773_v55 = vpack.c.bf16 %v1731_v60, %v1699_v2  ;;  %v1670_v58 = vmax.f32 %v1542_v25, 0.0  ;;  %v1544_v30 = vadd.f32 %v10112_v1, %v1396_v6  ;;  %v1640_v56 = vmax.f32 %v1512_v23, 0.0 }
 0x106   : > { %8766 = vmatpush1.bf16.msra.mxu0 %v8765_v38  ;;  %v1509_v15 = vadd.f32 %v10076_v19, %v1361_v26  ;;  %v1541_v36 = vadd.f32 %v10112_v1, %v1393_v35  ;;  %v1363_v24 = vmul.f32 %v10078_v20, %v10033_v4  ;;  %v1395_v31 = vmul.f32 %v10114_v3, %v10033_v4 }
 0x107   : > { %8774 = vmatpush1.bf16.msra.mxu1 %v8773_v55  ;;  %v8775_v12 = vpack.c.bf16 %v1670_v58, %v1638_v59  ;;  %v1672_v29 = vmax.f32 %v1544_v30, 0.0  ;;  %v1426_v27 = vmul.f32 %v10144_v57, %v10009_v45  ;;  %v1458_v34 = vmul.f32 %v10142_v43, %v10009_v45 }
 0x108   : > { %v1637_v17 = vmax.f32 %v1509_v15, 0.0  ;;  %v1669_v0 = vmax.f32 %v1541_v36, 0.0  ;;  %v1511_v14 = vadd.f32 %v10076_v19, %v1363_v24  ;;  %v1543_v28 = vadd.f32 %v10112_v1, %v1395_v31 }
 0x109   : > { %8776 = vmatprep.subr.bf16.mxu0 %v8775_v12  ;;  %v8783_v13 = vpack.c.bf16 %v1672_v29, %v1640_v56  ;;  %8560 = vmatmul.mubr.msk.f32.vlgmr.msra.gmra.mrb[16].mxu0 %vm1748_vm0, %v10193_v18  ;;  %v1574_v21 = vadd.f32 %v10165_v16, %v1426_v27  ;;  %v1606_v32 = vadd.f32 %v10163_v42, %v1458_v34 }
 0x10a   : > { %8562 = vmatmul.mubr.msk.f32.vlgmr.msra.gmra.mrb[16].mxu1 %vm1748_vm0, %v10193_v18  ;;  %v8777_v49 = vpack.c.bf16 %v1669_v0, %v1637_v17  ;;  %v1639_v45 = vmax.f32 %v1511_v14, 0.0  ;;  %v1671_v61 = vmax.f32 %v1543_v28, 0.0  ;;  %v1428_v63 = vmul.f32 %v10144_v57, %v10012_v46  ;;  %2441 = vmatprep.mubr.f32.mxu0 %v12241_v52 }
 0x10b   : > { %8784 = vmatprep.subr.bf16.mxu1 %v8783_v13  ;;  %v1702_v50 = vmax.f32 %v1574_v21, 0.0  ;;  %v1734_v47 = vmax.f32 %v1606_v32, 0.0  ;;  %v1460_v51 = vmul.f32 %v10142_v43, %v10012_v46  ;;  %2518 = vmatprep.mubr.f32.mxu1 %v12241_v52  ;;  %v1425_v5 = vmul.f32 %v10144_v57, %v10016_v48 }
 0x10c   : > { %8778 = vmatpush1.bf16.msra.mxu0 %v8777_v49  ;;  %v8785_v33 = vpack.c.bf16 %v1671_v61, %v1639_v45  ;;  %v1576_v39 = vadd.f32 %v10165_v16, %v1428_v63  ;;  %v1457_v54 = vmul.f32 %v10142_v43, %v10016_v48  ;;  %v1427_v44 = vmul.f32 %v10144_v57, %v10033_v4 }
 0x10d   : > { %v8779_v22 = vpack.c.bf16 %v1734_v47, %v1702_v50  ;;  %v1608_v62 = vadd.f32 %v10163_v42, %v1460_v51  ;;  %8561 = vmatmul.mubr.msk.f32.gmra.mrb[18].mxu0 %vm1748_vm0, %v10213_v53  ;;  %v1573_v46 = vadd.f32 %v10165_v16, %v1425_v5  ;;  %v1459_v9 = vmul.f32 %v10142_v43, %v10033_v4 }
 0x10e   : > { %8786 = vmatpush1.bf16.msra.mxu1 %v8785_v33  ;;  %v1704_v2 = vmax.f32 %v1576_v39, 0.0  ;;  %v1605_v37 = vadd.f32 %v10163_v42, %v1457_v54  ;;  %v1575_v48 = vadd.f32 %v10165_v16, %v1427_v44  ;;  %v1366_v60 = vmul.f32 %v10078_v20, %v10042_v7  ;;  %2589 = vmatprep.mubr.f32.mxu0 %v12241_v52 }
 0x10f   : > { %8780 = vmatprep.subr.bf16.mxu0 %v8779_v22  ;;  %v1736_v25 = vmax.f32 %v1608_v62, 0.0  ;;  %8563 = vmatmul.mubr.msk.f32.gmra.mrb[18].mxu1 %vm1748_vm0, %v10213_v53  ;;  %v1701_v6 = vmax.f32 %v1573_v46, 0.0  ;;  %v1607_v23 = vadd.f32 %v10163_v42, %v1459_v9  ;;  %v1398_v4 = vmul.f32 %v10114_v3, %v10042_v7 }
 0x110   : > { %v1733_v38 = vmax.f32 %v1605_v37, 0.0  ;;  %v1703_v59 = vmax.f32 %v1575_v48, 0.0  ;;  %v1514_v26 = vadd.f32 %v10076_v19, %v1366_v60  ;;  %v1368_v35 = vmul.f32 %v10078_v20, %v10045_v8  ;;  %2666 = vmatprep.mubr.f32.mxu1 %v12241_v52 }
 0x111   : > { %v8787_v55 = vpack.c.bf16 %v1736_v25, %v1704_v2  ;;  %v1735_v58 = vmax.f32 %v1607_v23, 0.0  ;;  %v1546_v30 = vadd.f32 %v10112_v1, %v1398_v4  ;;  %v1400_v56 = vmul.f32 %v10114_v3, %v10045_v8 }
 0x112   : > { %v8781_v15 = vpack.c.bf16 %v1733_v38, %v1701_v6  ;;  %v1642_v36 = vmax.f32 %v1514_v26, 0.0  ;;  %v1516_v24 = vadd.f32 %v10076_v19, %v1368_v35  ;;  %v1365_v31 = vmul.f32 %v10078_v20, %v10048_v40 }
 0x113   : > { %8788 = vmatprep.subr.bf16.mxu1 %v8787_v55  ;;  %v8789_v12 = vpack.c.bf16 %v1735_v58, %v1703_v59  ;;  %v1674_v29 = vmax.f32 %v1546_v30, 0.0  ;;  %v1548_v27 = vadd.f32 %v10112_v1, %v1400_v56  ;;  %v1397_v34 = vmul.f32 %v10114_v3, %v10048_v40  ;;  %v10533_v58 = vpop.permute.xlu0 %599 }
 0x114   : > { %8782 = vmatpush1.bf16.msra.mxu0 %v8781_v15  ;;  %v1644_v17 = vmax.f32 %v1516_v24, 0.0  ;;  %v1513_v0 = vadd.f32 %v10076_v19, %v1365_v31  ;;  %v1367_v14 = vmul.f32 %v10078_v20, %v10053_v41  ;;  %v1399_v28 = vmul.f32 %v10114_v3, %v10053_v41  ;;  %v10539_v24 = vpop.permute.xlu1 %604 }
 0x115   : > { %8790 = vmatpush1.bf16.msra.mxu1 %v8789_v12  ;;  %v8791_v13 = vpack.c.bf16 %v1674_v29, %v1642_v36  ;;  %v1676_v21 = vmax.f32 %v1548_v27, 0.0  ;;  %v1545_v32 = vadd.f32 %v10112_v1, %v1397_v34  ;;  %v1430_v49 = vmul.f32 %v10144_v57, %v10042_v7 }
 0x116   : > { %v1641_v45 = vmax.f32 %v1513_v0, 0.0  ;;  %v1515_v61 = vadd.f32 %v10076_v19, %v1367_v14  ;;  %v1547_v63 = vadd.f32 %v10112_v1, %v1399_v28  ;;  %v1462_v50 = vmul.f32 %v10142_v43, %v10042_v7  ;;  %v12242_v14 = vld [vmem:[#allocation12_spill] sm:$0xff] }
 0x117   : > { %8792 = vmatprep.subr.bf16.mxu0 %v8791_v13  ;;  %v8799_v47 = vpack.c.bf16 %v1676_v21, %v1644_v17  ;;  %8564 = vmatmul.mubr.msk.f32.vlgmr.msra.gmra.mrb[20].mxu0 %vm1748_vm0, %v10193_v18  ;;  %v1673_v51 = vmax.f32 %v1545_v32, 0.0  ;;  %v1578_v5 = vadd.f32 %v10165_v16, %v1430_v49  ;;  %v1432_v33 = vmul.f32 %v10144_v57, %v10045_v8 }
 0x118   : > { %8566 = vmatmul.mubr.msk.f32.vlgmr.msra.gmra.mrb[20].mxu1 %vm1748_vm0, %v10193_v18  ;;  %v1643_v39 = vmax.f32 %v1515_v61, 0.0  ;;  %v1675_v54 = vmax.f32 %v1547_v63, 0.0  ;;  %v1610_v44 = vadd.f32 %v10163_v42, %v1462_v50  ;;  %v1464_v7 = vmul.f32 %v10142_v43, %v10045_v8  ;;  %2595 = vmatprep.mubr.f32.mxu0 %v12241_v52  ;;  %v12243_v63 = vld [vmem:[#allocation13_spill] sm:$0xff] }
 0x119   : > { %8800 = vmatprep.subr.bf16.mxu1 %v8799_v47  ;;  %v8793_v22 = vpack.c.bf16 %v1673_v51, %v1641_v45  ;;  %v1706_v62 = vmax.f32 %v1578_v5, 0.0  ;;  %v1580_v46 = vadd.f32 %v10165_v16, %v1432_v33  ;;  %2672 = vmatprep.mubr.f32.mxu1 %v12241_v52  ;;  %v1429_v9 = vmul.f32 %v10144_v57, %v10048_v40 }
 0x11a   : > { %v8801_v2 = vpack.c.bf16 %v1675_v54, %v1643_v39  ;;  %v1738_v37 = vmax.f32 %v1610_v44, 0.0  ;;  %v1612_v48 = vadd.f32 %v10163_v42, %v1464_v7  ;;  %v1461_v60 = vmul.f32 %v10142_v43, %v10048_v40  ;;  %v10558_v54 = vpop.permute.xlu0 %747 }
 0x11b   : > { %8794 = vmatpush1.bf16.msra.mxu0 %v8793_v22  ;;  %v1708_v8 = vmax.f32 %v1580_v46, 0.0  ;;  %v1577_v25 = vadd.f32 %v10165_v16, %v1429_v9  ;;  %v1431_v6 = vmul.f32 %v10144_v57, %v10053_v41  ;;  %v1463_v23 = vmul.f32 %v10142_v43, %v10053_v41 }
 0x11c   : > { %8802 = vmatpush1.bf16.msra.mxu1 %v8801_v2  ;;  %v8795_v4 = vpack.c.bf16 %v1738_v37, %v1706_v62  ;;  %v1740_v38 = vmax.f32 %v1612_v48, 0.0  ;;  %8565 = vmatmul.mubr.msk.f32.gmra.mrb[22].mxu0 %vm1748_vm0, %v10213_v53  ;;  %v1609_v59 = vadd.f32 %v10163_v42, %v1461_v60  ;;  %v1370_v40 = vmul.f32 %v10078_v20, %v10056_v10  ;;  %v10564_v62 = vpop.permute.xlu1 %752 }
 0x11d   : > { %8567 = vmatmul.mubr.msk.f32.gmra.mrb[22].mxu1 %vm1748_vm0, %v10213_v53  ;;  %v1705_v26 = vmax.f32 %v1577_v25, 0.0  ;;  %v1579_v35 = vadd.f32 %v10165_v16, %v1431_v6  ;;  %v1611_v55 = vadd.f32 %v10163_v42, %v1463_v23  ;;  %v1402_v41 = vmul.f32 %v10114_v3, %v10056_v10  ;;  %2743 = vmatprep.mubr.f32.mxu0 %v12241_v52 }
 0x11e   : > { %8796 = vmatprep.subr.bf16.mxu0 %v8795_v4  ;;  %v8803_v30 = vpack.c.bf16 %v1740_v38, %v1708_v8  ;;  %v1737_v56 = vmax.f32 %v1609_v59, 0.0  ;;  %v1518_v15 = vadd.f32 %v10076_v19, %v1370_v40  ;;  %v1372_v36 = vmul.f32 %v10078_v20, %v10059_v11  ;;  %2820 = vmatprep.mubr.f32.mxu1 %v12241_v52 }
 0x11f   : > { %v1707_v31 = vmax.f32 %v1579_v35, 0.0  ;;  %v1739_v12 = vmax.f32 %v1611_v55, 0.0  ;;  %v1550_v29 = vadd.f32 %v10112_v1, %v1402_v41  ;;  %v1404_v27 = vmul.f32 %v10114_v3, %v10059_v11 }
 0x120   : > { %8804 = vmatprep.subr.bf16.mxu1 %v8803_v30  ;;  %v8797_v34 = vpack.c.bf16 %v1737_v56, %v1705_v26  ;;  %v1646_v17 = vmax.f32 %v1518_v15, 0.0  ;;  %v1520_v0 = vadd.f32 %v10076_v19, %v1372_v36  ;;  %v1369_v28 = vmul.f32 %v10078_v20, %v12242_v14  ;;  %v10589_v26 = vpop.permute.xlu0 %609  ;;  %v12244_v30 = vld [vmem:[#allocation14_spill] sm:$0xff]  ;;  %v10596_v15 = vpop.permute.xlu1 %614 }
 0x121   : > { %v8805_v13 = vpack.c.bf16 %v1739_v12, %v1707_v31  ;;  %v1678_v21 = vmax.f32 %v1550_v29, 0.0  ;;  %v1552_v32 = vadd.f32 %v10112_v1, %v1404_v27  ;;  %v1401_v49 = vmul.f32 %v10114_v3, %v12242_v14 }
 0x122   : > { %8798 = vmatpush1.bf16.msra.mxu0 %v8797_v34  ;;  %v1648_v45 = vmax.f32 %v1520_v0, 0.0  ;;  %v1517_v61 = vadd.f32 %v10076_v19, %v1369_v28  ;;  %v1371_v50 = vmul.f32 %v10078_v20, %v12243_v63  ;;  %v1403_v47 = vmul.f32 %v10114_v3, %v12243_v63  ;;  %v12245_v34 = vld [vmem:[#allocation15_spill] sm:$0xff] }
 0x123   : > { %8806 = vmatpush1.bf16.msra.mxu1 %v8805_v13  ;;  %v8807_v51 = vpack.c.bf16 %v1678_v21, %v1646_v17  ;;  %v1680_v5 = vmax.f32 %v1552_v32, 0.0  ;;  %v1549_v33 = vadd.f32 %v10112_v1, %v1401_v49  ;;  %v1434_v39 = vmul.f32 %v10144_v57, %v10056_v10  ;;  %v12246_v21 = vld [vmem:[#allocation16_spill] sm:$0xff] }
 0x124   : > { %v1645_v44 = vmax.f32 %v1517_v61, 0.0  ;;  %v1519_v7 = vadd.f32 %v10076_v19, %v1371_v50  ;;  %v1551_v22 = vadd.f32 %v10112_v1, %v1403_v47  ;;  %v1466_v20 = vmul.f32 %v10142_v43, %v10056_v10  ;;  %v10618_v50 = vpop.permute.xlu0 %757 }
 0x125   : > { %8808 = vmatprep.subr.bf16.mxu0 %v8807_v51  ;;  %v8815_v3 = vpack.c.bf16 %v1680_v5, %v1648_v45  ;;  %8568 = vmatmul.mubr.msk.f32.vlgmr.msra.gmra.mrb[24].mxu0 %vm1748_vm0, %v10193_v18  ;;  %v1677_v46 = vmax.f32 %v1549_v33, 0.0  ;;  %v1582_v9 = vadd.f32 %v10165_v16, %v1434_v39  ;;  %v1436_v2 = vmul.f32 %v10144_v57, %v10059_v11  ;;  %v12247_v5 = vld [vmem:[#allocation17_spill] sm:$0xff] }
 0x126   : > { %8570 = vmatmul.mubr.msk.f32.vlgmr.msra.gmra.mrb[24].mxu1 %vm1748_vm0, %v10193_v18  ;;  %v1647_v19 = vmax.f32 %v1519_v7, 0.0  ;;  %v1679_v1 = vmax.f32 %v1551_v22, 0.0  ;;  %v1614_v10 = vadd.f32 %v10163_v42, %v1466_v20  ;;  %v1468_v37 = vmul.f32 %v10142_v43, %v10059_v11  ;;  %2749 = vmatprep.mubr.f32.mxu0 %v12241_v52 }
 0x127   : > { %8816 = vmatprep.subr.bf16.mxu1 %v8815_v3  ;;  %v8809_v48 = vpack.c.bf16 %v1677_v46, %v1645_v44  ;;  %v1710_v60 = vmax.f32 %v1582_v9, 0.0  ;;  %v1584_v8 = vadd.f32 %v10165_v16, %v1436_v2  ;;  %2826 = vmatprep.mubr.f32.mxu1 %v12241_v52  ;;  %v1433_v25 = vmul.f32 %v10144_v57, %v12242_v14  ;;  %v10625_v44 = vpop.permute.xlu1 %762 }
 0x128   : > { %v8817_v18 = vpack.c.bf16 %v1679_v1, %v1647_v19  ;;  %v1742_v6 = vmax.f32 %v1614_v10, 0.0  ;;  %v1616_v23 = vadd.f32 %v10163_v42, %v1468_v37  ;;  %v1465_v4 = vmul.f32 %v10142_v43, %v12242_v14  ;;  %v9473_v10 = vld [vmem:[#allocation2 + $0x10] sm:$0xff] }
 0x129   : > { %8810 = vmatpush1.bf16.msra.mxu0 %v8809_v48  ;;  %v1712_v11 = vmax.f32 %v1584_v8, 0.0  ;;  %v1581_v38 = vadd.f32 %v10165_v16, %v1433_v25  ;;  %v1435_v59 = vmul.f32 %v10144_v57, %v12243_v63  ;;  %v1467_v40 = vmul.f32 %v10142_v43, %v12243_v63 }
 0x12a   : > { %8818 = vmatpush1.bf16.msra.mxu1 %v8817_v18  ;;  %v8811_v35 = vpack.c.bf16 %v1742_v6, %v1710_v60  ;;  %v1744_v55 = vmax.f32 %v1616_v23, 0.0  ;;  %8569 = vmatmul.mubr.msk.f32.gmra.mrb[26].mxu0 %vm1748_vm0, %v10213_v53  ;;  %v1613_v41 = vadd.f32 %v10163_v42, %v1465_v4  ;;  %v618_v56 = vmul.f32 %v10533_v58, %v12244_v30 }
 0x12b   : > { %8571 = vmatmul.mubr.msk.f32.gmra.mrb[26].mxu1 %vm1748_vm0, %v10213_v53  ;;  %v1709_v57 = vmax.f32 %v1581_v38, 0.0  ;;  %v1583_v43 = vadd.f32 %v10165_v16, %v1435_v59  ;;  %v1615_v36 = vadd.f32 %v10163_v42, %v1467_v40  ;;  %v650_v31 = vmul.f32 %v10539_v24, %v12244_v30  ;;  %2897 = vmatprep.mubr.f32.mxu0 %v12241_v52 }
 0x12c   : > { %8812 = vmatprep.subr.bf16.mxu0 %v8811_v35  ;;  %v8819_v12 = vpack.c.bf16 %v1744_v55, %v1712_v11  ;;  %v1741_v29 = vmax.f32 %v1613_v41, 0.0  ;;  %v766_v27 = vadd.f32 %v10558_v54, %v618_v56  ;;  %v620_v17 = vmul.f32 %v10533_v58, %v12245_v34  ;;  %2974 = vmatprep.mubr.f32.mxu1 %v12241_v52 }
 0x12d   : > { %v1711_v53 = vmax.f32 %v1583_v43, 0.0  ;;  %v1743_v0 = vmax.f32 %v1615_v36, 0.0  ;;  %v798_v16 = vadd.f32 %v10564_v62, %v650_v31  ;;  %v652_v42 = vmul.f32 %v10539_v24, %v12245_v34  ;;  %v9474_v31 = vld [vmem:[#allocation2 + $0x18] sm:$0xff] }
 0x12e   : > { %8820 = vmatprep.subr.bf16.mxu1 %v8819_v12  ;;  %v8813_v14 = vpack.c.bf16 %v1741_v29, %v1709_v57  ;;  %v894_v28 = vmax.f32 %v766_v27, 0.0  ;;  %v768_v13 = vadd.f32 %v10558_v54, %v620_v17  ;;  %v617_v32 = vmul.f32 %v10533_v58, %v12246_v21  ;;  %v12248_v29 = vld [vmem:[#allocation18_spill] sm:$0xff] }
 0x12f   : > { %v8821_v49 = vpack.c.bf16 %v1743_v0, %v1711_v53  ;;  %v926_v45 = vmax.f32 %v798_v16, 0.0  ;;  %v800_v61 = vadd.f32 %v10564_v62, %v652_v42  ;;  %v649_v63 = vmul.f32 %v10539_v24, %v12246_v21 }
 0x130   : > { %8814 = vmatpush1.bf16.msra.mxu0 %v8813_v14  ;;  %v896_v47 = vmax.f32 %v768_v13, 0.0  ;;  %v765_v51 = vadd.f32 %v10558_v54, %v617_v32  ;;  %v619_v33 = vmul.f32 %v10533_v58, %v12247_v5  ;;  %v651_v39 = vmul.f32 %v10539_v24, %v12247_v5 }
 0x131   : > { %8822 = vmatpush1.bf16.msra.mxu1 %v8821_v49  ;;  %v8823_v7 = vpack.c.bf16 %v926_v45, %v894_v28  ;;  %v928_v22 = vmax.f32 %v800_v61, 0.0  ;;  %v797_v20 = vadd.f32 %v10564_v62, %v649_v63  ;;  %v682_v3 = vmul.f32 %v10589_v26, %v12244_v30  ;;  %v12249_v28 = vld [vmem:[#allocation19_spill] sm:$0xff] }
 0x132   : > { %v893_v46 = vmax.f32 %v765_v51, 0.0  ;;  %v767_v9 = vadd.f32 %v10558_v54, %v619_v33  ;;  %v799_v2 = vadd.f32 %v10564_v62, %v651_v39  ;;  %v714_v19 = vmul.f32 %v10596_v15, %v12244_v30  ;;  %v12250_v51 = vld [vmem:[#allocation20_spill] sm:$0xff] }
 0x133   : > { %8824 = vmatprep.subr.bf16.mxu0 %v8823_v7  ;;  %v8831_v1 = vpack.c.bf16 %v928_v22, %v896_v47  ;;  %8572 = vmatmul.mubr.msk.f32.vlgmr.msra.gmra.mrb[28].mxu0 %vm1748_vm0, %v9473_v10  ;;  %v925_v37 = vmax.f32 %v797_v20, 0.0  ;;  %v830_v48 = vadd.f32 %v10618_v50, %v682_v3  ;;  %v684_v60 = vmul.f32 %v10589_v26, %v12245_v34  ;;  %v10678_v3 = vld [vmem:[#allocation2] sm:$0xff] }
 0x134   : > { %8574 = vmatmul.mubr.msk.f32.vlgmr.msra.gmra.mrb[28].mxu1 %vm1748_vm0, %v9473_v10  ;;  %v895_v8 = vmax.f32 %v767_v9, 0.0  ;;  %v927_v25 = vmax.f32 %v799_v2, 0.0  ;;  %v862_v18 = vadd.f32 %v10625_v44, %v714_v19  ;;  %v716_v6 = vmul.f32 %v10596_v15, %v12245_v34  ;;  %2903 = vmatprep.mubr.f32.mxu0 %v12241_v52  ;;  %v12251_v9 = vld [vmem:[#allocation10_spill] sm:$0xff]  ;;  %v12252_v2 = vld [vmem:[#allocation9_spill] sm:$0xff] }
 0x135   : > { %8832 = vmatprep.subr.bf16.mxu1 %v8831_v1  ;;  %v8825_v23 = vpack.c.bf16 %v925_v37, %v893_v46  ;;  %v958_v4 = vmax.f32 %v830_v48, 0.0  ;;  %v832_v11 = vadd.f32 %v10618_v50, %v684_v60  ;;  %2980 = vmatprep.mubr.f32.mxu1 %v12241_v52  ;;  %v681_v38 = vmul.f32 %v10589_v26, %v12246_v21 }
 0x136   : > { %v8833_v59 = vpack.c.bf16 %v927_v25, %v895_v8  ;;  %v990_v40 = vmax.f32 %v862_v18, 0.0  ;;  %v864_v35 = vadd.f32 %v10625_v44, %v716_v6  ;;  %v713_v55 = vmul.f32 %v10596_v15, %v12246_v21 }
 0x137   : > { %8826 = vmatpush1.bf16.msra.mxu0 %v8825_v23  ;;  %v960_v41 = vmax.f32 %v832_v11, 0.0  ;;  %v829_v30 = vadd.f32 %v10618_v50, %v681_v38  ;;  %v683_v56 = vmul.f32 %v10589_v26, %v12247_v5  ;;  %v715_v57 = vmul.f32 %v10596_v15, %v12247_v5 }
 0x138   : > { %8834 = vmatpush1.bf16.msra.mxu1 %v8833_v59  ;;  %v8827_v43 = vpack.c.bf16 %v990_v40, %v958_v4  ;;  %v992_v36 = vmax.f32 %v864_v35, 0.0  ;;  %8573 = vmatmul.mubr.msk.f32.gmra.mrb[30].mxu0 %vm1748_vm0, %v9474_v31  ;;  %v861_v12 = vadd.f32 %v10625_v44, %v713_v55  ;;  %v622_v27 = vmul.f32 %v10533_v58, %v12248_v29 }
 0x139   : > { %8575 = vmatmul.mubr.msk.f32.gmra.mrb[30].mxu1 %vm1748_vm0, %v9474_v31  ;;  %v957_v34 = vmax.f32 %v829_v30, 0.0  ;;  %v831_v17 = vadd.f32 %v10618_v50, %v683_v56  ;;  %v863_v53 = vadd.f32 %v10625_v44, %v715_v57  ;;  %v654_v0 = vmul.f32 %v10539_v24, %v12248_v29  ;;  %3057 = vmatprep.mubr.f32.mxu0 %v12241_v52 }
 0x13a   : > { %8828 = vmatprep.subr.bf16.mxu0 %v8827_v43  ;;  %v8835_v16 = vpack.c.bf16 %v992_v36, %v960_v41  ;;  %v989_v42 = vmax.f32 %v861_v12, 0.0  ;;  %v770_v14 = vadd.f32 %v10558_v54, %v622_v27  ;;  %v624_v13 = vmul.f32 %v10533_v58, %v12249_v28  ;;  %3134 = vmatprep.mubr.f32.mxu1 %v12241_v52  ;;  %v10707_v43 = vld [vmem:[#allocation2 + $0x8] sm:$0xff] }
 0x13b   : > { %v959_v21 = vmax.f32 %v831_v17, 0.0  ;;  %v991_v32 = vmax.f32 %v863_v53, 0.0  ;;  %v802_v49 = vadd.f32 %v10564_v62, %v654_v0  ;;  %v656_v45 = vmul.f32 %v10539_v24, %v12249_v28 }
 0x13c   : > { %8836 = vmatprep.subr.bf16.mxu1 %v8835_v16  ;;  %v8829_v61 = vpack.c.bf16 %v989_v42, %v957_v34  ;;  %v898_v63 = vmax.f32 %v770_v14, 0.0  ;;  %v772_v47 = vadd.f32 %v10558_v54, %v624_v13  ;;  %v621_v5 = vmul.f32 %v10533_v58, %v12250_v51 }
 0x13d   : > { %v8837_v33 = vpack.c.bf16 %v991_v32, %v959_v21  ;;  %v930_v39 = vmax.f32 %v802_v49, 0.0  ;;  %v804_v7 = vadd.f32 %v10564_v62, %v656_v45  ;;  %v653_v22 = vmul.f32 %v10539_v24, %v12250_v51  ;;  %v9475_v32 = vld [vmem:[%s9879_s29 + $0x20] sm:$0xff]  ;;  %v12254_v49 = vld [vmem:[#allocation11_spill] sm:$0xff] }
 0x13e   : > { %8830 = vmatpush1.bf16.msra.mxu0 %v8829_v61  ;;  %v900_v20 = vmax.f32 %v772_v47, 0.0  ;;  %v769_v46 = vadd.f32 %v10558_v54, %v621_v5  ;;  %v12253_v19 = vrot.slane %v12252_v2, %v12251_v9  ;;  %v686_v10 = vmul.f32 %v10589_v26, %v12248_v29  ;;  %v9476_v61 = vld [vmem:[%s9879_s29 + $0x28] sm:$0xff] }
 0x13f   : > { %8838 = vmatpush1.bf16.msra.mxu1 %v8837_v33  ;;  %v8839_v37 = vpack.c.bf16 %v930_v39, %v898_v63  ;;  %v932_v48 = vmax.f32 %v804_v7, 0.0  ;;  %v801_v60 = vadd.f32 %v10564_v62, %v653_v22  ;;  %v718_v8 = vmul.f32 %v10596_v15, %v12248_v29 }
 0x140   : > { %v488_v1 = vrot.slane %v12253_v19, %v12251_v9  ;;  %v897_v25 = vmax.f32 %v769_v46, 0.0  ;;  %v834_v23 = vadd.f32 %v10618_v50, %v686_v10  ;;  %v688_v59 = vmul.f32 %v10589_v26, %v12249_v28 }
 0x141   : > { %8840 = vmatprep.subr.bf16.mxu0 %v8839_v37  ;;  %v8847_v4 = vpack.c.bf16 %v932_v48, %v900_v20  ;;  %8576 = vmatmul.mubr.msk.f32.vlgmr.msra.gmra.mrb[0].mxu0 %vm1748_vm0, %v10678_v3  ;;  %v929_v11 = vmax.f32 %v801_v60, 0.0  ;;  %v866_v38 = vadd.f32 %v10625_v44, %v718_v8  ;;  %v720_v41 = vmul.f32 %v10596_v15, %v12249_v28 }
 0x142   : > { %v623_v18 = vmul.f32 %v10533_v58, %v488_v1  ;;  %v655_v6 = vmul.f32 %v10539_v24, %v488_v1  ;;  %8578 = vmatmul.mubr.msk.f32.vlgmr.msra.gmra.mrb[0].mxu1 %vm1748_vm0, %v10678_v3  ;;  %v962_v55 = vmax.f32 %v834_v23, 0.0  ;;  %3063 = vmatprep.mubr.f32.mxu0 %v12241_v52  ;;  %v836_v57 = vadd.f32 %v10618_v50, %v688_v59 }
 0x143   : > { %8848 = vmatprep.subr.bf16.mxu1 %v8847_v4  ;;  %v8841_v30 = vpack.c.bf16 %v929_v11, %v897_v25  ;;  %v994_v56 = vmax.f32 %v866_v38, 0.0  ;;  %3140 = vmatprep.mubr.f32.mxu1 %v12241_v52  ;;  %v685_v36 = vmul.f32 %v10589_v26, %v12250_v51  ;;  %v868_v29 = vadd.f32 %v10625_v44, %v720_v41 }
 0x144   : > { %v771_v40 = vadd.f32 %v10558_v54, %v623_v18  ;;  %v803_v35 = vadd.f32 %v10564_v62, %v655_v6  ;;  %v717_v27 = vmul.f32 %v10596_v15, %v12250_v51  ;;  %v964_v17 = vmax.f32 %v836_v57, 0.0 }
 0x145   : > { %8842 = vmatpush1.bf16.msra.mxu0 %v8841_v30  ;;  %v8843_v34 = vpack.c.bf16 %v994_v56, %v962_v55  ;;  %v833_v53 = vadd.f32 %v10618_v50, %v685_v36  ;;  %v687_v0 = vmul.f32 %v10589_v26, %v488_v1  ;;  %v996_v42 = vmax.f32 %v868_v29, 0.0 }
 0x146   : > { %v899_v31 = vmax.f32 %v771_v40, 0.0  ;;  %v931_v12 = vmax.f32 %v803_v35, 0.0  ;;  %8577 = vmatmul.mubr.msk.f32.gmra.mrb[2].mxu0 %vm1748_vm0, %v10707_v43  ;;  %8579 = vmatmul.mubr.msk.f32.gmra.mrb[2].mxu1 %vm1748_vm0, %v10707_v43  ;;  %v865_v14 = vadd.f32 %v10625_v44, %v717_v27  ;;  %v719_v28 = vmul.f32 %v10596_v15, %v488_v1  ;;  %v10736_v1 = vld [vmem:[%s9879_s29 + $0x30] sm:$0xff] }
 0x147   : > { %8844 = vmatprep.subr.bf16.mxu0 %v8843_v34  ;;  %v961_v13 = vmax.f32 %v833_v53, 0.0  ;;  %v835_v21 = vadd.f32 %v10618_v50, %v687_v0  ;;  %v340_v45 = vrot.slane %v9475_v32, %v12254_v49  ;;  %v348_v63 = vrot.slane %v9476_v61, %v12254_v49  ;;  %3211 = vmatprep.mubr.f32.mxu0 %v12241_v52 }
 0x148   : > { %v8849_v16 = vpack.c.bf16 %v931_v12, %v899_v31  ;;  %v8851_v47 = vpack.c.bf16 %v996_v42, %v964_v17  ;;  %v993_v51 = vmax.f32 %v865_v14, 0.0  ;;  %v867_v5 = vadd.f32 %v10625_v44, %v719_v28  ;;  %3288 = vmatprep.mubr.f32.mxu1 %v12241_v52 }
 0x149   : > { %v336_v33 = vrot.slane %v9475_v32, %v12251_v9  ;;  %v963_v39 = vmax.f32 %v835_v21, 0.0  ;;  %v500_v7 = vrot.slane %v340_v45, %v12251_v9  ;;  %v508_v22 = vrot.slane %v348_v63, %v12251_v9 }
 0x14a   : > { %8850 = vmatpush1.bf16.msra.mxu1 %v8849_v16  ;;  %v344_v20 = vrot.slane %v9476_v61, %v12251_v9  ;;  %v8845_v46 = vpack.c.bf16 %v993_v51, %v961_v13  ;;  %v995_v2 = vmax.f32 %v867_v5, 0.0  ;;  %v356_v10 = vrot.slane %v10736_v1, %v12254_v49 }
 0x14b   : > { %8852 = vmatprep.subr.bf16.mxu1 %v8851_v47  ;;  %v496_v19 = vrot.slane %v336_v33, %v12251_v9  ;;  %v626_v37 = vmul.f32 %v10533_v58, %v500_v7  ;;  %v658_v48 = vmul.f32 %v10539_v24, %v500_v7  ;;  %v628_v60 = vmul.f32 %v10533_v58, %v508_v22 }
 0x14c   : > { %v660_v8 = vmul.f32 %v10539_v24, %v508_v22  ;;  %8846 = vmatpush1.bf16.msra.mxu0 %v8845_v46  ;;  %v8853_v25 = vpack.c.bf16 %v995_v2, %v963_v39  ;;  %v504_v23 = vrot.slane %v344_v20, %v12251_v9  ;;  %v690_v53 = vmul.f32 %v10589_v26, %v500_v7 }
 0x14d   : > { %v625_v18 = vmul.f32 %v10533_v58, %v496_v19  ;;  %v657_v6 = vmul.f32 %v10539_v24, %v496_v19  ;;  %v774_v4 = vadd.f32 %v10558_v54, %v626_v37  ;;  %v806_v11 = vadd.f32 %v10564_v62, %v658_v48 }
 0x14e   : > { %v776_v38 = vadd.f32 %v10558_v54, %v628_v60  ;;  %v808_v59 = vadd.f32 %v10564_v62, %v660_v8  ;;  %8854 = vmatpush1.bf16.msra.mxu1 %v8853_v25  ;;  %v627_v55 = vmul.f32 %v10533_v58, %v504_v23  ;;  %v659_v41 = vmul.f32 %v10539_v24, %v504_v23 }
 0x14f   : > { %v773_v40 = vadd.f32 %v10558_v54, %v625_v18  ;;  %v805_v35 = vadd.f32 %v10564_v62, %v657_v6  ;;  %v902_v30 = vmax.f32 %v774_v4, 0.0  ;;  %v934_v56 = vmax.f32 %v806_v11, 0.0  ;;  %8580 = vmatmul.mubr.msk.f32.vlgmr.msra.gmra.mrb[4].mxu0 %vm1748_vm0, %v10678_v3  ;;  %v9478_v18 = vld [vmem:[%s9879_s29 + $0x38] sm:$0xff] }
 0x150   : > { %v904_v57 = vmax.f32 %v776_v38, 0.0  ;;  %v936_v36 = vmax.f32 %v808_v59, 0.0  ;;  %v775_v29 = vadd.f32 %v10558_v54, %v627_v55  ;;  %v807_v27 = vadd.f32 %v10564_v62, %v659_v41  ;;  %3217 = vmatprep.mubr.f32.mxu0 %v12241_v52 }
 0x151   : > { %v901_v31 = vmax.f32 %v773_v40, 0.0  ;;  %v933_v12 = vmax.f32 %v805_v35, 0.0  ;;  %v8855_v34 = vpack.c.bf16 %v934_v56, %v902_v30  ;;  %8582 = vmatmul.mubr.msk.f32.vlgmr.msra.gmra.mrb[4].mxu1 %vm1748_vm0, %v10678_v3  ;;  %v722_v0 = vmul.f32 %v10596_v15, %v500_v7 }
 0x152   : > { %v8863_v17 = vpack.c.bf16 %v936_v36, %v904_v57  ;;  %v903_v42 = vmax.f32 %v775_v29, 0.0  ;;  %v935_v14 = vmax.f32 %v807_v27, 0.0  ;;  %v692_v28 = vmul.f32 %v10589_v26, %v508_v22  ;;  %3294 = vmatprep.mubr.f32.mxu1 %v12241_v52 }
 0x153   : > { %v8857_v16 = vpack.c.bf16 %v933_v12, %v901_v31  ;;  %8856 = vmatprep.subr.bf16.mxu0 %v8855_v34  ;;  %v838_v13 = vadd.f32 %v10618_v50, %v690_v53  ;;  %v870_v21 = vadd.f32 %v10625_v44, %v722_v0  ;;  %v724_v32 = vmul.f32 %v10596_v15, %v508_v22 }
 0x154   : > { %8864 = vmatprep.subr.bf16.mxu1 %v8863_v17  ;;  %v8865_v45 = vpack.c.bf16 %v935_v14, %v903_v42  ;;  %v840_v61 = vadd.f32 %v10618_v50, %v692_v28  ;;  %v689_v63 = vmul.f32 %v10589_v26, %v496_v19  ;;  %v721_v47 = vmul.f32 %v10596_v15, %v496_v19 }
 0x155   : > { %8858 = vmatpush1.bf16.msra.mxu0 %v8857_v16  ;;  %v966_v51 = vmax.f32 %v838_v13, 0.0  ;;  %v998_v5 = vmax.f32 %v870_v21, 0.0  ;;  %v872_v33 = vadd.f32 %v10625_v44, %v724_v32  ;;  %8583 = vmatmul.mubr.msk.f32.gmra.mrb[6].mxu1 %vm1748_vm0, %v10707_v43  ;;  %v691_v39 = vmul.f32 %v10589_v26, %v504_v23 }
 0x156   : > { %8581 = vmatmul.mubr.msk.f32.gmra.mrb[6].mxu0 %vm1748_vm0, %v10707_v43  ;;  %8866 = vmatpush1.bf16.msra.mxu1 %v8865_v45  ;;  %v968_v7 = vmax.f32 %v840_v61, 0.0  ;;  %v837_v22 = vadd.f32 %v10618_v50, %v689_v63  ;;  %v869_v20 = vadd.f32 %v10625_v44, %v721_v47  ;;  %v723_v46 = vmul.f32 %v10596_v15, %v504_v23 }
 0x157   : > { %3365 = vmatprep.mubr.f32.mxu0 %v12241_v52  ;;  %v8859_v2 = vpack.c.bf16 %v998_v5, %v966_v51  ;;  %v1000_v19 = vmax.f32 %v872_v33, 0.0  ;;  %v839_v37 = vadd.f32 %v10618_v50, %v691_v39  ;;  %v516_v48 = vrot.slane %v356_v10, %v12251_v9  ;;  %3442 = vmatprep.mubr.f32.mxu1 %v12241_v52 }
 0x158   : > { %v965_v60 = vmax.f32 %v837_v22, 0.0  ;;  %v997_v8 = vmax.f32 %v869_v20, 0.0  ;;  %v871_v25 = vadd.f32 %v10625_v44, %v723_v46  ;;  %v364_v6 = vrot.slane %v9478_v18, %v12254_v49 }
 0x159   : > { %8860 = vmatprep.subr.bf16.mxu0 %v8859_v2  ;;  %v8867_v23 = vpack.c.bf16 %v1000_v19, %v968_v7  ;;  %v967_v4 = vmax.f32 %v839_v37, 0.0  ;;  %v630_v11 = vmul.f32 %v10533_v58, %v516_v48  ;;  %v662_v38 = vmul.f32 %v10539_v24, %v516_v48 }
 0x15a   : > { %v8861_v59 = vpack.c.bf16 %v997_v8, %v965_v60  ;;  %v999_v40 = vmax.f32 %v871_v25, 0.0  ;;  %v524_v10 = vrot.slane %v364_v6, %v12251_v9  ;;  %v352_v35 = vrot.slane %v10736_v1, %v12251_v9 }
 0x15b   : > { %8868 = vmatprep.subr.bf16.mxu1 %v8867_v23  ;;  %v778_v55 = vadd.f32 %v10558_v54, %v630_v11  ;;  %v810_v41 = vadd.f32 %v10564_v62, %v662_v38  ;;  %v360_v30 = vrot.slane %v9478_v18, %v12251_v9  ;;  %v694_v56 = vmul.f32 %v10589_v26, %v516_v48 }
 0x15c   : > { %8862 = vmatpush1.bf16.msra.mxu0 %v8861_v59  ;;  %v8869_v57 = vpack.c.bf16 %v999_v40, %v967_v4  ;;  %v632_v36 = vmul.f32 %v10533_v58, %v524_v10  ;;  %v664_v31 = vmul.f32 %v10539_v24, %v524_v10  ;;  %v512_v12 = vrot.slane %v352_v35, %v12251_v9  ;;  %v9479_v35 = vld [vmem:[%s9879_s29 + $0x40] sm:$0xff] }
 0x15d   : > { %v906_v29 = vmax.f32 %v778_v55, 0.0  ;;  %v938_v27 = vmax.f32 %v810_v41, 0.0  ;;  %v520_v1 = vrot.slane %v360_v30, %v12251_v9  ;;  %v726_v34 = vmul.f32 %v10596_v15, %v516_v48  ;;  %v9480_v41 = vld [vmem:[%s9879_s29 + $0x48] sm:$0xff] }
 0x15e   : > { %8870 = vmatpush1.bf16.msra.mxu1 %v8869_v57  ;;  %v780_v17 = vadd.f32 %v10558_v54, %v632_v36  ;;  %v812_v53 = vadd.f32 %v10564_v62, %v664_v31  ;;  %v629_v0 = vmul.f32 %v10533_v58, %v512_v12  ;;  %v661_v16 = vmul.f32 %v10539_v24, %v512_v12 }
 0x15f   : > { %v8871_v42 = vpack.c.bf16 %v938_v27, %v906_v29  ;;  %8584 = vmatmul.mubr.msk.f32.vlgmr.msra.gmra.mrb[8].mxu0 %vm1748_vm0, %v10678_v3  ;;  %v631_v14 = vmul.f32 %v10533_v58, %v520_v1  ;;  %v663_v28 = vmul.f32 %v10539_v24, %v520_v1  ;;  %v842_v13 = vadd.f32 %v10618_v50, %v694_v56 }
 0x160   : > { %v908_v21 = vmax.f32 %v780_v17, 0.0  ;;  %v940_v32 = vmax.f32 %v812_v53, 0.0  ;;  %v777_v45 = vadd.f32 %v10558_v54, %v629_v0  ;;  %v809_v61 = vadd.f32 %v10564_v62, %v661_v16  ;;  %3371 = vmatprep.mubr.f32.mxu0 %v12241_v52 }
 0x161   : > { %8872 = vmatprep.subr.bf16.mxu0 %v8871_v42  ;;  %8586 = vmatmul.mubr.msk.f32.vlgmr.msra.gmra.mrb[8].mxu1 %vm1748_vm0, %v10678_v3  ;;  %v779_v63 = vadd.f32 %v10558_v54, %v631_v14  ;;  %v811_v47 = vadd.f32 %v10564_v62, %v663_v28  ;;  %v874_v51 = vadd.f32 %v10625_v44, %v726_v34  ;;  %v970_v5 = vmax.f32 %v842_v13, 0.0 }
 0x162   : > { %v8879_v33 = vpack.c.bf16 %v940_v32, %v908_v21  ;;  %v905_v39 = vmax.f32 %v777_v45, 0.0  ;;  %v937_v7 = vmax.f32 %v809_v61, 0.0  ;;  %v696_v22 = vmul.f32 %v10589_v26, %v524_v10  ;;  %3448 = vmatprep.mubr.f32.mxu1 %v12241_v52 }
 0x163   : > { %v907_v20 = vmax.f32 %v779_v63, 0.0  ;;  %v939_v46 = vmax.f32 %v811_v47, 0.0  ;;  %v1002_v2 = vmax.f32 %v874_v51, 0.0  ;;  %v728_v19 = vmul.f32 %v10596_v15, %v524_v10  ;;  %8585 = vmatmul.mubr.msk.f32.gmra.mrb[10].mxu0 %vm1748_vm0, %v10707_v43 }
 0x164   : > { %8880 = vmatprep.subr.bf16.mxu1 %v8879_v33  ;;  %v8873_v37 = vpack.c.bf16 %v937_v7, %v905_v39  ;;  %v844_v48 = vadd.f32 %v10618_v50, %v696_v22  ;;  %v693_v60 = vmul.f32 %v10589_v26, %v512_v12  ;;  %v725_v8 = vmul.f32 %v10596_v15, %v512_v12 }
 0x165   : > { %v8881_v25 = vpack.c.bf16 %v939_v46, %v907_v20  ;;  %v8875_v18 = vpack.c.bf16 %v1002_v2, %v970_v5  ;;  %v876_v6 = vadd.f32 %v10625_v44, %v728_v19  ;;  %8587 = vmatmul.mubr.msk.f32.gmra.mrb[10].mxu1 %vm1748_vm0, %v10707_v43  ;;  %v695_v23 = vmul.f32 %v10589_v26, %v520_v1 }
 0x166   : > { %8874 = vmatpush1.bf16.msra.mxu0 %v8873_v37  ;;  %v972_v4 = vmax.f32 %v844_v48, 0.0  ;;  %v841_v11 = vadd.f32 %v10618_v50, %v693_v60  ;;  %v873_v38 = vadd.f32 %v10625_v44, %v725_v8  ;;  %v727_v59 = vmul.f32 %v10596_v15, %v520_v1  ;;  %3519 = vmatprep.mubr.f32.mxu0 %v12241_v52 }
 0x167   : > { %8882 = vmatpush1.bf16.msra.mxu1 %v8881_v25  ;;  %8876 = vmatprep.subr.bf16.mxu0 %v8875_v18  ;;  %v1004_v40 = vmax.f32 %v876_v6, 0.0  ;;  %v843_v10 = vadd.f32 %v10618_v50, %v695_v23  ;;  %v372_v55 = vrot.slane %v9479_v35, %v12254_v49  ;;  %v380_v30 = vrot.slane %v9480_v41, %v12254_v49 }
 0x168   : > { %v969_v56 = vmax.f32 %v841_v11, 0.0  ;;  %v1001_v57 = vmax.f32 %v873_v38, 0.0  ;;  %v875_v36 = vadd.f32 %v10625_v44, %v727_v59  ;;  %3596 = vmatprep.mubr.f32.mxu1 %v12241_v52  ;;  %v368_v31 = vrot.slane %v9479_v35, %v12251_v9 }
 0x169   : > { %v8883_v12 = vpack.c.bf16 %v1004_v40, %v972_v4  ;;  %v971_v29 = vmax.f32 %v843_v10, 0.0  ;;  %v532_v27 = vrot.slane %v372_v55, %v12251_v9  ;;  %v540_v1 = vrot.slane %v380_v30, %v12251_v9 }
 0x16a   : > { %v8877_v34 = vpack.c.bf16 %v1001_v57, %v969_v56  ;;  %v1003_v17 = vmax.f32 %v875_v36, 0.0  ;;  %v528_v53 = vrot.slane %v368_v31, %v12251_v9  ;;  %v376_v0 = vrot.slane %v9480_v41, %v12251_v9 }
 0x16b   : > { %8884 = vmatprep.subr.bf16.mxu1 %v8883_v12  ;;  %v634_v16 = vmul.f32 %v10533_v58, %v532_v27  ;;  %v666_v42 = vmul.f32 %v10539_v24, %v532_v27  ;;  %v636_v14 = vmul.f32 %v10533_v58, %v540_v1  ;;  %v668_v28 = vmul.f32 %v10539_v24, %v540_v1 }
 0x16c   : > { %8878 = vmatpush1.bf16.msra.mxu0 %v8877_v34  ;;  %v8885_v13 = vpack.c.bf16 %v1003_v17, %v971_v29  ;;  %v633_v21 = vmul.f32 %v10533_v58, %v528_v53  ;;  %v665_v32 = vmul.f32 %v10539_v24, %v528_v53  ;;  %v536_v45 = vrot.slane %v376_v0, %v12251_v9  ;;  %v9481_v0 = vld [vmem:[%s9879_s29 + $0x50] sm:$0xff] }
 0x16d   : > { %v782_v61 = vadd.f32 %v10558_v54, %v634_v16  ;;  %v814_v63 = vadd.f32 %v10564_v62, %v666_v42  ;;  %v784_v47 = vadd.f32 %v10558_v54, %v636_v14  ;;  %v816_v51 = vadd.f32 %v10564_v62, %v668_v28 }
 0x16e   : > { %8886 = vmatpush1.bf16.msra.mxu1 %v8885_v13  ;;  %v781_v5 = vadd.f32 %v10558_v54, %v633_v21  ;;  %v813_v33 = vadd.f32 %v10564_v62, %v665_v32  ;;  %v635_v39 = vmul.f32 %v10533_v58, %v536_v45  ;;  %v667_v7 = vmul.f32 %v10539_v24, %v536_v45  ;;  %v9482_v13 = vld [vmem:[%s9879_s29 + $0x58] sm:$0xff] }
 0x16f   : > { %v910_v22 = vmax.f32 %v782_v61, 0.0  ;;  %v942_v20 = vmax.f32 %v814_v63, 0.0  ;;  %v912_v46 = vmax.f32 %v784_v47, 0.0  ;;  %v944_v2 = vmax.f32 %v816_v51, 0.0  ;;  %8588 = vmatmul.mubr.msk.f32.vlgmr.msra.gmra.mrb[12].mxu0 %vm1748_vm0, %v10678_v3 }
 0x170   : > { %v909_v19 = vmax.f32 %v781_v5, 0.0  ;;  %v941_v37 = vmax.f32 %v813_v33, 0.0  ;;  %v783_v48 = vadd.f32 %v10558_v54, %v635_v39  ;;  %v815_v60 = vadd.f32 %v10564_v62, %v667_v7  ;;  %3525 = vmatprep.mubr.f32.mxu0 %v12241_v52 }
 0x171   : > { %v8887_v8 = vpack.c.bf16 %v942_v20, %v910_v22  ;;  %v8895_v25 = vpack.c.bf16 %v944_v2, %v912_v46  ;;  %8590 = vmatmul.mubr.msk.f32.vlgmr.msra.gmra.mrb[12].mxu1 %vm1748_vm0, %v10678_v3  ;;  %v698_v18 = vmul.f32 %v10589_v26, %v532_v27  ;;  %v730_v6 = vmul.f32 %v10596_v15, %v532_v27 }
 0x172   : > { %v8889_v23 = vpack.c.bf16 %v941_v37, %v909_v19  ;;  %v911_v4 = vmax.f32 %v783_v48, 0.0  ;;  %v943_v11 = vmax.f32 %v815_v60, 0.0  ;;  %v700_v38 = vmul.f32 %v10589_v26, %v540_v1  ;;  %3602 = vmatprep.mubr.f32.mxu1 %v12241_v52 }
 0x173   : > { %8888 = vmatprep.subr.bf16.mxu0 %v8887_v8  ;;  %8896 = vmatprep.subr.bf16.mxu1 %v8895_v25  ;;  %v846_v59 = vadd.f32 %v10618_v50, %v698_v18  ;;  %v878_v40 = vadd.f32 %v10625_v44, %v730_v6  ;;  %v732_v10 = vmul.f32 %v10596_v15, %v540_v1 }
 0x174   : > { %8890 = vmatpush1.bf16.msra.mxu0 %v8889_v23  ;;  %v8897_v35 = vpack.c.bf16 %v943_v11, %v911_v4  ;;  %v848_v55 = vadd.f32 %v10618_v50, %v700_v38  ;;  %v697_v41 = vmul.f32 %v10589_v26, %v528_v53  ;;  %v729_v30 = vmul.f32 %v10596_v15, %v528_v53 }
 0x175   : > { %v974_v56 = vmax.f32 %v846_v59, 0.0  ;;  %v1006_v57 = vmax.f32 %v878_v40, 0.0  ;;  %v880_v36 = vadd.f32 %v10625_v44, %v732_v10  ;;  %8589 = vmatmul.mubr.msk.f32.gmra.mrb[14].mxu0 %vm1748_vm0, %v10707_v43  ;;  %8591 = vmatmul.mubr.msk.f32.gmra.mrb[14].mxu1 %vm1748_vm0, %v10707_v43  ;;  %v699_v31 = vmul.f32 %v10589_v26, %v536_v45 }
 0x176   : > { %8898 = vmatpush1.bf16.msra.mxu1 %v8897_v35  ;;  %v976_v12 = vmax.f32 %v848_v55, 0.0  ;;  %v845_v29 = vadd.f32 %v10618_v50, %v697_v41  ;;  %v877_v27 = vadd.f32 %v10625_v44, %v729_v30  ;;  %v731_v1 = vmul.f32 %v10596_v15, %v536_v45  ;;  %3673 = vmatprep.mubr.f32.mxu0 %v12241_v52 }
 0x177   : > { %v8891_v34 = vpack.c.bf16 %v1006_v57, %v974_v56  ;;  %v1008_v17 = vmax.f32 %v880_v36, 0.0  ;;  %v847_v53 = vadd.f32 %v10618_v50, %v699_v31  ;;  %v388_v16 = vrot.slane %v9481_v0, %v12254_v49  ;;  %3750 = vmatprep.mubr.f32.mxu1 %v12241_v52 }
 0x178   : > { %v973_v42 = vmax.f32 %v845_v29, 0.0  ;;  %v1005_v14 = vmax.f32 %v877_v27, 0.0  ;;  %v879_v28 = vadd.f32 %v10625_v44, %v731_v1  ;;  %v396_v21 = vrot.slane %v9482_v13, %v12254_v49 }
 0x179   : > { %8892 = vmatprep.subr.bf16.mxu0 %v8891_v34  ;;  %v8899_v32 = vpack.c.bf16 %v1008_v17, %v976_v12  ;;  %v975_v45 = vmax.f32 %v847_v53, 0.0  ;;  %v548_v61 = vrot.slane %v388_v16, %v12251_v9  ;;  %v384_v63 = vrot.slane %v9481_v0, %v12251_v9 }
 0x17a   : > { %v8893_v47 = vpack.c.bf16 %v1005_v14, %v973_v42  ;;  %v1007_v51 = vmax.f32 %v879_v28, 0.0  ;;  %v556_v5 = vrot.slane %v396_v21, %v12251_v9  ;;  %v392_v33 = vrot.slane %v9482_v13, %v12251_v9 }
 0x17b   : > { %8900 = vmatprep.subr.bf16.mxu1 %v8899_v32  ;;  %v638_v39 = vmul.f32 %v10533_v58, %v548_v61  ;;  %v670_v7 = vmul.f32 %v10539_v24, %v548_v61  ;;  %v544_v22 = vrot.slane %v384_v63, %v12251_v9  ;;  %v702_v20 = vmul.f32 %v10589_v26, %v548_v61 }
 0x17c   : > { %8894 = vmatpush1.bf16.msra.mxu0 %v8893_v47  ;;  %v8901_v46 = vpack.c.bf16 %v1007_v51, %v975_v45  ;;  %v640_v2 = vmul.f32 %v10533_v58, %v556_v5  ;;  %v672_v19 = vmul.f32 %v10539_v24, %v556_v5  ;;  %v552_v37 = vrot.slane %v392_v33, %v12251_v9  ;;  %v9483_v47 = vld [vmem:[%s9879_s29 + $0x60] sm:$0xff] }
 0x17d   : > { %v786_v48 = vadd.f32 %v10558_v54, %v638_v39  ;;  %v818_v60 = vadd.f32 %v10564_v62, %v670_v7  ;;  %v637_v8 = vmul.f32 %v10533_v58, %v544_v22  ;;  %v669_v25 = vmul.f32 %v10539_v24, %v544_v22 }
 0x17e   : > { %8902 = vmatpush1.bf16.msra.mxu1 %v8901_v46  ;;  %v788_v18 = vadd.f32 %v10558_v54, %v640_v2  ;;  %v820_v6 = vadd.f32 %v10564_v62, %v672_v19  ;;  %v639_v23 = vmul.f32 %v10533_v58, %v552_v37  ;;  %v671_v4 = vmul.f32 %v10539_v24, %v552_v37 }
 0x17f   : > { %v914_v11 = vmax.f32 %v786_v48, 0.0  ;;  %v946_v38 = vmax.f32 %v818_v60, 0.0  ;;  %8592 = vmatmul.mubr.msk.f32.vlgmr.msra.gmra.mrb[16].mxu0 %vm1748_vm0, %v10678_v3  ;;  %v785_v59 = vadd.f32 %v10558_v54, %v637_v8  ;;  %v817_v40 = vadd.f32 %v10564_v62, %v669_v25  ;;  %v9484_v48 = vld [vmem:[%s9879_s29 + $0x68] sm:$0xff] }
 0x180   : > { %v916_v10 = vmax.f32 %v788_v18, 0.0  ;;  %v948_v35 = vmax.f32 %v820_v6, 0.0  ;;  %v787_v55 = vadd.f32 %v10558_v54, %v639_v23  ;;  %v819_v41 = vadd.f32 %v10564_v62, %v671_v4  ;;  %3679 = vmatprep.mubr.f32.mxu0 %v12241_v52 }
 0x181   : > { %v8903_v30 = vpack.c.bf16 %v946_v38, %v914_v11  ;;  %8594 = vmatmul.mubr.msk.f32.vlgmr.msra.gmra.mrb[16].mxu1 %vm1748_vm0, %v10678_v3  ;;  %v913_v56 = vmax.f32 %v785_v59, 0.0  ;;  %v945_v57 = vmax.f32 %v817_v40, 0.0  ;;  %v734_v36 = vmul.f32 %v10596_v15, %v548_v61 }
 0x182   : > { %v8911_v31 = vpack.c.bf16 %v948_v35, %v916_v10  ;;  %v915_v12 = vmax.f32 %v787_v55, 0.0  ;;  %v947_v29 = vmax.f32 %v819_v41, 0.0  ;;  %v850_v27 = vadd.f32 %v10618_v50, %v702_v20  ;;  %3756 = vmatprep.mubr.f32.mxu1 %v12241_v52 }
 0x183   : > { %8904 = vmatprep.subr.bf16.mxu0 %v8903_v30  ;;  %v8905_v1 = vpack.c.bf16 %v945_v57, %v913_v56  ;;  %v882_v34 = vadd.f32 %v10625_v44, %v734_v36  ;;  %v704_v17 = vmul.f32 %v10589_v26, %v556_v5  ;;  %v736_v53 = vmul.f32 %v10596_v15, %v556_v5 }
 0x184   : > { %8912 = vmatprep.subr.bf16.mxu1 %v8911_v31  ;;  %v8913_v0 = vpack.c.bf16 %v947_v29, %v915_v12  ;;  %v978_v16 = vmax.f32 %v850_v27, 0.0  ;;  %8593 = vmatmul.mubr.msk.f32.gmra.mrb[18].mxu0 %vm1748_vm0, %v10707_v43  ;;  %v701_v42 = vmul.f32 %v10589_v26, %v544_v22  ;;  %v733_v14 = vmul.f32 %v10596_v15, %v544_v22 }
 0x185   : > { %8906 = vmatpush1.bf16.msra.mxu0 %v8905_v1  ;;  %v1010_v28 = vmax.f32 %v882_v34, 0.0  ;;  %v852_v13 = vadd.f32 %v10618_v50, %v704_v17  ;;  %v884_v21 = vadd.f32 %v10625_v44, %v736_v53  ;;  %8595 = vmatmul.mubr.msk.f32.gmra.mrb[18].mxu1 %vm1748_vm0, %v10707_v43  ;;  %v703_v32 = vmul.f32 %v10589_v26, %v552_v37 }
 0x186   : > { %8914 = vmatpush1.bf16.msra.mxu1 %v8913_v0  ;;  %v849_v45 = vadd.f32 %v10618_v50, %v701_v42  ;;  %v881_v61 = vadd.f32 %v10625_v44, %v733_v14  ;;  %v735_v63 = vmul.f32 %v10596_v15, %v552_v37  ;;  %v404_v51 = vrot.slane %v9483_v47, %v12254_v49 }
 0x187   : > { %v8907_v5 = vpack.c.bf16 %v1010_v28, %v978_v16  ;;  %v980_v33 = vmax.f32 %v852_v13, 0.0  ;;  %v1012_v39 = vmax.f32 %v884_v21, 0.0  ;;  %v851_v7 = vadd.f32 %v10618_v50, %v703_v32  ;;  %3827 = vmatprep.mubr.f32.mxu0 %v12241_v52  ;;  %3904 = vmatprep.mubr.f32.mxu1 %v12241_v52 }
 0x188   : > { %v977_v22 = vmax.f32 %v849_v45, 0.0  ;;  %v1009_v20 = vmax.f32 %v881_v61, 0.0  ;;  %v883_v46 = vadd.f32 %v10625_v44, %v735_v63  ;;  %v564_v2 = vrot.slane %v404_v51, %v12251_v9 }
 0x189   : > { %8908 = vmatprep.subr.bf16.mxu0 %v8907_v5  ;;  %v8915_v19 = vpack.c.bf16 %v1012_v39, %v980_v33  ;;  %v979_v37 = vmax.f32 %v851_v7, 0.0  ;;  %v412_v60 = vrot.slane %v9484_v48, %v12254_v49  ;;  %v400_v8 = vrot.slane %v9483_v47, %v12251_v9 }
 0x18a   : > { %v8909_v25 = vpack.c.bf16 %v1009_v20, %v977_v22  ;;  %v1011_v18 = vmax.f32 %v883_v46, 0.0  ;;  %v642_v6 = vmul.f32 %v10533_v58, %v564_v2  ;;  %v674_v23 = vmul.f32 %v10539_v24, %v564_v2 }
 0x18b   : > { %8916 = vmatprep.subr.bf16.mxu1 %v8915_v19  ;;  %v572_v4 = vrot.slane %v412_v60, %v12251_v9  ;;  %v560_v11 = vrot.slane %v400_v8, %v12251_v9  ;;  %v408_v38 = vrot.slane %v9484_v48, %v12251_v9  ;;  %v706_v59 = vmul.f32 %v10589_v26, %v564_v2  ;;  %v12255_v8 = vld [vmem:[#allocation8_spill] sm:$0xff] }
 0x18c   : > { %8910 = vmatpush1.bf16.msra.mxu0 %v8909_v25  ;;  %v8917_v40 = vpack.c.bf16 %v1011_v18, %v979_v37  ;;  %v790_v10 = vadd.f32 %v10558_v54, %v642_v6  ;;  %v822_v35 = vadd.f32 %v10564_v62, %v674_v23  ;;  %v738_v55 = vmul.f32 %v10596_v15, %v564_v2 }
 0x18d   : > { %v644_v41 = vmul.f32 %v10533_v58, %v572_v4  ;;  %v676_v30 = vmul.f32 %v10539_v24, %v572_v4  ;;  %v641_v56 = vmul.f32 %v10533_v58, %v560_v11  ;;  %v673_v57 = vmul.f32 %v10539_v24, %v560_v11 }
 0x18e   : > { %8918 = vmatpush1.bf16.msra.mxu1 %v8917_v40  ;;  %v918_v36 = vmax.f32 %v790_v10, 0.0  ;;  %v950_v31 = vmax.f32 %v822_v35, 0.0  ;;  %v568_v12 = vrot.slane %v408_v38, %v12251_v9  ;;  %v854_v29 = vadd.f32 %v10618_v50, %v706_v59  ;;  %v9485_v59 = vld [vmem:[%s9879_s29 + $0x70] sm:$0xff]  ;;  %v9486_v10 = vld [vmem:[%s9879_s29 + $0x78] sm:$0xff] }
 0x18f   : > { %v792_v27 = vadd.f32 %v10558_v54, %v644_v41  ;;  %v824_v1 = vadd.f32 %v10564_v62, %v676_v30  ;;  %8596 = vmatmul.mubr.msk.f32.vlgmr.msra.gmra.mrb[20].mxu0 %vm1748_vm0, %v10678_v3  ;;  %v789_v34 = vadd.f32 %v10558_v54, %v641_v56  ;;  %v821_v17 = vadd.f32 %v10564_v62, %v673_v57 }
 0x190   : > { %v8919_v53 = vpack.c.bf16 %v950_v31, %v918_v36  ;;  %v643_v0 = vmul.f32 %v10533_v58, %v568_v12  ;;  %v675_v16 = vmul.f32 %v10539_v24, %v568_v12  ;;  %v886_v42 = vadd.f32 %v10625_v44, %v738_v55  ;;  %3833 = vmatprep.mubr.f32.mxu0 %v12241_v52 }
 0x191   : > { %v920_v14 = vmax.f32 %v792_v27, 0.0  ;;  %v952_v28 = vmax.f32 %v824_v1, 0.0  ;;  %8598 = vmatmul.mubr.msk.f32.vlgmr.msra.gmra.mrb[20].mxu1 %vm1748_vm0, %v10678_v3  ;;  %v917_v13 = vmax.f32 %v789_v34, 0.0  ;;  %v949_v21 = vmax.f32 %v821_v17, 0.0  ;;  %v11018_v34 = vld [vmem:[%s9879_s29] sm:$0xff] }
 0x192   : > { %8920 = vmatprep.subr.bf16.mxu0 %v8919_v53  ;;  %v791_v32 = vadd.f32 %v10558_v54, %v643_v0  ;;  %v823_v45 = vadd.f32 %v10564_v62, %v675_v16  ;;  %v982_v61 = vmax.f32 %v854_v29, 0.0  ;;  %v1014_v63 = vmax.f32 %v886_v42, 0.0  ;;  %3910 = vmatprep.mubr.f32.mxu1 %v12241_v52  ;;  %v11014_v29 = vpop.permute.xlu0 %4525 }
 0x193   : > { %v8927_v47 = vpack.c.bf16 %v952_v28, %v920_v14  ;;  %v8921_v51 = vpack.c.bf16 %v949_v21, %v917_v13  ;;  %v708_v5 = vmul.f32 %v10589_v26, %v572_v4  ;;  %v740_v33 = vmul.f32 %v10596_v15, %v572_v4  ;;  %8597 = vmatmul.mubr.msk.f32.gmra.mrb[22].mxu0 %vm1748_vm0, %v10707_v43  ;;  %v11026_v14 = vpop.permute.xlu1 %4530 }
 0x194   : > { %v919_v39 = vmax.f32 %v791_v32, 0.0  ;;  %v951_v7 = vmax.f32 %v823_v45, 0.0  ;;  %v8923_v22 = vpack.c.bf16 %v1014_v63, %v982_v61  ;;  %v705_v20 = vmul.f32 %v10589_v26, %v560_v11  ;;  %3981 = vmatprep.mubr.f32.mxu0 %v12241_v52 }
 0x195   : > { %8928 = vmatprep.subr.bf16.mxu1 %v8927_v47  ;;  %8922 = vmatpush1.bf16.msra.mxu0 %v8921_v51  ;;  %v856_v46 = vadd.f32 %v10618_v50, %v708_v5  ;;  %v888_v2 = vadd.f32 %v10625_v44, %v740_v33  ;;  %v737_v19 = vmul.f32 %v10596_v15, %v560_v11  ;;  %v10999_v25 = vsub.s32 6, %v12255_v8 }
 0x196   : > { %v8929_v37 = vpack.c.bf16 %v951_v7, %v919_v39  ;;  %8924 = vmatprep.subr.bf16.mxu0 %v8923_v22  ;;  %8599 = vmatmul.mubr.msk.f32.gmra.mrb[22].mxu1 %vm1748_vm0, %v10707_v43  ;;  %v853_v48 = vadd.f32 %v10618_v50, %v705_v20  ;;  %v707_v60 = vmul.f32 %v10589_v26, %v568_v12 }
 0x197   : > { %v984_v18 = vmax.f32 %v856_v46, 0.0  ;;  %v1016_v6 = vmax.f32 %v888_v2, 0.0  ;;  %v885_v23 = vadd.f32 %v10625_v44, %v737_v19  ;;  %v739_v4 = vmul.f32 %v10596_v15, %v568_v12  ;;  %4058 = vmatprep.mubr.f32.mxu1 %v12241_v52  ;;  %v11041_v46 = vpop.permute.xlu0 %4673 }
 0x198   : > { %8930 = vmatpush1.bf16.msra.mxu1 %v8929_v37  ;;  %v981_v11 = vmax.f32 %v853_v48, 0.0  ;;  %v855_v38 = vadd.f32 %v10618_v50, %v707_v60  ;;  %v420_v40 = vrot.slane %v9485_v59, %v12254_v49  ;;  %v428_v35 = vrot.slane %v9486_v10, %v12254_v49 }
 0x199   : > { %v8931_v55 = vpack.c.bf16 %v1016_v6, %v984_v18  ;;  %v1013_v41 = vmax.f32 %v885_v23, 0.0  ;;  %v887_v30 = vadd.f32 %v10625_v44, %v739_v4  ;;  %v416_v56 = vrot.slane %v9485_v59, %v12251_v9  ;;  %v11050_v6 = vpop.permute.xlu1 %4678 }
 0x19a   : > { %v983_v57 = vmax.f32 %v855_v38, 0.0  ;;  %v580_v36 = vrot.slane %v420_v40, %v12251_v9  ;;  %v588_v31 = vrot.slane %v428_v35, %v12251_v9  ;;  %v424_v12 = vrot.slane %v9486_v10, %v12251_v9 }
 0x19b   : > { %8932 = vmatprep.subr.bf16.mxu1 %v8931_v55  ;;  %v8925_v27 = vpack.c.bf16 %v1013_v41, %v981_v11  ;;  %v1015_v1 = vmax.f32 %v887_v30, 0.0  ;;  %v576_v49 = vrot.slane %v416_v56, %v12251_v9  ;;  %v4232_v17 = vrot.slane %v11018_v34, %v10999_v25 }
 0x19c   : > { %v646_v53 = vmul.f32 %v10533_v58, %v580_v36  ;;  %v678_v0 = vmul.f32 %v10539_v24, %v580_v36  ;;  %v648_v16 = vmul.f32 %v10533_v58, %v588_v31  ;;  %v680_v42 = vmul.f32 %v10539_v24, %v588_v31 }
 0x19d   : > { %8926 = vmatpush1.bf16.msra.mxu0 %v8925_v27  ;;  %v8933_v28 = vpack.c.bf16 %v1015_v1, %v983_v57  ;;  %v645_v13 = vmul.f32 %v10533_v58, %v576_v49  ;;  %v677_v21 = vmul.f32 %v10539_v24, %v576_v49  ;;  %v584_v32 = vrot.slane %v424_v12, %v12251_v9 }
 0x19e   : > { %v794_v45 = vadd.f32 %v10558_v54, %v646_v53  ;;  %v826_v61 = vadd.f32 %v10564_v62, %v678_v0  ;;  %v796_v63 = vadd.f32 %v10558_v54, %v648_v16  ;;  %v828_v47 = vadd.f32 %v10564_v62, %v680_v42 }
 0x19f   : > { %8934 = vmatpush1.bf16.msra.mxu1 %v8933_v28  ;;  %v793_v51 = vadd.f32 %v10558_v54, %v645_v13  ;;  %v825_v5 = vadd.f32 %v10564_v62, %v677_v21  ;;  %v647_v33 = vmul.f32 %v10533_v58, %v584_v32  ;;  %v679_v39 = vmul.f32 %v10539_v24, %v584_v32 }
 0x1a0   : > { %v922_v7 = vmax.f32 %v794_v45, 0.0  ;;  %v954_v22 = vmax.f32 %v826_v61, 0.0  ;;  %v924_v9 = vmax.f32 %v796_v63, 0.0  ;;  %v956_v20 = vmax.f32 %v828_v47, 0.0  ;;  %8600 = vmatmul.mubr.msk.f32.vlgmr.msra.gmra.mrb[24].mxu0 %vm1748_vm0, %v10678_v3 }
 0x1a1   : > { %v921_v2 = vmax.f32 %v793_v51, 0.0  ;;  %v953_v19 = vmax.f32 %v825_v5, 0.0  ;;  %v795_v37 = vadd.f32 %v10558_v54, %v647_v33  ;;  %v827_v48 = vadd.f32 %v10564_v62, %v679_v39  ;;  %3987 = vmatprep.mubr.f32.mxu0 %v12241_v52 }
 0x1a2   : > { %v8935_v58 = vpack.c.bf16 %v954_v22, %v922_v7  ;;  %v8943_v60 = vpack.c.bf16 %v956_v20, %v924_v9  ;;  %8602 = vmatmul.mubr.msk.f32.vlgmr.msra.gmra.mrb[24].mxu1 %vm1748_vm0, %v10678_v3  ;;  %v710_v24 = vmul.f32 %v10589_v26, %v580_v36  ;;  %v742_v18 = vmul.f32 %v10596_v15, %v580_v36  ;;  %v11069_v36 = vpop.permute.xlu0 %4535 }
 0x1a3   : > { %v8937_v23 = vpack.c.bf16 %v953_v19, %v921_v2  ;;  %v923_v4 = vmax.f32 %v795_v37, 0.0  ;;  %v955_v11 = vmax.f32 %v827_v48, 0.0  ;;  %v712_v54 = vmul.f32 %v10589_v26, %v588_v31  ;;  %4064 = vmatprep.mubr.f32.mxu1 %v12241_v52 }
 0x1a4   : > { %v11055_v62 = vsub.s32 2, %v12255_v8  ;;  %8936 = vmatprep.subr.bf16.mxu0 %v8935_v58  ;;  %8944 = vmatprep.subr.bf16.mxu1 %v8943_v60  ;;  %v858_v3 = vadd.f32 %v10618_v50, %v710_v24  ;;  %v890_v38 = vadd.f32 %v10625_v44, %v742_v18  ;;  %v744_v59 = vmul.f32 %v10596_v15, %v588_v31 }
 0x1a5   : > { %8938 = vmatpush1.bf16.msra.mxu0 %v8937_v23  ;;  %v8945_v40 = vpack.c.bf16 %v955_v11, %v923_v4  ;;  %v860_v10 = vadd.f32 %v10618_v50, %v712_v54  ;;  %v709_v35 = vmul.f32 %v10589_v26, %v576_v49  ;;  %v741_v55 = vmul.f32 %v10596_v15, %v576_v49  ;;  %v9489_v4 = vld [vmem:[#allocation2] sm:$0xff] }
 0x1a6   : > { %v986_v41 = vmax.f32 %v858_v3, 0.0  ;;  %v1018_v30 = vmax.f32 %v890_v38, 0.0  ;;  %v892_v56 = vadd.f32 %v10625_v44, %v744_v59  ;;  %8601 = vmatmul.mubr.msk.f32.gmra.mrb[26].mxu0 %vm1748_vm0, %v10707_v43  ;;  %8603 = vmatmul.mubr.msk.f32.gmra.mrb[26].mxu1 %vm1748_vm0, %v10707_v43  ;;  %v711_v57 = vmul.f32 %v10589_v26, %v584_v32  ;;  %v11081_v43 = vpop.permute.xlu1 %4540  ;;  %v11095_v39 = vpop.permute.xlu0 %4683 }
 0x1a7   : > { %8946 = vmatpush1.bf16.msra.mxu1 %v8945_v40  ;;  %v988_v31 = vmax.f32 %v860_v10, 0.0  ;;  %v857_v12 = vadd.f32 %v10618_v50, %v709_v35  ;;  %v889_v27 = vadd.f32 %v10625_v44, %v741_v55  ;;  %v743_v1 = vmul.f32 %v10596_v15, %v584_v32  ;;  %4135 = vmatprep.mubr.f32.mxu0 %v12241_v52  ;;  %v9488_v15 = vld [vmem:[%s9879_s29 + $0x8] sm:$0xff] }
 0x1a8   : > { %v8939_v49 = vpack.c.bf16 %v1018_v30, %v986_v41  ;;  %v1020_v53 = vmax.f32 %v892_v56, 0.0  ;;  %v859_v0 = vadd.f32 %v10618_v50, %v711_v57  ;;  %v4392_v26 = vrot.slane %v4232_v17, %v11055_v62  ;;  %4212 = vmatprep.mubr.f32.mxu1 %v12241_v52 }
 0x1a9   : > { %v985_v16 = vmax.f32 %v857_v12, 0.0  ;;  %v1017_v42 = vmax.f32 %v889_v27, 0.0  ;;  %v891_v28 = vadd.f32 %v10625_v44, %v743_v1  ;;  %v4240_v13 = vrot.slane %v9488_v15, %v10999_v25 }
 0x1aa   : > { %8940 = vmatprep.subr.bf16.mxu0 %v8939_v49  ;;  %v8947_v21 = vpack.c.bf16 %v1020_v53, %v988_v31  ;;  %v987_v32 = vmax.f32 %v859_v0, 0.0  ;;  %v4544_v50 = vmul.f32 %v11014_v29, %v4392_v26  ;;  %v4576_v45 = vmul.f32 %v11026_v14, %v4392_v26  ;;  %v11102_v48 = vpop.permute.xlu1 %4688  ;;  %v9490_v0 = vld [vmem:[#allocation2 + $0x8] sm:$0xff] }
 0x1ab   : > { %v8941_v61 = vpack.c.bf16 %v1017_v42, %v985_v16  ;;  %v1019_v17 = vmax.f32 %v891_v28, 0.0  ;;  %v4400_v63 = vrot.slane %v4240_v13, %v11055_v62  ;;  %v4228_v47 = vrot.slane %v11018_v34, %v11055_v62 }
 0x1ac   : > { %8948 = vmatprep.subr.bf16.mxu1 %v8947_v21  ;;  %v4692_v44 = vadd.f32 %v11041_v46, %v4544_v50  ;;  %v4724_v51 = vadd.f32 %v11050_v6, %v4576_v45  ;;  %v4236_v5 = vrot.slane %v9488_v15, %v11055_v62  ;;  %v4608_v33 = vmul.f32 %v11069_v36, %v4392_v26 }
 0x1ad   : > { %8942 = vmatpush1.bf16.msra.mxu0 %v8941_v61  ;;  %v8949_v7 = vpack.c.bf16 %v1019_v17, %v987_v32  ;;  %v4546_v22 = vmul.f32 %v11014_v29, %v4400_v63  ;;  %v4578_v9 = vmul.f32 %v11026_v14, %v4400_v63  ;;  %v4388_v20 = vrot.slane %v4228_v47, %v11055_v62 }
 0x1ae   : > { %v4820_v34 = vmax.f32 %v4692_v44, 0.0  ;;  %v4852_v2 = vmax.f32 %v4724_v51, 0.0  ;;  %v4396_v19 = vrot.slane %v4236_v5, %v11055_v62  ;;  %v4640_v37 = vmul.f32 %v11081_v43, %v4392_v26  ;;  %v9491_v44 = vld [vmem:[%s9879_s29 + $0x10] sm:$0xff]  ;;  %v9492_v5 = vld [vmem:[%s9879_s29 + $0x18] sm:$0xff] }
 0x1af   : > { %8950 = vmatpush1.bf16.msra.mxu1 %v8949_v7  ;;  %v4694_v58 = vadd.f32 %v11041_v46, %v4546_v22  ;;  %v4726_v60 = vadd.f32 %v11050_v6, %v4578_v9  ;;  %v4543_v24 = vmul.f32 %v11014_v29, %v4388_v20  ;;  %v4575_v18 = vmul.f32 %v11026_v14, %v4388_v20 }
 0x1b0   : > { %v8951_v23 = vpack.c.bf16 %v4852_v2, %v4820_v34  ;;  %8604 = vmatmul.mubr.msk.f32.vlgmr.msra.gmra.mrb[28].mxu0 %vm1748_vm0, %v9489_v4  ;;  %v4545_v11 = vmul.f32 %v11014_v29, %v4396_v19  ;;  %v4577_v54 = vmul.f32 %v11026_v14, %v4396_v19  ;;  %v4756_v3 = vadd.f32 %v11095_v39, %v4608_v33 }
 0x1b1   : > { %v4822_v38 = vmax.f32 %v4694_v58, 0.0  ;;  %v4854_v59 = vmax.f32 %v4726_v60, 0.0  ;;  %v4691_v40 = vadd.f32 %v11041_v46, %v4543_v24  ;;  %v4723_v10 = vadd.f32 %v11050_v6, %v4575_v18  ;;  %4141 = vmatprep.mubr.f32.mxu0 %v12241_v52 }
 0x1b2   : > { %8952 = vmatprep.subr.bf16.mxu0 %v8951_v23  ;;  %8606 = vmatmul.mubr.msk.f32.vlgmr.msra.gmra.mrb[28].mxu1 %vm1748_vm0, %v9489_v4  ;;  %v4693_v35 = vadd.f32 %v11041_v46, %v4545_v11  ;;  %v4725_v55 = vadd.f32 %v11050_v6, %v4577_v54  ;;  %v4788_v41 = vadd.f32 %v11102_v48, %v4640_v37  ;;  %v4884_v30 = vmax.f32 %v4756_v3, 0.0 }
 0x1b3   : > { %v8959_v56 = vpack.c.bf16 %v4854_v59, %v4822_v38  ;;  %v4819_v57 = vmax.f32 %v4691_v40, 0.0  ;;  %v4851_v31 = vmax.f32 %v4723_v10, 0.0  ;;  %v4610_v12 = vmul.f32 %v11069_v36, %v4400_v63  ;;  %4218 = vmatprep.mubr.f32.mxu1 %v12241_v52  ;;  %v11149_v38 = vld [vmem:[#allocation2 + $0x20] sm:$0xff] }
 0x1b4   : > { %v4821_v27 = vmax.f32 %v4693_v35, 0.0  ;;  %v4853_v1 = vmax.f32 %v4725_v55, 0.0  ;;  %v4916_v49 = vmax.f32 %v4788_v41, 0.0  ;;  %v4642_v53 = vmul.f32 %v11081_v43, %v4400_v63  ;;  %8605 = vmatmul.mubr.msk.f32.gmra.mrb[30].mxu0 %vm1748_vm0, %v9490_v0 }
 0x1b5   : > { %8960 = vmatprep.subr.bf16.mxu1 %v8959_v56  ;;  %v8953_v26 = vpack.c.bf16 %v4851_v31, %v4819_v57  ;;  %v4758_v16 = vadd.f32 %v11095_v39, %v4610_v12  ;;  %v4607_v42 = vmul.f32 %v11069_v36, %v4388_v20  ;;  %v4639_v28 = vmul.f32 %v11081_v43, %v4388_v20 }
 0x1b6   : > { %v8961_v15 = vpack.c.bf16 %v4853_v1, %v4821_v27  ;;  %v8955_v13 = vpack.c.bf16 %v4916_v49, %v4884_v30  ;;  %v4790_v21 = vadd.f32 %v11102_v48, %v4642_v53  ;;  %8607 = vmatmul.mubr.msk.f32.gmra.mrb[30].mxu1 %vm1748_vm0, %v9490_v0  ;;  %v4609_v32 = vmul.f32 %v11069_v36, %v4396_v19 }
 0x1b7   : > { %8954 = vmatpush1.bf16.msra.mxu0 %v8953_v26  ;;  %v4886_v50 = vmax.f32 %v4758_v16, 0.0  ;;  %v4755_v45 = vadd.f32 %v11095_v39, %v4607_v42  ;;  %v4787_v61 = vadd.f32 %v11102_v48, %v4639_v28  ;;  %v4641_v17 = vmul.f32 %v11081_v43, %v4396_v19  ;;  %5020 = vmatprep.mubr.f32.mxu0 %v12241_v52 }
 0x1b8   : > { %8962 = vmatpush1.bf16.msra.mxu1 %v8961_v15  ;;  %8956 = vmatprep.subr.bf16.mxu0 %v8955_v13  ;;  %v4918_v63 = vmax.f32 %v4790_v21, 0.0  ;;  %v4757_v47 = vadd.f32 %v11095_v39, %v4609_v32  ;;  %v4248_v51 = vrot.slane %v9491_v44, %v10999_v25  ;;  %v4256_v33 = vrot.slane %v9492_v5, %v10999_v25 }
 0x1b9   : > { %v4883_v7 = vmax.f32 %v4755_v45, 0.0  ;;  %v4915_v22 = vmax.f32 %v4787_v61, 0.0  ;;  %v4789_v9 = vadd.f32 %v11102_v48, %v4641_v17  ;;  %5097 = vmatprep.mubr.f32.mxu1 %v12241_v52  ;;  %v4244_v20 = vrot.slane %v9491_v44, %v11055_v62  ;;  %v11173_v17 = vld [vmem:[#allocation2 + $0x28] sm:$0xff] }
 0x1ba   : > { %v8963_v34 = vpack.c.bf16 %v4918_v63, %v4886_v50  ;;  %v4885_v2 = vmax.f32 %v4757_v47, 0.0  ;;  %v4408_v19 = vrot.slane %v4248_v51, %v11055_v62  ;;  %v4416_v37 = vrot.slane %v4256_v33, %v11055_v62 }
 0x1bb   : > { %v8957_v58 = vpack.c.bf16 %v4915_v22, %v4883_v7  ;;  %v4917_v60 = vmax.f32 %v4789_v9, 0.0  ;;  %v4404_v24 = vrot.slane %v4244_v20, %v11055_v62  ;;  %v4252_v18 = vrot.slane %v9492_v5, %v11055_v62 }
 0x1bc   : > { %8964 = vmatprep.subr.bf16.mxu1 %v8963_v34  ;;  %v4548_v23 = vmul.f32 %v11014_v29, %v4408_v19  ;;  %v4580_v4 = vmul.f32 %v11026_v14, %v4408_v19  ;;  %v4550_v11 = vmul.f32 %v11014_v29, %v4416_v37  ;;  %v4582_v54 = vmul.f32 %v11026_v14, %v4416_v37 }
 0x1bd   : > { %8958 = vmatpush1.bf16.msra.mxu0 %v8957_v58  ;;  %v8965_v3 = vpack.c.bf16 %v4917_v60, %v4885_v2  ;;  %v4547_v59 = vmul.f32 %v11014_v29, %v4404_v24  ;;  %v4579_v40 = vmul.f32 %v11026_v14, %v4404_v24  ;;  %v4412_v10 = vrot.slane %v4252_v18, %v11055_v62 }
 0x1be   : > { %v4696_v35 = vadd.f32 %v11041_v46, %v4548_v23  ;;  %v4728_v55 = vadd.f32 %v11050_v6, %v4580_v4  ;;  %v4698_v41 = vadd.f32 %v11041_v46, %v4550_v11  ;;  %v4730_v30 = vadd.f32 %v11050_v6, %v4582_v54  ;;  %v9493_v23 = vld [vmem:[%s9879_s29 + $0x20] sm:$0xff] }
 0x1bf   : > { %8966 = vmatpush1.bf16.msra.mxu1 %v8965_v3  ;;  %v4695_v56 = vadd.f32 %v11041_v46, %v4547_v59  ;;  %v4727_v57 = vadd.f32 %v11050_v6, %v4579_v40  ;;  %v4549_v31 = vmul.f32 %v11014_v29, %v4412_v10  ;;  %v4581_v12 = vmul.f32 %v11026_v14, %v4412_v10  ;;  %v9494_v59 = vld [vmem:[%s9879_s29 + $0x28] sm:$0xff] }
 0x1c0   : > { %v4824_v27 = vmax.f32 %v4696_v35, 0.0  ;;  %v4856_v1 = vmax.f32 %v4728_v55, 0.0  ;;  %v4826_v49 = vmax.f32 %v4698_v41, 0.0  ;;  %v4858_v53 = vmax.f32 %v4730_v30, 0.0  ;;  %8616 = vmatmul.mubr.msk.f32.vlgmr.msra.gmra.mrb[0].mxu0 %vm1748_vm0, %v11149_v38 }
 0x1c1   : > { %v4823_v0 = vmax.f32 %v4695_v56, 0.0  ;;  %v4855_v26 = vmax.f32 %v4727_v57, 0.0  ;;  %v4697_v16 = vadd.f32 %v11041_v46, %v4549_v31  ;;  %v4729_v42 = vadd.f32 %v11050_v6, %v4581_v12  ;;  %5026 = vmatprep.mubr.f32.mxu0 %v12241_v52 }
 0x1c2   : > { %v8967_v28 = vpack.c.bf16 %v4856_v1, %v4824_v27  ;;  %v8975_v15 = vpack.c.bf16 %v4858_v53, %v4826_v49  ;;  %8618 = vmatmul.mubr.msk.f32.vlgmr.msra.gmra.mrb[0].mxu1 %vm1748_vm0, %v11149_v38  ;;  %v4612_v13 = vmul.f32 %v11069_v36, %v4408_v19  ;;  %v4644_v21 = vmul.f32 %v11081_v43, %v4408_v19 }
 0x1c3   : > { %v8969_v32 = vpack.c.bf16 %v4855_v26, %v4823_v0  ;;  %v4825_v50 = vmax.f32 %v4697_v16, 0.0  ;;  %v4857_v45 = vmax.f32 %v4729_v42, 0.0  ;;  %v4614_v61 = vmul.f32 %v11069_v36, %v4416_v37  ;;  %5103 = vmatprep.mubr.f32.mxu1 %v12241_v52 }
 0x1c4   : > { %8968 = vmatprep.subr.bf16.mxu0 %v8967_v28  ;;  %8976 = vmatprep.subr.bf16.mxu1 %v8975_v15  ;;  %v4760_v63 = vadd.f32 %v11095_v39, %v4612_v13  ;;  %v4792_v47 = vadd.f32 %v11102_v48, %v4644_v21  ;;  %v4646_v44 = vmul.f32 %v11081_v43, %v4416_v37 }
 0x1c5   : > { %8970 = vmatpush1.bf16.msra.mxu0 %v8969_v32  ;;  %v8977_v51 = vpack.c.bf16 %v4857_v45, %v4825_v50  ;;  %v4762_v5 = vadd.f32 %v11095_v39, %v4614_v61  ;;  %v4611_v33 = vmul.f32 %v11069_v36, %v4404_v24  ;;  %v4643_v7 = vmul.f32 %v11081_v43, %v4404_v24 }
 0x1c6   : > { %v4888_v22 = vmax.f32 %v4760_v63, 0.0  ;;  %v4920_v9 = vmax.f32 %v4792_v47, 0.0  ;;  %v4794_v20 = vadd.f32 %v11102_v48, %v4646_v44  ;;  %8617 = vmatmul.mubr.msk.f32.gmra.mrb[2].mxu0 %vm1748_vm0, %v11173_v17  ;;  %8619 = vmatmul.mubr.msk.f32.gmra.mrb[2].mxu1 %vm1748_vm0, %v11173_v17  ;;  %v4613_v34 = vmul.f32 %v11069_v36, %v4412_v10 }
 0x1c7   : > { %8978 = vmatpush1.bf16.msra.mxu1 %v8977_v51  ;;  %v4890_v2 = vmax.f32 %v4762_v5, 0.0  ;;  %v4759_v19 = vadd.f32 %v11095_v39, %v4611_v33  ;;  %v4791_v37 = vadd.f32 %v11102_v48, %v4643_v7  ;;  %v4645_v58 = vmul.f32 %v11081_v43, %v4412_v10  ;;  %5174 = vmatprep.mubr.f32.mxu0 %v12241_v52 }
 0x1c8   : > { %v8971_v60 = vpack.c.bf16 %v4920_v9, %v4888_v22  ;;  %v4922_v24 = vmax.f32 %v4794_v20, 0.0  ;;  %v4761_v18 = vadd.f32 %v11095_v39, %v4613_v34  ;;  %v4264_v4 = vrot.slane %v9493_v23, %v10999_v25  ;;  %5251 = vmatprep.mubr.f32.mxu1 %v12241_v52 }
 0x1c9   : > { %v4887_v11 = vmax.f32 %v4759_v19, 0.0  ;;  %v4919_v54 = vmax.f32 %v4791_v37, 0.0  ;;  %v4793_v3 = vadd.f32 %v11102_v48, %v4645_v58  ;;  %v4272_v40 = vrot.slane %v9494_v59, %v10999_v25 }
 0x1ca   : > { %8972 = vmatprep.subr.bf16.mxu0 %v8971_v60  ;;  %v8979_v10 = vpack.c.bf16 %v4922_v24, %v4890_v2  ;;  %v4889_v35 = vmax.f32 %v4761_v18, 0.0  ;;  %v4424_v55 = vrot.slane %v4264_v4, %v11055_v62  ;;  %v4260_v41 = vrot.slane %v9493_v23, %v11055_v62 }
 0x1cb   : > { %v8973_v30 = vpack.c.bf16 %v4919_v54, %v4887_v11  ;;  %v4921_v56 = vmax.f32 %v4793_v3, 0.0  ;;  %v4432_v57 = vrot.slane %v4272_v40, %v11055_v62  ;;  %v4268_v31 = vrot.slane %v9494_v59, %v11055_v62 }
 0x1cc   : > { %8980 = vmatprep.subr.bf16.mxu1 %v8979_v10  ;;  %v4552_v12 = vmul.f32 %v11014_v29, %v4424_v55  ;;  %v4584_v27 = vmul.f32 %v11026_v14, %v4424_v55  ;;  %v4420_v1 = vrot.slane %v4260_v41, %v11055_v62  ;;  %v4616_v49 = vmul.f32 %v11069_v36, %v4424_v55 }
 0x1cd   : > { %8974 = vmatpush1.bf16.msra.mxu0 %v8973_v30  ;;  %v8981_v53 = vpack.c.bf16 %v4921_v56, %v4889_v35  ;;  %v4554_v0 = vmul.f32 %v11014_v29, %v4432_v57  ;;  %v4586_v26 = vmul.f32 %v11026_v14, %v4432_v57  ;;  %v4428_v16 = vrot.slane %v4268_v31, %v11055_v62  ;;  %v9495_v56 = vld [vmem:[%s9879_s29 + $0x30] sm:$0xff] }
 0x1ce   : > { %v4700_v42 = vadd.f32 %v11041_v46, %v4552_v12  ;;  %v4732_v28 = vadd.f32 %v11050_v6, %v4584_v27  ;;  %v4551_v15 = vmul.f32 %v11014_v29, %v4420_v1  ;;  %v4583_v13 = vmul.f32 %v11026_v14, %v4420_v1 }
 0x1cf   : > { %8982 = vmatpush1.bf16.msra.mxu1 %v8981_v53  ;;  %v4702_v21 = vadd.f32 %v11041_v46, %v4554_v0  ;;  %v4734_v32 = vadd.f32 %v11050_v6, %v4586_v26  ;;  %v4553_v50 = vmul.f32 %v11014_v29, %v4428_v16  ;;  %v4585_v45 = vmul.f32 %v11026_v14, %v4428_v16 }
 0x1d0   : > { %v4828_v61 = vmax.f32 %v4700_v42, 0.0  ;;  %v4860_v63 = vmax.f32 %v4732_v28, 0.0  ;;  %8620 = vmatmul.mubr.msk.f32.vlgmr.msra.gmra.mrb[4].mxu0 %vm1748_vm0, %v11149_v38  ;;  %v4699_v47 = vadd.f32 %v11041_v46, %v4551_v15  ;;  %v4731_v44 = vadd.f32 %v11050_v6, %v4583_v13  ;;  %v9496_v28 = vld [vmem:[%s9879_s29 + $0x38] sm:$0xff] }
 0x1d1   : > { %v4830_v51 = vmax.f32 %v4702_v21, 0.0  ;;  %v4862_v5 = vmax.f32 %v4734_v32, 0.0  ;;  %v4701_v33 = vadd.f32 %v11041_v46, %v4553_v50  ;;  %v4733_v7 = vadd.f32 %v11050_v6, %v4585_v45  ;;  %5180 = vmatprep.mubr.f32.mxu0 %v12241_v52 }
 0x1d2   : > { %v8983_v22 = vpack.c.bf16 %v4860_v63, %v4828_v61  ;;  %8622 = vmatmul.mubr.msk.f32.vlgmr.msra.gmra.mrb[4].mxu1 %vm1748_vm0, %v11149_v38  ;;  %v4827_v9 = vmax.f32 %v4699_v47, 0.0  ;;  %v4859_v20 = vmax.f32 %v4731_v44, 0.0  ;;  %v4648_v34 = vmul.f32 %v11081_v43, %v4424_v55 }
 0x1d3   : > { %v8991_v2 = vpack.c.bf16 %v4862_v5, %v4830_v51  ;;  %v4829_v19 = vmax.f32 %v4701_v33, 0.0  ;;  %v4861_v37 = vmax.f32 %v4733_v7, 0.0  ;;  %v4764_v58 = vadd.f32 %v11095_v39, %v4616_v49  ;;  %5257 = vmatprep.mubr.f32.mxu1 %v12241_v52 }
 0x1d4   : > { %8984 = vmatprep.subr.bf16.mxu0 %v8983_v22  ;;  %v8985_v60 = vpack.c.bf16 %v4859_v20, %v4827_v9  ;;  %v4796_v24 = vadd.f32 %v11102_v48, %v4648_v34  ;;  %v4618_v18 = vmul.f32 %v11069_v36, %v4432_v57  ;;  %v4650_v23 = vmul.f32 %v11081_v43, %v4432_v57 }
 0x1d5   : > { %8992 = vmatprep.subr.bf16.mxu1 %v8991_v2  ;;  %v8993_v4 = vpack.c.bf16 %v4861_v37, %v4829_v19  ;;  %v4892_v11 = vmax.f32 %v4764_v58, 0.0  ;;  %8621 = vmatmul.mubr.msk.f32.gmra.mrb[6].mxu0 %vm1748_vm0, %v11173_v17  ;;  %v4615_v54 = vmul.f32 %v11069_v36, %v4420_v1  ;;  %v4647_v3 = vmul.f32 %v11081_v43, %v4420_v1 }
 0x1d6   : > { %8986 = vmatpush1.bf16.msra.mxu0 %v8985_v60  ;;  %v4924_v59 = vmax.f32 %v4796_v24, 0.0  ;;  %v4766_v40 = vadd.f32 %v11095_v39, %v4618_v18  ;;  %v4798_v10 = vadd.f32 %v11102_v48, %v4650_v23  ;;  %8623 = vmatmul.mubr.msk.f32.gmra.mrb[6].mxu1 %vm1748_vm0, %v11173_v17  ;;  %v4617_v35 = vmul.f32 %v11069_v36, %v4428_v16 }
 0x1d7   : > { %8994 = vmatpush1.bf16.msra.mxu1 %v8993_v4  ;;  %v4763_v55 = vadd.f32 %v11095_v39, %v4615_v54  ;;  %v4795_v41 = vadd.f32 %v11102_v48, %v4647_v3  ;;  %v4649_v30 = vmul.f32 %v11081_v43, %v4428_v16  ;;  %v4280_v57 = vrot.slane %v9495_v56, %v10999_v25 }
 0x1d8   : > { %v8987_v31 = vpack.c.bf16 %v4924_v59, %v4892_v11  ;;  %v4894_v12 = vmax.f32 %v4766_v40, 0.0  ;;  %v4926_v27 = vmax.f32 %v4798_v10, 0.0  ;;  %v4765_v1 = vadd.f32 %v11095_v39, %v4617_v35  ;;  %5328 = vmatprep.mubr.f32.mxu0 %v12241_v52  ;;  %5405 = vmatprep.mubr.f32.mxu1 %v12241_v52 }
 0x1d9   : > { %v4891_v49 = vmax.f32 %v4763_v55, 0.0  ;;  %v4923_v53 = vmax.f32 %v4795_v41, 0.0  ;;  %v4797_v0 = vadd.f32 %v11102_v48, %v4649_v30  ;;  %v4440_v26 = vrot.slane %v4280_v57, %v11055_v62 }
 0x1da   : > { %8988 = vmatprep.subr.bf16.mxu0 %v8987_v31  ;;  %v8995_v16 = vpack.c.bf16 %v4926_v27, %v4894_v12  ;;  %v4893_v42 = vmax.f32 %v4765_v1, 0.0  ;;  %v4288_v15 = vrot.slane %v9496_v28, %v10999_v25  ;;  %v4276_v13 = vrot.slane %v9495_v56, %v11055_v62 }
 0x1db   : > { %v8989_v21 = vpack.c.bf16 %v4923_v53, %v4891_v49  ;;  %v4925_v32 = vmax.f32 %v4797_v0, 0.0  ;;  %v4556_v50 = vmul.f32 %v11014_v29, %v4440_v26  ;;  %v4588_v45 = vmul.f32 %v11026_v14, %v4440_v26 }
 0x1dc   : > { %8996 = vmatprep.subr.bf16.mxu1 %v8995_v16  ;;  %v4448_v61 = vrot.slane %v4288_v15, %v11055_v62  ;;  %v4436_v63 = vrot.slane %v4276_v13, %v11055_v62  ;;  %v4284_v47 = vrot.slane %v9496_v28, %v11055_v62  ;;  %v4620_v44 = vmul.f32 %v11069_v36, %v4440_v26 }
 0x1dd   : > { %8990 = vmatpush1.bf16.msra.mxu0 %v8989_v21  ;;  %v8997_v51 = vpack.c.bf16 %v4925_v32, %v4893_v42  ;;  %v4704_v5 = vadd.f32 %v11041_v46, %v4556_v50  ;;  %v4736_v33 = vadd.f32 %v11050_v6, %v4588_v45  ;;  %v4652_v7 = vmul.f32 %v11081_v43, %v4440_v26 }
 0x1de   : > { %v4558_v22 = vmul.f32 %v11014_v29, %v4448_v61  ;;  %v4590_v9 = vmul.f32 %v11026_v14, %v4448_v61  ;;  %v4555_v20 = vmul.f32 %v11014_v29, %v4436_v63  ;;  %v4587_v34 = vmul.f32 %v11026_v14, %v4436_v63 }
 0x1df   : > { %8998 = vmatpush1.bf16.msra.mxu1 %v8997_v51  ;;  %v4832_v2 = vmax.f32 %v4704_v5, 0.0  ;;  %v4864_v19 = vmax.f32 %v4736_v33, 0.0  ;;  %v4444_v37 = vrot.slane %v4284_v47, %v11055_v62  ;;  %v4768_v58 = vadd.f32 %v11095_v39, %v4620_v44  ;;  %v9497_v47 = vld [vmem:[%s9879_s29 + $0x40] sm:$0xff]  ;;  %v9498_v51 = vld [vmem:[%s9879_s29 + $0x48] sm:$0xff] }
 0x1e0   : > { %v4706_v60 = vadd.f32 %v11041_v46, %v4558_v22  ;;  %v4738_v24 = vadd.f32 %v11050_v6, %v4590_v9  ;;  %8624 = vmatmul.mubr.msk.f32.vlgmr.msra.gmra.mrb[8].mxu0 %vm1748_vm0, %v11149_v38  ;;  %v4703_v18 = vadd.f32 %v11041_v46, %v4555_v20  ;;  %v4735_v23 = vadd.f32 %v11050_v6, %v4587_v34 }
 0x1e1   : > { %v8999_v4 = vpack.c.bf16 %v4864_v19, %v4832_v2  ;;  %v4557_v11 = vmul.f32 %v11014_v29, %v4444_v37  ;;  %v4589_v54 = vmul.f32 %v11026_v14, %v4444_v37  ;;  %v4800_v3 = vadd.f32 %v11102_v48, %v4652_v7  ;;  %5334 = vmatprep.mubr.f32.mxu0 %v12241_v52 }
 0x1e2   : > { %v4834_v59 = vmax.f32 %v4706_v60, 0.0  ;;  %v4866_v40 = vmax.f32 %v4738_v24, 0.0  ;;  %8626 = vmatmul.mubr.msk.f32.vlgmr.msra.gmra.mrb[8].mxu1 %vm1748_vm0, %v11149_v38  ;;  %v4831_v10 = vmax.f32 %v4703_v18, 0.0  ;;  %v4863_v35 = vmax.f32 %v4735_v23, 0.0  ;;  %v11312_v24 = vld [vmem:[%s9879_s29 + $0x50] sm:$0xff] }
 0x1e3   : > { %9000 = vmatprep.subr.bf16.mxu0 %v8999_v4  ;;  %v4705_v55 = vadd.f32 %v11041_v46, %v4557_v11  ;;  %v4737_v41 = vadd.f32 %v11050_v6, %v4589_v54  ;;  %v4896_v30 = vmax.f32 %v4768_v58, 0.0  ;;  %v4928_v56 = vmax.f32 %v4800_v3, 0.0  ;;  %5411 = vmatprep.mubr.f32.mxu1 %v12241_v52 }
 0x1e4   : > { %v9007_v57 = vpack.c.bf16 %v4866_v40, %v4834_v59  ;;  %v9001_v31 = vpack.c.bf16 %v4863_v35, %v4831_v10  ;;  %v4622_v12 = vmul.f32 %v11069_v36, %v4448_v61  ;;  %v4654_v27 = vmul.f32 %v11081_v43, %v4448_v61  ;;  %8625 = vmatmul.mubr.msk.f32.gmra.mrb[10].mxu0 %vm1748_vm0, %v11173_v17 }
 0x1e5   : > { %v4833_v1 = vmax.f32 %v4705_v55, 0.0  ;;  %v4865_v49 = vmax.f32 %v4737_v41, 0.0  ;;  %v9003_v53 = vpack.c.bf16 %v4928_v56, %v4896_v30  ;;  %v4619_v0 = vmul.f32 %v11069_v36, %v4436_v63  ;;  %5482 = vmatprep.mubr.f32.mxu0 %v12241_v52 }
 0x1e6   : > { %9008 = vmatprep.subr.bf16.mxu1 %v9007_v57  ;;  %9002 = vmatpush1.bf16.msra.mxu0 %v9001_v31  ;;  %v4770_v26 = vadd.f32 %v11095_v39, %v4622_v12  ;;  %v4802_v16 = vadd.f32 %v11102_v48, %v4654_v27  ;;  %v4651_v42 = vmul.f32 %v11081_v43, %v4436_v63 }
 0x1e7   : > { %v9009_v28 = vpack.c.bf16 %v4865_v49, %v4833_v1  ;;  %9004 = vmatprep.subr.bf16.mxu0 %v9003_v53  ;;  %8627 = vmatmul.mubr.msk.f32.gmra.mrb[10].mxu1 %vm1748_vm0, %v11173_v17  ;;  %v4767_v15 = vadd.f32 %v11095_v39, %v4619_v0  ;;  %v4621_v13 = vmul.f32 %v11069_v36, %v4444_v37 }
 0x1e8   : > { %v4898_v21 = vmax.f32 %v4770_v26, 0.0  ;;  %v4930_v32 = vmax.f32 %v4802_v16, 0.0  ;;  %v4799_v50 = vadd.f32 %v11102_v48, %v4651_v42  ;;  %v4653_v45 = vmul.f32 %v11081_v43, %v4444_v37  ;;  %5559 = vmatprep.mubr.f32.mxu1 %v12241_v52 }
 0x1e9   : > { %9010 = vmatpush1.bf16.msra.mxu1 %v9009_v28  ;;  %v4895_v61 = vmax.f32 %v4767_v15, 0.0  ;;  %v4769_v63 = vadd.f32 %v11095_v39, %v4621_v13  ;;  %v4296_v44 = vrot.slane %v9497_v47, %v10999_v25  ;;  %v4304_v5 = vrot.slane %v9498_v51, %v10999_v25 }
 0x1ea   : > { %v9011_v33 = vpack.c.bf16 %v4930_v32, %v4898_v21  ;;  %v4927_v7 = vmax.f32 %v4799_v50, 0.0  ;;  %v4801_v22 = vadd.f32 %v11102_v48, %v4653_v45  ;;  %v4292_v9 = vrot.slane %v9497_v47, %v11055_v62 }
 0x1eb   : > { %v4897_v20 = vmax.f32 %v4769_v63, 0.0  ;;  %v4456_v34 = vrot.slane %v4296_v44, %v11055_v62  ;;  %v4464_v2 = vrot.slane %v4304_v5, %v11055_v62  ;;  %v4300_v19 = vrot.slane %v9498_v51, %v11055_v62 }
 0x1ec   : > { %9012 = vmatprep.subr.bf16.mxu1 %v9011_v33  ;;  %v9005_v37 = vpack.c.bf16 %v4927_v7, %v4895_v61  ;;  %v4929_v58 = vmax.f32 %v4801_v22, 0.0  ;;  %v4452_v60 = vrot.slane %v4292_v9, %v11055_v62  ;;  %v4312_v18 = vrot.slane %v11312_v24, %v10999_v25 }
 0x1ed   : > { %v4560_v23 = vmul.f32 %v11014_v29, %v4456_v34  ;;  %v4592_v4 = vmul.f32 %v11026_v14, %v4456_v34  ;;  %v4562_v11 = vmul.f32 %v11014_v29, %v4464_v2  ;;  %v4594_v54 = vmul.f32 %v11026_v14, %v4464_v2 }
 0x1ee   : > { %9006 = vmatpush1.bf16.msra.mxu0 %v9005_v37  ;;  %v9013_v3 = vpack.c.bf16 %v4929_v58, %v4897_v20  ;;  %v4559_v59 = vmul.f32 %v11014_v29, %v4452_v60  ;;  %v4591_v40 = vmul.f32 %v11026_v14, %v4452_v60  ;;  %v4460_v10 = vrot.slane %v4300_v19, %v11055_v62 }
 0x1ef   : > { %v4708_v35 = vadd.f32 %v11041_v46, %v4560_v23  ;;  %v4740_v55 = vadd.f32 %v11050_v6, %v4592_v4  ;;  %v4710_v41 = vadd.f32 %v11041_v46, %v4562_v11  ;;  %v4742_v30 = vadd.f32 %v11050_v6, %v4594_v54 }
 0x1f0   : > { %9014 = vmatpush1.bf16.msra.mxu1 %v9013_v3  ;;  %v4707_v56 = vadd.f32 %v11041_v46, %v4559_v59  ;;  %v4739_v57 = vadd.f32 %v11050_v6, %v4591_v40  ;;  %v4561_v31 = vmul.f32 %v11014_v29, %v4460_v10  ;;  %v4593_v12 = vmul.f32 %v11026_v14, %v4460_v10 }
 0x1f1   : > { %v4836_v27 = vmax.f32 %v4708_v35, 0.0  ;;  %v4868_v1 = vmax.f32 %v4740_v55, 0.0  ;;  %v4838_v49 = vmax.f32 %v4710_v41, 0.0  ;;  %v4870_v53 = vmax.f32 %v4742_v30, 0.0  ;;  %8628 = vmatmul.mubr.msk.f32.vlgmr.msra.gmra.mrb[12].mxu0 %vm1748_vm0, %v11149_v38  ;;  %v9500_v35 = vld [vmem:[%s9879_s29 + $0x58] sm:$0xff] }
 0x1f2   : > { %v4835_v0 = vmax.f32 %v4707_v56, 0.0  ;;  %v4867_v26 = vmax.f32 %v4739_v57, 0.0  ;;  %v4709_v16 = vadd.f32 %v11041_v46, %v4561_v31  ;;  %v4741_v42 = vadd.f32 %v11050_v6, %v4593_v12  ;;  %5488 = vmatprep.mubr.f32.mxu0 %v12241_v52 }
 0x1f3   : > { %v9015_v28 = vpack.c.bf16 %v4868_v1, %v4836_v27  ;;  %v9023_v15 = vpack.c.bf16 %v4870_v53, %v4838_v49  ;;  %8630 = vmatmul.mubr.msk.f32.vlgmr.msra.gmra.mrb[12].mxu1 %vm1748_vm0, %v11149_v38  ;;  %v4624_v13 = vmul.f32 %v11069_v36, %v4456_v34  ;;  %v4656_v21 = vmul.f32 %v11081_v43, %v4456_v34 }
 0x1f4   : > { %v9017_v32 = vpack.c.bf16 %v4867_v26, %v4835_v0  ;;  %v4837_v50 = vmax.f32 %v4709_v16, 0.0  ;;  %v4869_v45 = vmax.f32 %v4741_v42, 0.0  ;;  %v4626_v61 = vmul.f32 %v11069_v36, %v4464_v2  ;;  %5565 = vmatprep.mubr.f32.mxu1 %v12241_v52 }
 0x1f5   : > { %v11343_v63 = vsub.s32 3, %v12255_v8  ;;  %9016 = vmatprep.subr.bf16.mxu0 %v9015_v28  ;;  %9024 = vmatprep.subr.bf16.mxu1 %v9023_v15  ;;  %v4772_v47 = vadd.f32 %v11095_v39, %v4624_v13  ;;  %v4804_v44 = vadd.f32 %v11102_v48, %v4656_v21  ;;  %v4658_v51 = vmul.f32 %v11081_v43, %v4464_v2 }
 0x1f6   : > { %9018 = vmatpush1.bf16.msra.mxu0 %v9017_v32  ;;  %v9025_v5 = vpack.c.bf16 %v4869_v45, %v4837_v50  ;;  %v4774_v33 = vadd.f32 %v11095_v39, %v4626_v61  ;;  %v4623_v7 = vmul.f32 %v11069_v36, %v4452_v60  ;;  %v4655_v22 = vmul.f32 %v11081_v43, %v4452_v60 }
 0x1f7   : > { %v4900_v9 = vmax.f32 %v4772_v47, 0.0  ;;  %v4932_v20 = vmax.f32 %v4804_v44, 0.0  ;;  %v4806_v34 = vadd.f32 %v11102_v48, %v4658_v51  ;;  %8629 = vmatmul.mubr.msk.f32.gmra.mrb[14].mxu0 %vm1748_vm0, %v11173_v17  ;;  %8631 = vmatmul.mubr.msk.f32.gmra.mrb[14].mxu1 %vm1748_vm0, %v11173_v17  ;;  %v4625_v2 = vmul.f32 %v11069_v36, %v4460_v10 }
 0x1f8   : > { %9026 = vmatpush1.bf16.msra.mxu1 %v9025_v5  ;;  %v4902_v19 = vmax.f32 %v4774_v33, 0.0  ;;  %v4771_v37 = vadd.f32 %v11095_v39, %v4623_v7  ;;  %v4803_v58 = vadd.f32 %v11102_v48, %v4655_v22  ;;  %v4657_v60 = vmul.f32 %v11081_v43, %v4460_v10  ;;  %5636 = vmatprep.mubr.f32.mxu0 %v12241_v52 }
 0x1f9   : > { %v9019_v23 = vpack.c.bf16 %v4932_v20, %v4900_v9  ;;  %v4934_v4 = vmax.f32 %v4806_v34, 0.0  ;;  %v4773_v11 = vadd.f32 %v11095_v39, %v4625_v2  ;;  %v4472_v54 = vrot.slane %v4312_v18, %v11055_v62  ;;  %5713 = vmatprep.mubr.f32.mxu1 %v12241_v52 }
 0x1fa   : > { %v4899_v3 = vmax.f32 %v4771_v37, 0.0  ;;  %v4931_v59 = vmax.f32 %v4803_v58, 0.0  ;;  %v4805_v40 = vadd.f32 %v11102_v48, %v4657_v60  ;;  %v4320_v10 = vrot.slane %v9500_v35, %v10999_v25 }
 0x1fb   : > { %9020 = vmatprep.subr.bf16.mxu0 %v9019_v23  ;;  %v9027_v55 = vpack.c.bf16 %v4934_v4, %v4902_v19  ;;  %v4901_v41 = vmax.f32 %v4773_v11, 0.0  ;;  %v4564_v30 = vmul.f32 %v11014_v29, %v4472_v54  ;;  %v4596_v56 = vmul.f32 %v11026_v14, %v4472_v54 }
 0x1fc   : > { %v9021_v57 = vpack.c.bf16 %v4931_v59, %v4899_v3  ;;  %v4933_v31 = vmax.f32 %v4805_v40, 0.0  ;;  %v4480_v18 = vrot.slane %v4320_v10, %v11055_v62  ;;  %v4308_v12 = vrot.slane %v11312_v24, %v11055_v62 }
 0x1fd   : > { %9028 = vmatprep.subr.bf16.mxu1 %v9027_v55  ;;  %v4712_v27 = vadd.f32 %v11041_v46, %v4564_v30  ;;  %v4744_v1 = vadd.f32 %v11050_v6, %v4596_v56  ;;  %v4316_v49 = vrot.slane %v9500_v35, %v11055_v62  ;;  %v4628_v53 = vmul.f32 %v11069_v36, %v4472_v54 }
 0x1fe   : > { %9022 = vmatpush1.bf16.msra.mxu0 %v9021_v57  ;;  %v9029_v0 = vpack.c.bf16 %v4933_v31, %v4901_v41  ;;  %v4566_v26 = vmul.f32 %v11014_v29, %v4480_v18  ;;  %v4598_v16 = vmul.f32 %v11026_v14, %v4480_v18  ;;  %v4468_v42 = vrot.slane %v4308_v12, %v11055_v62 }
 0x1ff   : > { %v4840_v28 = vmax.f32 %v4712_v27, 0.0  ;;  %v4872_v15 = vmax.f32 %v4744_v1, 0.0  ;;  %v4476_v24 = vrot.slane %v4316_v49, %v11055_v62  ;;  %v4660_v13 = vmul.f32 %v11081_v43, %v4472_v54  ;;  %v9501_v1 = vld [vmem:[%s9879_s29 + $0x60] sm:$0xff] }
 0x200   : > { %9030 = vmatpush1.bf16.msra.mxu1 %v9029_v0  ;;  %v4714_v21 = vadd.f32 %v11041_v46, %v4566_v26  ;;  %v4746_v32 = vadd.f32 %v11050_v6, %v4598_v16  ;;  %v4563_v50 = vmul.f32 %v11014_v29, %v4468_v42  ;;  %v4595_v45 = vmul.f32 %v11026_v14, %v4468_v42 }
 0x201   : > { %v9031_v61 = vpack.c.bf16 %v4872_v15, %v4840_v28  ;;  %8632 = vmatmul.mubr.msk.f32.vlgmr.msra.gmra.mrb[16].mxu0 %vm1748_vm0, %v11149_v38  ;;  %v4565_v47 = vmul.f32 %v11014_v29, %v4476_v24  ;;  %v4597_v44 = vmul.f32 %v11026_v14, %v4476_v24  ;;  %v4776_v51 = vadd.f32 %v11095_v39, %v4628_v53  ;;  %v9502_v53 = vld [vmem:[%s9879_s29 + $0x68] sm:$0xff] }
 0x202   : > { %v4842_v5 = vmax.f32 %v4714_v21, 0.0  ;;  %v4874_v33 = vmax.f32 %v4746_v32, 0.0  ;;  %v4711_v7 = vadd.f32 %v11041_v46, %v4563_v50  ;;  %v4743_v22 = vadd.f32 %v11050_v6, %v4595_v45  ;;  %5642 = vmatprep.mubr.f32.mxu0 %v12241_v52 }
 0x203   : > { %9032 = vmatprep.subr.bf16.mxu0 %v9031_v61  ;;  %8634 = vmatmul.mubr.msk.f32.vlgmr.msra.gmra.mrb[16].mxu1 %vm1748_vm0, %v11149_v38  ;;  %v4713_v9 = vadd.f32 %v11041_v46, %v4565_v47  ;;  %v4745_v20 = vadd.f32 %v11050_v6, %v4597_v44  ;;  %v4808_v34 = vadd.f32 %v11102_v48, %v4660_v13  ;;  %v4904_v2 = vmax.f32 %v4776_v51, 0.0 }
 0x204   : > { %v9039_v19 = vpack.c.bf16 %v4874_v33, %v4842_v5  ;;  %v4839_v37 = vmax.f32 %v4711_v7, 0.0  ;;  %v4871_v58 = vmax.f32 %v4743_v22, 0.0  ;;  %v4630_v60 = vmul.f32 %v11069_v36, %v4480_v18  ;;  %5719 = vmatprep.mubr.f32.mxu1 %v12241_v52 }
 0x205   : > { %v4841_v23 = vmax.f32 %v4713_v9, 0.0  ;;  %v4873_v4 = vmax.f32 %v4745_v20, 0.0  ;;  %v4936_v11 = vmax.f32 %v4808_v34, 0.0  ;;  %v4662_v54 = vmul.f32 %v11081_v43, %v4480_v18  ;;  %8633 = vmatmul.mubr.msk.f32.gmra.mrb[18].mxu0 %vm1748_vm0, %v11173_v17 }
 0x206   : > { %9040 = vmatprep.subr.bf16.mxu1 %v9039_v19  ;;  %v9033_v3 = vpack.c.bf16 %v4871_v58, %v4839_v37  ;;  %v4778_v59 = vadd.f32 %v11095_v39, %v4630_v60  ;;  %v4627_v40 = vmul.f32 %v11069_v36, %v4468_v42  ;;  %v4659_v35 = vmul.f32 %v11081_v43, %v4468_v42 }
 0x207   : > { %v9041_v10 = vpack.c.bf16 %v4873_v4, %v4841_v23  ;;  %v9035_v55 = vpack.c.bf16 %v4936_v11, %v4904_v2  ;;  %v4810_v41 = vadd.f32 %v11102_v48, %v4662_v54  ;;  %8635 = vmatmul.mubr.msk.f32.gmra.mrb[18].mxu1 %vm1748_vm0, %v11173_v17  ;;  %v4629_v30 = vmul.f32 %v11069_v36, %v4476_v24 }
 0x208   : > { %9034 = vmatpush1.bf16.msra.mxu0 %v9033_v3  ;;  %v4906_v56 = vmax.f32 %v4778_v59, 0.0  ;;  %v4775_v57 = vadd.f32 %v11095_v39, %v4627_v40  ;;  %v4807_v31 = vadd.f32 %v11102_v48, %v4659_v35  ;;  %v4661_v18 = vmul.f32 %v11081_v43, %v4476_v24  ;;  %5790 = vmatprep.mubr.f32.mxu0 %v12241_v52 }
 0x209   : > { %9042 = vmatpush1.bf16.msra.mxu1 %v9041_v10  ;;  %9036 = vmatprep.subr.bf16.mxu0 %v9035_v55  ;;  %v4938_v12 = vmax.f32 %v4810_v41, 0.0  ;;  %v4777_v27 = vadd.f32 %v11095_v39, %v4629_v30  ;;  %v4328_v49 = vrot.slane %v9501_v1, %v10999_v25  ;;  %v4336_v0 = vrot.slane %v9502_v53, %v10999_v25 }
 0x20a   : > { %v4903_v26 = vmax.f32 %v4775_v57, 0.0  ;;  %v4935_v16 = vmax.f32 %v4807_v31, 0.0  ;;  %v4809_v42 = vadd.f32 %v11102_v48, %v4661_v18  ;;  %5867 = vmatprep.mubr.f32.mxu1 %v12241_v52  ;;  %v4324_v28 = vrot.slane %v9501_v1, %v11055_v62 }
 0x20b   : > { %v9043_v15 = vpack.c.bf16 %v4938_v12, %v4906_v56  ;;  %v4905_v24 = vmax.f32 %v4777_v27, 0.0  ;;  %v4488_v13 = vrot.slane %v4328_v49, %v11055_v62  ;;  %v4496_v21 = vrot.slane %v4336_v0, %v11055_v62 }
 0x20c   : > { %v9037_v32 = vpack.c.bf16 %v4935_v16, %v4903_v26  ;;  %v4937_v50 = vmax.f32 %v4809_v42, 0.0  ;;  %v4484_v45 = vrot.slane %v4324_v28, %v11055_v62  ;;  %v4332_v61 = vrot.slane %v9502_v53, %v11055_v62 }
 0x20d   : > { %9044 = vmatprep.subr.bf16.mxu1 %v9043_v15  ;;  %v4568_v47 = vmul.f32 %v11014_v29, %v4488_v13  ;;  %v4600_v44 = vmul.f32 %v11026_v14, %v4488_v13  ;;  %v4570_v51 = vmul.f32 %v11014_v29, %v4496_v21  ;;  %v4602_v5 = vmul.f32 %v11026_v14, %v4496_v21 }
 0x20e   : > { %9038 = vmatpush1.bf16.msra.mxu0 %v9037_v32  ;;  %v9045_v33 = vpack.c.bf16 %v4937_v50, %v4905_v24  ;;  %v4567_v7 = vmul.f32 %v11014_v29, %v4484_v45  ;;  %v4599_v22 = vmul.f32 %v11026_v14, %v4484_v45  ;;  %v4492_v9 = vrot.slane %v4332_v61, %v11055_v62 }
 0x20f   : > { %v4716_v20 = vadd.f32 %v11041_v46, %v4568_v47  ;;  %v4748_v34 = vadd.f32 %v11050_v6, %v4600_v44  ;;  %v4718_v2 = vadd.f32 %v11041_v46, %v4570_v51  ;;  %v4750_v19 = vadd.f32 %v11050_v6, %v4602_v5  ;;  %v9503_v44 = vld [vmem:[%s9879_s29 + $0x70] sm:$0xff] }
 0x210   : > { %9046 = vmatpush1.bf16.msra.mxu1 %v9045_v33  ;;  %v4715_v37 = vadd.f32 %v11041_v46, %v4567_v7  ;;  %v4747_v58 = vadd.f32 %v11050_v6, %v4599_v22  ;;  %v4569_v60 = vmul.f32 %v11014_v29, %v4492_v9  ;;  %v4601_v23 = vmul.f32 %v11026_v14, %v4492_v9  ;;  %v9504_v22 = vld [vmem:[%s9879_s29 + $0x78] sm:$0xff] }
 0x211   : > { %v4844_v4 = vmax.f32 %v4716_v20, 0.0  ;;  %v4876_v11 = vmax.f32 %v4748_v34, 0.0  ;;  %v4846_v54 = vmax.f32 %v4718_v2, 0.0  ;;  %v4878_v3 = vmax.f32 %v4750_v19, 0.0  ;;  %8636 = vmatmul.mubr.msk.f32.vlgmr.msra.gmra.mrb[20].mxu0 %vm1748_vm0, %v11149_v38  ;;  %v11481_v34 = vpop.permute.xlu0 %6552 }
 0x212   : > { %v4843_v59 = vmax.f32 %v4715_v37, 0.0  ;;  %v4875_v40 = vmax.f32 %v4747_v58, 0.0  ;;  %v4717_v35 = vadd.f32 %v11041_v46, %v4569_v60  ;;  %v4749_v10 = vadd.f32 %v11050_v6, %v4601_v23  ;;  %5796 = vmatprep.mubr.f32.mxu0 %v12241_v52 }
 0x213   : > { %v9047_v55 = vpack.c.bf16 %v4876_v11, %v4844_v4  ;;  %v9055_v41 = vpack.c.bf16 %v4878_v3, %v4846_v54  ;;  %8638 = vmatmul.mubr.msk.f32.vlgmr.msra.gmra.mrb[20].mxu1 %vm1748_vm0, %v11149_v38  ;;  %v4632_v30 = vmul.f32 %v11069_v36, %v4488_v13  ;;  %v4664_v56 = vmul.f32 %v11081_v43, %v4488_v13  ;;  %v11487_v11 = vpop.permute.xlu1 %6557 }
 0x214   : > { %v9049_v57 = vpack.c.bf16 %v4875_v40, %v4843_v59  ;;  %v4845_v31 = vmax.f32 %v4717_v35, 0.0  ;;  %v4877_v18 = vmax.f32 %v4749_v10, 0.0  ;;  %v4634_v12 = vmul.f32 %v11069_v36, %v4496_v21  ;;  %5873 = vmatprep.mubr.f32.mxu1 %v12241_v52 }
 0x215   : > { %9048 = vmatprep.subr.bf16.mxu0 %v9047_v55  ;;  %9056 = vmatprep.subr.bf16.mxu1 %v9055_v41  ;;  %v4780_v27 = vadd.f32 %v11095_v39, %v4632_v30  ;;  %v4812_v1 = vadd.f32 %v11102_v48, %v4664_v56  ;;  %v4666_v49 = vmul.f32 %v11081_v43, %v4496_v21  ;;  %v11459_v53 = vsub.s32 7, %v12255_v8 }
 0x216   : > { %9050 = vmatpush1.bf16.msra.mxu0 %v9049_v57  ;;  %v9057_v0 = vpack.c.bf16 %v4877_v18, %v4845_v31  ;;  %v4782_v26 = vadd.f32 %v11095_v39, %v4634_v12  ;;  %v4631_v16 = vmul.f32 %v11069_v36, %v4484_v45  ;;  %v4663_v42 = vmul.f32 %v11081_v43, %v4484_v45 }
 0x217   : > { %v4908_v28 = vmax.f32 %v4780_v27, 0.0  ;;  %v4940_v15 = vmax.f32 %v4812_v1, 0.0  ;;  %v4814_v24 = vadd.f32 %v11102_v48, %v4666_v49  ;;  %8637 = vmatmul.mubr.msk.f32.gmra.mrb[22].mxu0 %vm1748_vm0, %v11173_v17  ;;  %8639 = vmatmul.mubr.msk.f32.gmra.mrb[22].mxu1 %vm1748_vm0, %v11173_v17  ;;  %v4633_v8 = vmul.f32 %v11069_v36, %v4492_v9  ;;  %v11504_v1 = vpop.permute.xlu0 %6700 }
 0x218   : > { %9058 = vmatpush1.bf16.msra.mxu1 %v9057_v0  ;;  %v4910_v13 = vmax.f32 %v4782_v26, 0.0  ;;  %v4779_v21 = vadd.f32 %v11095_v39, %v4631_v16  ;;  %v4811_v32 = vadd.f32 %v11102_v48, %v4663_v42  ;;  %v4665_v50 = vmul.f32 %v11081_v43, %v4492_v9  ;;  %5944 = vmatprep.mubr.f32.mxu0 %v12241_v52 }
 0x219   : > { %v9051_v45 = vpack.c.bf16 %v4940_v15, %v4908_v28  ;;  %v4942_v61 = vmax.f32 %v4814_v24, 0.0  ;;  %v4781_v47 = vadd.f32 %v11095_v39, %v4633_v8  ;;  %v4344_v51 = vrot.slane %v9503_v44, %v10999_v25  ;;  %6021 = vmatprep.mubr.f32.mxu1 %v12241_v52 }
 0x21a   : > { %v4907_v5 = vmax.f32 %v4779_v21, 0.0  ;;  %v4939_v33 = vmax.f32 %v4811_v32, 0.0  ;;  %v4813_v7 = vadd.f32 %v11102_v48, %v4665_v50  ;;  %v4352_v20 = vrot.slane %v9504_v22, %v10999_v25 }
 0x21b   : > { %9052 = vmatprep.subr.bf16.mxu0 %v9051_v45  ;;  %v9059_v9 = vpack.c.bf16 %v4942_v61, %v4910_v13  ;;  %v4909_v2 = vmax.f32 %v4781_v47, 0.0  ;;  %v4504_v19 = vrot.slane %v4344_v51, %v11055_v62  ;;  %v4340_v37 = vrot.slane %v9503_v44, %v11055_v62 }
 0x21c   : > { %v9053_v58 = vpack.c.bf16 %v4939_v33, %v4907_v5  ;;  %v4941_v60 = vmax.f32 %v4813_v7, 0.0  ;;  %v4512_v23 = vrot.slane %v4352_v20, %v11055_v62  ;;  %v4348_v4 = vrot.slane %v9504_v22, %v11055_v62  ;;  %v11527_v33 = vpop.permute.xlu0 %6562 }
 0x21d   : > { %9060 = vmatprep.subr.bf16.mxu1 %v9059_v9  ;;  %v4572_v25 = vmul.f32 %v11014_v29, %v4504_v19  ;;  %v4604_v54 = vmul.f32 %v11026_v14, %v4504_v19  ;;  %v4500_v3 = vrot.slane %v4340_v37, %v11055_v62  ;;  %v4636_v59 = vmul.f32 %v11069_v36, %v4504_v19 }
 0x21e   : > { %9054 = vmatpush1.bf16.msra.mxu0 %v9053_v58  ;;  %v9061_v40 = vpack.c.bf16 %v4941_v60, %v4909_v2  ;;  %v4574_v35 = vmul.f32 %v11014_v29, %v4512_v23  ;;  %v4606_v10 = vmul.f32 %v11026_v14, %v4512_v23  ;;  %v4508_v55 = vrot.slane %v4348_v4, %v11055_v62  ;;  %v9505_v58 = vld [vmem:[%s9879_s29] sm:$0xff] }
 0x21f   : > { %v4720_v41 = vadd.f32 %v11041_v46, %v4572_v25  ;;  %v4752_v30 = vadd.f32 %v11050_v6, %v4604_v54  ;;  %v4571_v56 = vmul.f32 %v11014_v29, %v4500_v3  ;;  %v4603_v57 = vmul.f32 %v11026_v14, %v4500_v3 }
 0x220   : > { %9062 = vmatpush1.bf16.msra.mxu1 %v9061_v40  ;;  %v4722_v31 = vadd.f32 %v11041_v46, %v4574_v35  ;;  %v4754_v18 = vadd.f32 %v11050_v6, %v4606_v10  ;;  %v4573_v12 = vmul.f32 %v11014_v29, %v4508_v55  ;;  %v4605_v27 = vmul.f32 %v11026_v14, %v4508_v55  ;;  %v11513_v29 = vpop.permute.xlu1 %6705  ;;  %v9506_v10 = vld [vmem:[%s9879_s29 + $0x8] sm:$0xff] }
 0x221   : > { %v4848_v62 = vmax.f32 %v4720_v41, 0.0  ;;  %v4880_v49 = vmax.f32 %v4752_v30, 0.0  ;;  %8640 = vmatmul.mubr.msk.f32.vlgmr.msra.gmra.mrb[24].mxu0 %vm1748_vm0, %v11149_v38  ;;  %v4719_v0 = vadd.f32 %v11041_v46, %v4571_v56  ;;  %v4751_v26 = vadd.f32 %v11050_v6, %v4603_v57 }
 0x222   : > { %v4850_v16 = vmax.f32 %v4722_v31, 0.0  ;;  %v4882_v42 = vmax.f32 %v4754_v18, 0.0  ;;  %v4721_v28 = vadd.f32 %v11041_v46, %v4573_v12  ;;  %v4753_v15 = vadd.f32 %v11050_v6, %v4605_v27  ;;  %5950 = vmatprep.mubr.f32.mxu0 %v12241_v52  ;;  %v11551_v31 = vpop.permute.xlu0 %6710 }
 0x223   : > { %v9063_v14 = vpack.c.bf16 %v4880_v49, %v4848_v62  ;;  %8642 = vmatmul.mubr.msk.f32.vlgmr.msra.gmra.mrb[24].mxu1 %vm1748_vm0, %v11149_v38  ;;  %v4847_v24 = vmax.f32 %v4719_v0, 0.0  ;;  %v4879_v8 = vmax.f32 %v4751_v26, 0.0  ;;  %v4668_v13 = vmul.f32 %v11081_v43, %v4504_v19 }
 0x224   : > { %v9071_v21 = vpack.c.bf16 %v4882_v42, %v4850_v16  ;;  %v4849_v32 = vmax.f32 %v4721_v28, 0.0  ;;  %v4881_v50 = vmax.f32 %v4753_v15, 0.0  ;;  %v4784_v45 = vadd.f32 %v11095_v39, %v4636_v59  ;;  %6027 = vmatprep.mubr.f32.mxu1 %v12241_v52 }
 0x225   : > { %9064 = vmatprep.subr.bf16.mxu0 %v9063_v14  ;;  %v9065_v46 = vpack.c.bf16 %v4879_v8, %v4847_v24  ;;  %v4816_v6 = vadd.f32 %v11102_v48, %v4668_v13  ;;  %v4638_v61 = vmul.f32 %v11069_v36, %v4512_v23  ;;  %v4670_v47 = vmul.f32 %v11081_v43, %v4512_v23  ;;  %v11539_v23 = vpop.permute.xlu1 %6567 }
 0x226   : > { %9072 = vmatprep.subr.bf16.mxu1 %v9071_v21  ;;  %v9073_v38 = vpack.c.bf16 %v4881_v50, %v4849_v32  ;;  %v4912_v44 = vmax.f32 %v4784_v45, 0.0  ;;  %8641 = vmatmul.mubr.msk.f32.gmra.mrb[26].mxu0 %vm1748_vm0, %v11173_v17  ;;  %v4635_v51 = vmul.f32 %v11069_v36, %v4500_v3  ;;  %v4667_v5 = vmul.f32 %v11081_v43, %v4500_v3  ;;  %v9507_v45 = vld [vmem:[#allocation2 + $0x20] sm:$0xff] }
 0x227   : > { %9066 = vmatpush1.bf16.msra.mxu0 %v9065_v46  ;;  %v4944_v7 = vmax.f32 %v4816_v6, 0.0  ;;  %v4786_v22 = vadd.f32 %v11095_v39, %v4638_v61  ;;  %v4818_v20 = vadd.f32 %v11102_v48, %v4670_v47  ;;  %8643 = vmatmul.mubr.msk.f32.gmra.mrb[26].mxu1 %vm1748_vm0, %v11173_v17  ;;  %v4637_v9 = vmul.f32 %v11069_v36, %v4508_v55 }
 0x228   : > { %9074 = vmatpush1.bf16.msra.mxu1 %v9073_v38  ;;  %v4783_v2 = vadd.f32 %v11095_v39, %v4635_v51  ;;  %v4815_v19 = vadd.f32 %v11102_v48, %v4667_v5  ;;  %v4669_v37 = vmul.f32 %v11081_v43, %v4508_v55  ;;  %v6259_v60 = vrot.slane %v9505_v58, %v11459_v53 }
 0x229   : > { %v9067_v4 = vpack.c.bf16 %v4944_v7, %v4912_v44  ;;  %v4914_v25 = vmax.f32 %v4786_v22, 0.0  ;;  %v4946_v54 = vmax.f32 %v4818_v20, 0.0  ;;  %v4785_v17 = vadd.f32 %v11095_v39, %v4637_v9  ;;  %6098 = vmatprep.mubr.f32.mxu0 %v12241_v52  ;;  %6175 = vmatprep.mubr.f32.mxu1 %v12241_v52  ;;  %v11560_v16 = vpop.permute.xlu1 %6715 }
 0x22a   : > { %v4911_v36 = vmax.f32 %v4783_v2, 0.0  ;;  %v4943_v3 = vmax.f32 %v4815_v19, 0.0  ;;  %v4817_v59 = vadd.f32 %v11102_v48, %v4669_v37  ;;  %v6419_v43 = vrot.slane %v6259_v60, %v11343_v63 }
 0x22b   : > { %9068 = vmatprep.subr.bf16.mxu0 %v9067_v4  ;;  %v9075_v40 = vpack.c.bf16 %v4946_v54, %v4914_v25  ;;  %v4913_v35 = vmax.f32 %v4785_v17, 0.0  ;;  %v6267_v55 = vrot.slane %v9506_v10, %v11459_v53  ;;  %v6255_v41 = vrot.slane %v9505_v58, %v11343_v63  ;;  %v9508_v25 = vld [vmem:[#allocation2 + $0x28] sm:$0xff] }
 0x22c   : > { %v9069_v30 = vpack.c.bf16 %v4943_v3, %v4911_v36  ;;  %v4945_v39 = vmax.f32 %v4817_v59, 0.0  ;;  %v6571_v56 = vmul.f32 %v11481_v34, %v6419_v43  ;;  %v6603_v57 = vmul.f32 %v11487_v11, %v6419_v43 }
 0x22d   : > { %9076 = vmatprep.subr.bf16.mxu1 %v9075_v40  ;;  %v6427_v48 = vrot.slane %v6267_v55, %v11343_v63  ;;  %v6415_v18 = vrot.slane %v6255_v41, %v11343_v63  ;;  %v6263_v12 = vrot.slane %v9506_v10, %v11343_v63  ;;  %v6635_v27 = vmul.f32 %v11527_v33, %v6419_v43 }
 0x22e   : > { %9070 = vmatpush1.bf16.msra.mxu0 %v9069_v30  ;;  %v9077_v62 = vpack.c.bf16 %v4945_v39, %v4913_v35  ;;  %v6719_v49 = vadd.f32 %v11504_v1, %v6571_v56  ;;  %v6751_v0 = vadd.f32 %v11513_v29, %v6603_v57  ;;  %v6667_v26 = vmul.f32 %v11539_v23, %v6419_v43 }
 0x22f   : > { %v6573_v42 = vmul.f32 %v11481_v34, %v6427_v48  ;;  %v6605_v28 = vmul.f32 %v11487_v11, %v6427_v48  ;;  %v6570_v15 = vmul.f32 %v11481_v34, %v6415_v18  ;;  %v6602_v14 = vmul.f32 %v11487_v11, %v6415_v18 }
 0x230   : > { %9078 = vmatpush1.bf16.msra.mxu1 %v9077_v62  ;;  %v6847_v24 = vmax.f32 %v6719_v49, 0.0  ;;  %v6879_v8 = vmax.f32 %v6751_v0, 0.0  ;;  %v6423_v13 = vrot.slane %v6263_v12, %v11343_v63  ;;  %v6783_v21 = vadd.f32 %v11551_v31, %v6635_v27  ;;  %v9510_v27 = vld [vmem:[%s9879_s29 + $0x18] sm:$0xff] }
 0x231   : > { %v6721_v32 = vadd.f32 %v11504_v1, %v6573_v42  ;;  %v6753_v50 = vadd.f32 %v11513_v29, %v6605_v28  ;;  %8644 = vmatmul.mubr.msk.f32.vlgmr.msra.gmra.mrb[28].mxu0 %vm1748_vm0, %v9507_v45  ;;  %v6718_v46 = vadd.f32 %v11504_v1, %v6570_v15  ;;  %v6750_v6 = vadd.f32 %v11513_v29, %v6602_v14 }
 0x232   : > { %v9079_v61 = vpack.c.bf16 %v6879_v8, %v6847_v24  ;;  %v6572_v47 = vmul.f32 %v11481_v34, %v6423_v13  ;;  %v6604_v38 = vmul.f32 %v11487_v11, %v6423_v13  ;;  %v6815_v44 = vadd.f32 %v11560_v16, %v6667_v26  ;;  %6104 = vmatprep.mubr.f32.mxu0 %v12241_v52 }
 0x233   : > { %v6849_v51 = vmax.f32 %v6721_v32, 0.0  ;;  %v6881_v5 = vmax.f32 %v6753_v50, 0.0  ;;  %8646 = vmatmul.mubr.msk.f32.vlgmr.msra.gmra.mrb[28].mxu1 %vm1748_vm0, %v9507_v45  ;;  %v6846_v7 = vmax.f32 %v6718_v46, 0.0  ;;  %v6878_v22 = vmax.f32 %v6750_v6, 0.0  ;;  %v11607_v32 = vld [vmem:[%s9879_s29 + $0x20] sm:$0xff] }
 0x234   : > { %9080 = vmatprep.subr.bf16.mxu0 %v9079_v61  ;;  %v6720_v20 = vadd.f32 %v11504_v1, %v6572_v47  ;;  %v6752_v9 = vadd.f32 %v11513_v29, %v6604_v38  ;;  %v6911_v2 = vmax.f32 %v6783_v21, 0.0  ;;  %v6943_v19 = vmax.f32 %v6815_v44, 0.0  ;;  %6181 = vmatprep.mubr.f32.mxu1 %v12241_v52  ;;  %v11615_v38 = vld [vmem:[#allocation2 + $0x30] sm:$0xff] }
 0x235   : > { %v9087_v37 = vpack.c.bf16 %v6881_v5, %v6849_v51  ;;  %v9081_v58 = vpack.c.bf16 %v6878_v22, %v6846_v7  ;;  %v6637_v60 = vmul.f32 %v11527_v33, %v6427_v48  ;;  %v6669_v4 = vmul.f32 %v11539_v23, %v6427_v48  ;;  %8645 = vmatmul.mubr.msk.f32.gmra.mrb[30].mxu0 %vm1748_vm0, %v9508_v25 }
 0x236   : > { %v6848_v54 = vmax.f32 %v6720_v20, 0.0  ;;  %v6880_v17 = vmax.f32 %v6752_v9, 0.0  ;;  %v9083_v36 = vpack.c.bf16 %v6943_v19, %v6911_v2  ;;  %v6634_v3 = vmul.f32 %v11527_v33, %v6415_v18  ;;  %7047 = vmatprep.mubr.f32.mxu0 %v12241_v52 }
 0x237   : > { %9088 = vmatprep.subr.bf16.mxu1 %v9087_v37  ;;  %9082 = vmatpush1.bf16.msra.mxu0 %v9081_v58  ;;  %v6785_v59 = vadd.f32 %v11551_v31, %v6637_v60  ;;  %v6817_v43 = vadd.f32 %v11560_v16, %v6669_v4  ;;  %v6666_v40 = vmul.f32 %v11539_v23, %v6415_v18  ;;  %v9509_v18 = vld [vmem:[%s9879_s29 + $0x10] sm:$0xff] }
 0x238   : > { %v9089_v35 = vpack.c.bf16 %v6880_v17, %v6848_v54  ;;  %9084 = vmatprep.subr.bf16.mxu0 %v9083_v36  ;;  %8647 = vmatmul.mubr.msk.f32.gmra.mrb[30].mxu1 %vm1748_vm0, %v9508_v25  ;;  %v6782_v10 = vadd.f32 %v11551_v31, %v6634_v3  ;;  %v6636_v55 = vmul.f32 %v11527_v33, %v6423_v13 }
 0x239   : > { %v6913_v41 = vmax.f32 %v6785_v59, 0.0  ;;  %v6945_v30 = vmax.f32 %v6817_v43, 0.0  ;;  %v6814_v39 = vadd.f32 %v11560_v16, %v6666_v40  ;;  %v6668_v56 = vmul.f32 %v11539_v23, %v6423_v13  ;;  %7124 = vmatprep.mubr.f32.mxu1 %v12241_v52 }
 0x23a   : > { %9090 = vmatpush1.bf16.msra.mxu1 %v9089_v35  ;;  %v6910_v57 = vmax.f32 %v6782_v10, 0.0  ;;  %v6784_v48 = vadd.f32 %v11551_v31, %v6636_v55  ;;  %v6275_v12 = vrot.slane %v9509_v18, %v11459_v53  ;;  %v6283_v62 = vrot.slane %v9510_v27, %v11459_v53 }
 0x23b   : > { %v9091_v49 = vpack.c.bf16 %v6945_v30, %v6913_v41  ;;  %v6942_v0 = vmax.f32 %v6814_v39, 0.0  ;;  %v6816_v26 = vadd.f32 %v11560_v16, %v6668_v56  ;;  %v6271_v42 = vrot.slane %v9509_v18, %v11343_v63  ;;  %v11639_v56 = vld [vmem:[#allocation2 + $0x38] sm:$0xff] }
 0x23c   : > { %v6912_v28 = vmax.f32 %v6784_v48, 0.0  ;;  %v6435_v15 = vrot.slane %v6275_v12, %v11343_v63  ;;  %v6443_v14 = vrot.slane %v6283_v62, %v11343_v63  ;;  %v6279_v24 = vrot.slane %v9510_v27, %v11343_v63 }
 0x23d   : > { %9092 = vmatprep.subr.bf16.mxu1 %v9091_v49  ;;  %v9085_v8 = vpack.c.bf16 %v6942_v0, %v6910_v57  ;;  %v6944_v13 = vmax.f32 %v6816_v26, 0.0  ;;  %v6431_v21 = vrot.slane %v6271_v42, %v11343_v63  ;;  %v6291_v50 = vrot.slane %v11607_v32, %v11459_v53 }
 0x23e   : > { %v6575_v45 = vmul.f32 %v11481_v34, %v6435_v15  ;;  %v6607_v46 = vmul.f32 %v11487_v11, %v6435_v15  ;;  %v6577_v6 = vmul.f32 %v11481_v34, %v6443_v14  ;;  %v6609_v61 = vmul.f32 %v11487_v11, %v6443_v14 }
 0x23f   : > { %9086 = vmatpush1.bf16.msra.mxu0 %v9085_v8  ;;  %v9093_v47 = vpack.c.bf16 %v6944_v13, %v6912_v28  ;;  %v6574_v44 = vmul.f32 %v11481_v34, %v6431_v21  ;;  %v6606_v51 = vmul.f32 %v11487_v11, %v6431_v21  ;;  %v6439_v5 = vrot.slane %v6279_v24, %v11343_v63 }
 0x240   : > { %v6723_v7 = vadd.f32 %v11504_v1, %v6575_v45  ;;  %v6755_v22 = vadd.f32 %v11513_v29, %v6607_v46  ;;  %v6725_v20 = vadd.f32 %v11504_v1, %v6577_v6  ;;  %v6757_v9 = vadd.f32 %v11513_v29, %v6609_v61 }
 0x241   : > { %9094 = vmatpush1.bf16.msra.mxu1 %v9093_v47  ;;  %v6722_v2 = vadd.f32 %v11504_v1, %v6574_v44  ;;  %v6754_v19 = vadd.f32 %v11513_v29, %v6606_v51  ;;  %v6576_v37 = vmul.f32 %v11481_v34, %v6439_v5  ;;  %v6608_v58 = vmul.f32 %v11487_v11, %v6439_v5  ;;  %v9512_v44 = vld [vmem:[%s9879_s29 + $0x28] sm:$0xff] }
 0x242   : > { %v6851_v60 = vmax.f32 %v6723_v7, 0.0  ;;  %v6883_v4 = vmax.f32 %v6755_v22, 0.0  ;;  %v6853_v25 = vmax.f32 %v6725_v20, 0.0  ;;  %v6885_v54 = vmax.f32 %v6757_v9, 0.0  ;;  %8656 = vmatmul.mubr.msk.f32.vlgmr.msra.gmra.mrb[0].mxu0 %vm1748_vm0, %v11615_v38 }
 0x243   : > { %v6850_v17 = vmax.f32 %v6722_v2, 0.0  ;;  %v6882_v36 = vmax.f32 %v6754_v19, 0.0  ;;  %v6724_v3 = vadd.f32 %v11504_v1, %v6576_v37  ;;  %v6756_v59 = vadd.f32 %v11513_v29, %v6608_v58  ;;  %7053 = vmatprep.mubr.f32.mxu0 %v12241_v52 }
 0x244   : > { %v9095_v43 = vpack.c.bf16 %v6883_v4, %v6851_v60  ;;  %v9103_v40 = vpack.c.bf16 %v6885_v54, %v6853_v25  ;;  %8658 = vmatmul.mubr.msk.f32.vlgmr.msra.gmra.mrb[0].mxu1 %vm1748_vm0, %v11615_v38  ;;  %v6639_v35 = vmul.f32 %v11527_v33, %v6435_v15  ;;  %v6671_v10 = vmul.f32 %v11539_v23, %v6435_v15 }
 0x245   : > { %v9097_v55 = vpack.c.bf16 %v6882_v36, %v6850_v17  ;;  %v6852_v41 = vmax.f32 %v6724_v3, 0.0  ;;  %v6884_v30 = vmax.f32 %v6756_v59, 0.0  ;;  %v6641_v39 = vmul.f32 %v11527_v33, %v6443_v14  ;;  %7130 = vmatprep.mubr.f32.mxu1 %v12241_v52 }
 0x246   : > { %9096 = vmatprep.subr.bf16.mxu0 %v9095_v43  ;;  %9104 = vmatprep.subr.bf16.mxu1 %v9103_v40  ;;  %v6787_v57 = vadd.f32 %v11551_v31, %v6639_v35  ;;  %v6819_v48 = vadd.f32 %v11560_v16, %v6671_v10  ;;  %v6673_v18 = vmul.f32 %v11539_v23, %v6443_v14 }
 0x247   : > { %9098 = vmatpush1.bf16.msra.mxu0 %v9097_v55  ;;  %v9105_v12 = vpack.c.bf16 %v6884_v30, %v6852_v41  ;;  %v6789_v27 = vadd.f32 %v11551_v31, %v6641_v39  ;;  %v6638_v62 = vmul.f32 %v11527_v33, %v6431_v21  ;;  %v6670_v49 = vmul.f32 %v11539_v23, %v6431_v21 }
 0x248   : > { %v6915_v0 = vmax.f32 %v6787_v57, 0.0  ;;  %v6947_v26 = vmax.f32 %v6819_v48, 0.0  ;;  %v6821_v42 = vadd.f32 %v11560_v16, %v6673_v18  ;;  %8657 = vmatmul.mubr.msk.f32.gmra.mrb[2].mxu0 %vm1748_vm0, %v11639_v56  ;;  %8659 = vmatmul.mubr.msk.f32.gmra.mrb[2].mxu1 %vm1748_vm0, %v11639_v56  ;;  %v6640_v28 = vmul.f32 %v11527_v33, %v6439_v5 }
 0x249   : > { %9106 = vmatpush1.bf16.msra.mxu1 %v9105_v12  ;;  %v6917_v15 = vmax.f32 %v6789_v27, 0.0  ;;  %v6786_v14 = vadd.f32 %v11551_v31, %v6638_v62  ;;  %v6818_v24 = vadd.f32 %v11560_v16, %v6670_v49  ;;  %v6672_v8 = vmul.f32 %v11539_v23, %v6439_v5  ;;  %7201 = vmatprep.mubr.f32.mxu0 %v12241_v52 }
 0x24a   : > { %v9099_v13 = vpack.c.bf16 %v6947_v26, %v6915_v0  ;;  %v6949_v21 = vmax.f32 %v6821_v42, 0.0  ;;  %v6788_v45 = vadd.f32 %v11551_v31, %v6640_v28  ;;  %v6451_v46 = vrot.slane %v6291_v50, %v11343_v63  ;;  %7278 = vmatprep.mubr.f32.mxu1 %v12241_v52 }
 0x24b   : > { %v6914_v6 = vmax.f32 %v6786_v14, 0.0  ;;  %v6946_v61 = vmax.f32 %v6818_v24, 0.0  ;;  %v6820_v47 = vadd.f32 %v11560_v16, %v6672_v8  ;;  %v6299_v51 = vrot.slane %v9512_v44, %v11459_v53 }
 0x24c   : > { %9100 = vmatprep.subr.bf16.mxu0 %v9099_v13  ;;  %v9107_v5 = vpack.c.bf16 %v6949_v21, %v6917_v15  ;;  %v6916_v7 = vmax.f32 %v6788_v45, 0.0  ;;  %v6579_v22 = vmul.f32 %v11481_v34, %v6451_v46  ;;  %v6611_v20 = vmul.f32 %v11487_v11, %v6451_v46 }
 0x24d   : > { %v9101_v9 = vpack.c.bf16 %v6946_v61, %v6914_v6  ;;  %v6948_v2 = vmax.f32 %v6820_v47, 0.0  ;;  %v6459_v50 = vrot.slane %v6299_v51, %v11343_v63  ;;  %v6287_v19 = vrot.slane %v11607_v32, %v11343_v63 }
 0x24e   : > { %9108 = vmatprep.subr.bf16.mxu1 %v9107_v5  ;;  %v6727_v37 = vadd.f32 %v11504_v1, %v6579_v22  ;;  %v6759_v58 = vadd.f32 %v11513_v29, %v6611_v20  ;;  %v6295_v60 = vrot.slane %v9512_v44, %v11343_v63  ;;  %v6643_v4 = vmul.f32 %v11527_v33, %v6451_v46 }
 0x24f   : > { %9102 = vmatpush1.bf16.msra.mxu0 %v9101_v9  ;;  %v9109_v25 = vpack.c.bf16 %v6948_v2, %v6916_v7  ;;  %v6581_v54 = vmul.f32 %v11481_v34, %v6459_v50  ;;  %v6613_v17 = vmul.f32 %v11487_v11, %v6459_v50  ;;  %v6447_v36 = vrot.slane %v6287_v19, %v11343_v63  ;;  %v9513_v19 = vld [vmem:[%s9879_s29 + $0x30] sm:$0xff] }
 0x250   : > { %v6855_v3 = vmax.f32 %v6727_v37, 0.0  ;;  %v6887_v59 = vmax.f32 %v6759_v58, 0.0  ;;  %v6455_v32 = vrot.slane %v6295_v60, %v11343_v63  ;;  %v6675_v43 = vmul.f32 %v11539_v23, %v6451_v46  ;;  %v9514_v58 = vld [vmem:[%s9879_s29 + $0x38] sm:$0xff] }
 0x251   : > { %9110 = vmatpush1.bf16.msra.mxu1 %v9109_v25  ;;  %v6729_v40 = vadd.f32 %v11504_v1, %v6581_v54  ;;  %v6761_v35 = vadd.f32 %v11513_v29, %v6613_v17  ;;  %v6578_v10 = vmul.f32 %v11481_v34, %v6447_v36  ;;  %v6610_v55 = vmul.f32 %v11487_v11, %v6447_v36 }
 0x252   : > { %v9111_v41 = vpack.c.bf16 %v6887_v59, %v6855_v3  ;;  %8660 = vmatmul.mubr.msk.f32.vlgmr.msra.gmra.mrb[4].mxu0 %vm1748_vm0, %v11615_v38  ;;  %v6580_v30 = vmul.f32 %v11481_v34, %v6455_v32  ;;  %v6612_v39 = vmul.f32 %v11487_v11, %v6455_v32  ;;  %v6791_v57 = vadd.f32 %v11551_v31, %v6643_v4 }
 0x253   : > { %v6857_v48 = vmax.f32 %v6729_v40, 0.0  ;;  %v6889_v18 = vmax.f32 %v6761_v35, 0.0  ;;  %v6726_v12 = vadd.f32 %v11504_v1, %v6578_v10  ;;  %v6758_v27 = vadd.f32 %v11513_v29, %v6610_v55  ;;  %7207 = vmatprep.mubr.f32.mxu0 %v12241_v52 }
 0x254   : > { %9112 = vmatprep.subr.bf16.mxu0 %v9111_v41  ;;  %8662 = vmatmul.mubr.msk.f32.vlgmr.msra.gmra.mrb[4].mxu1 %vm1748_vm0, %v11615_v38  ;;  %v6728_v62 = vadd.f32 %v11504_v1, %v6580_v30  ;;  %v6760_v49 = vadd.f32 %v11513_v29, %v6612_v39  ;;  %v6823_v0 = vadd.f32 %v11560_v16, %v6675_v43  ;;  %v6919_v26 = vmax.f32 %v6791_v57, 0.0 }
 0x255   : > { %v9119_v42 = vpack.c.bf16 %v6889_v18, %v6857_v48  ;;  %v6854_v28 = vmax.f32 %v6726_v12, 0.0  ;;  %v6886_v15 = vmax.f32 %v6758_v27, 0.0  ;;  %v6645_v14 = vmul.f32 %v11527_v33, %v6459_v50  ;;  %7284 = vmatprep.mubr.f32.mxu1 %v12241_v52 }
 0x256   : > { %v6856_v24 = vmax.f32 %v6728_v62, 0.0  ;;  %v6888_v8 = vmax.f32 %v6760_v49, 0.0  ;;  %v6951_v13 = vmax.f32 %v6823_v0, 0.0  ;;  %v6677_v21 = vmul.f32 %v11539_v23, %v6459_v50  ;;  %8661 = vmatmul.mubr.msk.f32.gmra.mrb[6].mxu0 %vm1748_vm0, %v11639_v56 }
 0x257   : > { %9120 = vmatprep.subr.bf16.mxu1 %v9119_v42  ;;  %v9113_v45 = vpack.c.bf16 %v6886_v15, %v6854_v28  ;;  %v6793_v46 = vadd.f32 %v11551_v31, %v6645_v14  ;;  %v6642_v6 = vmul.f32 %v11527_v33, %v6447_v36  ;;  %v6674_v61 = vmul.f32 %v11539_v23, %v6447_v36 }
 0x258   : > { %v9121_v47 = vpack.c.bf16 %v6888_v8, %v6856_v24  ;;  %v9115_v44 = vpack.c.bf16 %v6951_v13, %v6919_v26  ;;  %v6825_v51 = vadd.f32 %v11560_v16, %v6677_v21  ;;  %8663 = vmatmul.mubr.msk.f32.gmra.mrb[6].mxu1 %vm1748_vm0, %v11639_v56  ;;  %v6644_v5 = vmul.f32 %v11527_v33, %v6455_v32 }
 0x259   : > { %9114 = vmatpush1.bf16.msra.mxu0 %v9113_v45  ;;  %v6921_v7 = vmax.f32 %v6793_v46, 0.0  ;;  %v6790_v22 = vadd.f32 %v11551_v31, %v6642_v6  ;;  %v6822_v20 = vadd.f32 %v11560_v16, %v6674_v61  ;;  %v6676_v9 = vmul.f32 %v11539_v23, %v6455_v32  ;;  %7355 = vmatprep.mubr.f32.mxu0 %v12241_v52 }
 0x25a   : > { %9122 = vmatpush1.bf16.msra.mxu1 %v9121_v47  ;;  %9116 = vmatprep.subr.bf16.mxu0 %v9115_v44  ;;  %v6953_v2 = vmax.f32 %v6825_v51, 0.0  ;;  %v6792_v50 = vadd.f32 %v11551_v31, %v6644_v5  ;;  %v6307_v37 = vrot.slane %v9513_v19, %v11459_v53  ;;  %v6315_v60 = vrot.slane %v9514_v58, %v11459_v53 }
 0x25b   : > { %v6918_v4 = vmax.f32 %v6790_v22, 0.0  ;;  %v6950_v25 = vmax.f32 %v6822_v20, 0.0  ;;  %v6824_v54 = vadd.f32 %v11560_v16, %v6676_v9  ;;  %7432 = vmatprep.mubr.f32.mxu1 %v12241_v52  ;;  %v6303_v17 = vrot.slane %v9513_v19, %v11343_v63 }
 0x25c   : > { %v9123_v36 = vpack.c.bf16 %v6953_v2, %v6921_v7  ;;  %v6920_v3 = vmax.f32 %v6792_v50, 0.0  ;;  %v6467_v59 = vrot.slane %v6307_v37, %v11343_v63  ;;  %v6475_v32 = vrot.slane %v6315_v60, %v11343_v63 }
 0x25d   : > { %v9117_v43 = vpack.c.bf16 %v6950_v25, %v6918_v4  ;;  %v6952_v40 = vmax.f32 %v6824_v54, 0.0  ;;  %v6463_v35 = vrot.slane %v6303_v17, %v11343_v63  ;;  %v6311_v10 = vrot.slane %v9514_v58, %v11343_v63 }
 0x25e   : > { %9124 = vmatprep.subr.bf16.mxu1 %v9123_v36  ;;  %v6583_v55 = vmul.f32 %v11481_v34, %v6467_v59  ;;  %v6615_v41 = vmul.f32 %v11487_v11, %v6467_v59  ;;  %v6585_v30 = vmul.f32 %v11481_v34, %v6475_v32  ;;  %v6617_v39 = vmul.f32 %v11487_v11, %v6475_v32 }
 0x25f   : > { %9118 = vmatpush1.bf16.msra.mxu0 %v9117_v43  ;;  %v9125_v57 = vpack.c.bf16 %v6952_v40, %v6920_v3  ;;  %v6582_v48 = vmul.f32 %v11481_v34, %v6463_v35  ;;  %v6614_v18 = vmul.f32 %v11487_v11, %v6463_v35  ;;  %v6471_v12 = vrot.slane %v6311_v10, %v11343_v63  ;;  %v9515_v10 = vld [vmem:[%s9879_s29 + $0x40] sm:$0xff] }
 0x260   : > { %v6731_v27 = vadd.f32 %v11504_v1, %v6583_v55  ;;  %v6763_v62 = vadd.f32 %v11513_v29, %v6615_v41  ;;  %v6733_v49 = vadd.f32 %v11504_v1, %v6585_v30  ;;  %v6765_v0 = vadd.f32 %v11513_v29, %v6617_v39 }
 0x261   : > { %9126 = vmatpush1.bf16.msra.mxu1 %v9125_v57  ;;  %v6730_v26 = vadd.f32 %v11504_v1, %v6582_v48  ;;  %v6762_v42 = vadd.f32 %v11513_v29, %v6614_v18  ;;  %v6584_v28 = vmul.f32 %v11481_v34, %v6471_v12  ;;  %v6616_v15 = vmul.f32 %v11487_v11, %v6471_v12  ;;  %v9516_v57 = vld [vmem:[%s9879_s29 + $0x48] sm:$0xff] }
 0x262   : > { %v6859_v14 = vmax.f32 %v6731_v27, 0.0  ;;  %v6891_v24 = vmax.f32 %v6763_v62, 0.0  ;;  %v6861_v8 = vmax.f32 %v6733_v49, 0.0  ;;  %v6893_v13 = vmax.f32 %v6765_v0, 0.0  ;;  %8664 = vmatmul.mubr.msk.f32.vlgmr.msra.gmra.mrb[8].mxu0 %vm1748_vm0, %v11615_v38 }
 0x263   : > { %v6858_v21 = vmax.f32 %v6730_v26, 0.0  ;;  %v6890_v45 = vmax.f32 %v6762_v42, 0.0  ;;  %v6732_v46 = vadd.f32 %v11504_v1, %v6584_v28  ;;  %v6764_v6 = vadd.f32 %v11513_v29, %v6616_v15  ;;  %7361 = vmatprep.mubr.f32.mxu0 %v12241_v52 }
 0x264   : > { %v9127_v61 = vpack.c.bf16 %v6891_v24, %v6859_v14  ;;  %v9135_v47 = vpack.c.bf16 %v6893_v13, %v6861_v8  ;;  %8666 = vmatmul.mubr.msk.f32.vlgmr.msra.gmra.mrb[8].mxu1 %vm1748_vm0, %v11615_v38  ;;  %v6647_v44 = vmul.f32 %v11527_v33, %v6467_v59  ;;  %v6679_v51 = vmul.f32 %v11539_v23, %v6467_v59 }
 0x265   : > { %v9129_v5 = vpack.c.bf16 %v6890_v45, %v6858_v21  ;;  %v6860_v7 = vmax.f32 %v6732_v46, 0.0  ;;  %v6892_v22 = vmax.f32 %v6764_v6, 0.0  ;;  %v6649_v20 = vmul.f32 %v11527_v33, %v6475_v32  ;;  %7438 = vmatprep.mubr.f32.mxu1 %v12241_v52 }
 0x266   : > { %9128 = vmatprep.subr.bf16.mxu0 %v9127_v61  ;;  %9136 = vmatprep.subr.bf16.mxu1 %v9135_v47  ;;  %v6795_v9 = vadd.f32 %v11551_v31, %v6647_v44  ;;  %v6827_v2 = vadd.f32 %v11560_v16, %v6679_v51  ;;  %v6681_v50 = vmul.f32 %v11539_v23, %v6475_v32 }
 0x267   : > { %9130 = vmatpush1.bf16.msra.mxu0 %v9129_v5  ;;  %v9137_v19 = vpack.c.bf16 %v6892_v22, %v6860_v7  ;;  %v6797_v37 = vadd.f32 %v11551_v31, %v6649_v20  ;;  %v6646_v58 = vmul.f32 %v11527_v33, %v6463_v35  ;;  %v6678_v60 = vmul.f32 %v11539_v23, %v6463_v35 }
 0x268   : > { %v6923_v4 = vmax.f32 %v6795_v9, 0.0  ;;  %v6955_v25 = vmax.f32 %v6827_v2, 0.0  ;;  %v6829_v54 = vadd.f32 %v11560_v16, %v6681_v50  ;;  %8665 = vmatmul.mubr.msk.f32.gmra.mrb[10].mxu0 %vm1748_vm0, %v11639_v56  ;;  %8667 = vmatmul.mubr.msk.f32.gmra.mrb[10].mxu1 %vm1748_vm0, %v11639_v56  ;;  %v6648_v17 = vmul.f32 %v11527_v33, %v6471_v12 }
 0x269   : > { %9138 = vmatpush1.bf16.msra.mxu1 %v9137_v19  ;;  %v6925_v36 = vmax.f32 %v6797_v37, 0.0  ;;  %v6794_v3 = vadd.f32 %v11551_v31, %v6646_v58  ;;  %v6826_v59 = vadd.f32 %v11560_v16, %v6678_v60  ;;  %v6680_v32 = vmul.f32 %v11539_v23, %v6471_v12  ;;  %7509 = vmatprep.mubr.f32.mxu0 %v12241_v52 }
 0x26a   : > { %v9131_v43 = vpack.c.bf16 %v6955_v25, %v6923_v4  ;;  %v6957_v40 = vmax.f32 %v6829_v54, 0.0  ;;  %v6796_v35 = vadd.f32 %v11551_v31, %v6648_v17  ;;  %v6323_v55 = vrot.slane %v9515_v10, %v11459_v53  ;;  %7586 = vmatprep.mubr.f32.mxu1 %v12241_v52 }
 0x26b   : > { %v6922_v41 = vmax.f32 %v6794_v3, 0.0  ;;  %v6954_v30 = vmax.f32 %v6826_v59, 0.0  ;;  %v6828_v39 = vadd.f32 %v11560_v16, %v6680_v32  ;;  %v6331_v48 = vrot.slane %v9516_v57, %v11459_v53 }
 0x26c   : > { %9132 = vmatprep.subr.bf16.mxu0 %v9131_v43  ;;  %v9139_v18 = vpack.c.bf16 %v6957_v40, %v6925_v36  ;;  %v6924_v12 = vmax.f32 %v6796_v35, 0.0  ;;  %v6483_v27 = vrot.slane %v6323_v55, %v11343_v63  ;;  %v6319_v62 = vrot.slane %v9515_v10, %v11343_v63 }
 0x26d   : > { %v9133_v49 = vpack.c.bf16 %v6954_v30, %v6922_v41  ;;  %v6956_v0 = vmax.f32 %v6828_v39, 0.0  ;;  %v6491_v26 = vrot.slane %v6331_v48, %v11343_v63  ;;  %v6327_v42 = vrot.slane %v9516_v57, %v11343_v63 }
 0x26e   : > { %9140 = vmatprep.subr.bf16.mxu1 %v9139_v18  ;;  %v6587_v28 = vmul.f32 %v11481_v34, %v6483_v27  ;;  %v6619_v15 = vmul.f32 %v11487_v11, %v6483_v27  ;;  %v6479_v14 = vrot.slane %v6319_v62, %v11343_v63  ;;  %v6651_v24 = vmul.f32 %v11527_v33, %v6483_v27 }
 0x26f   : > { %9134 = vmatpush1.bf16.msra.mxu0 %v9133_v49  ;;  %v9141_v8 = vpack.c.bf16 %v6956_v0, %v6924_v12  ;;  %v6589_v13 = vmul.f32 %v11481_v34, %v6491_v26  ;;  %v6621_v21 = vmul.f32 %v11487_v11, %v6491_v26  ;;  %v6487_v45 = vrot.slane %v6327_v42, %v11343_v63  ;;  %v9517_v49 = vld [vmem:[%s9879_s29 + $0x50] sm:$0xff] }
 0x270   : > { %v6735_v46 = vadd.f32 %v11504_v1, %v6587_v28  ;;  %v6767_v6 = vadd.f32 %v11513_v29, %v6619_v15  ;;  %v6586_v61 = vmul.f32 %v11481_v34, %v6479_v14  ;;  %v6618_v47 = vmul.f32 %v11487_v11, %v6479_v14 }
 0x271   : > { %9142 = vmatpush1.bf16.msra.mxu1 %v9141_v8  ;;  %v6737_v44 = vadd.f32 %v11504_v1, %v6589_v13  ;;  %v6769_v51 = vadd.f32 %v11513_v29, %v6621_v21  ;;  %v6588_v5 = vmul.f32 %v11481_v34, %v6487_v45  ;;  %v6620_v7 = vmul.f32 %v11487_v11, %v6487_v45 }
 0x272   : > { %v6863_v22 = vmax.f32 %v6735_v46, 0.0  ;;  %v6895_v20 = vmax.f32 %v6767_v6, 0.0  ;;  %8668 = vmatmul.mubr.msk.f32.vlgmr.msra.gmra.mrb[12].mxu0 %vm1748_vm0, %v11615_v38  ;;  %v6734_v9 = vadd.f32 %v11504_v1, %v6586_v61  ;;  %v6766_v2 = vadd.f32 %v11513_v29, %v6618_v47  ;;  %v9518_v46 = vld [vmem:[%s9879_s29 + $0x58] sm:$0xff] }
 0x273   : > { %v6865_v50 = vmax.f32 %v6737_v44, 0.0  ;;  %v6897_v19 = vmax.f32 %v6769_v51, 0.0  ;;  %v6736_v37 = vadd.f32 %v11504_v1, %v6588_v5  ;;  %v6768_v58 = vadd.f32 %v11513_v29, %v6620_v7  ;;  %7515 = vmatprep.mubr.f32.mxu0 %v12241_v52 }
 0x274   : > { %v9143_v60 = vpack.c.bf16 %v6895_v20, %v6863_v22  ;;  %8670 = vmatmul.mubr.msk.f32.vlgmr.msra.gmra.mrb[12].mxu1 %vm1748_vm0, %v11615_v38  ;;  %v6862_v4 = vmax.f32 %v6734_v9, 0.0  ;;  %v6894_v25 = vmax.f32 %v6766_v2, 0.0  ;;  %v6683_v54 = vmul.f32 %v11539_v23, %v6483_v27 }
 0x275   : > { %v9151_v17 = vpack.c.bf16 %v6897_v19, %v6865_v50  ;;  %v6864_v36 = vmax.f32 %v6736_v37, 0.0  ;;  %v6896_v3 = vmax.f32 %v6768_v58, 0.0  ;;  %v6799_v59 = vadd.f32 %v11551_v31, %v6651_v24  ;;  %7592 = vmatprep.mubr.f32.mxu1 %v12241_v52 }
 0x276   : > { %9144 = vmatprep.subr.bf16.mxu0 %v9143_v60  ;;  %v9145_v32 = vpack.c.bf16 %v6894_v25, %v6862_v4  ;;  %v6831_v43 = vadd.f32 %v11560_v16, %v6683_v54  ;;  %v6653_v40 = vmul.f32 %v11527_v33, %v6491_v26  ;;  %v6685_v35 = vmul.f32 %v11539_v23, %v6491_v26 }
 0x277   : > { %9152 = vmatprep.subr.bf16.mxu1 %v9151_v17  ;;  %v9153_v10 = vpack.c.bf16 %v6896_v3, %v6864_v36  ;;  %v6927_v55 = vmax.f32 %v6799_v59, 0.0  ;;  %8669 = vmatmul.mubr.msk.f32.gmra.mrb[14].mxu0 %vm1748_vm0, %v11639_v56  ;;  %v6650_v41 = vmul.f32 %v11527_v33, %v6479_v14  ;;  %v6682_v30 = vmul.f32 %v11539_v23, %v6479_v14 }
 0x278   : > { %9146 = vmatpush1.bf16.msra.mxu0 %v9145_v32  ;;  %v6959_v39 = vmax.f32 %v6831_v43, 0.0  ;;  %v6801_v57 = vadd.f32 %v11551_v31, %v6653_v40  ;;  %v6833_v48 = vadd.f32 %v11560_v16, %v6685_v35  ;;  %8671 = vmatmul.mubr.msk.f32.gmra.mrb[14].mxu1 %vm1748_vm0, %v11639_v56  ;;  %v6652_v18 = vmul.f32 %v11527_v33, %v6487_v45 }
 0x279   : > { %9154 = vmatpush1.bf16.msra.mxu1 %v9153_v10  ;;  %v6798_v12 = vadd.f32 %v11551_v31, %v6650_v41  ;;  %v6830_v27 = vadd.f32 %v11560_v16, %v6682_v30  ;;  %v6684_v62 = vmul.f32 %v11539_v23, %v6487_v45  ;;  %v6339_v0 = vrot.slane %v9517_v49, %v11459_v53 }
 0x27a   : > { %v9147_v26 = vpack.c.bf16 %v6959_v39, %v6927_v55  ;;  %v6929_v42 = vmax.f32 %v6801_v57, 0.0  ;;  %v6961_v28 = vmax.f32 %v6833_v48, 0.0  ;;  %v6800_v15 = vadd.f32 %v11551_v31, %v6652_v18  ;;  %7663 = vmatprep.mubr.f32.mxu0 %v12241_v52  ;;  %7740 = vmatprep.mubr.f32.mxu1 %v12241_v52 }
 0x27b   : > { %v6926_v14 = vmax.f32 %v6798_v12, 0.0  ;;  %v6958_v24 = vmax.f32 %v6830_v27, 0.0  ;;  %v6832_v8 = vadd.f32 %v11560_v16, %v6684_v62  ;;  %v6499_v13 = vrot.slane %v6339_v0, %v11343_v63 }
 0x27c   : > { %9148 = vmatprep.subr.bf16.mxu0 %v9147_v26  ;;  %v9155_v21 = vpack.c.bf16 %v6961_v28, %v6929_v42  ;;  %v6928_v45 = vmax.f32 %v6800_v15, 0.0  ;;  %v6347_v6 = vrot.slane %v9518_v46, %v11459_v53  ;;  %v6335_v61 = vrot.slane %v9517_v49, %v11343_v63 }
 0x27d   : > { %v9149_v47 = vpack.c.bf16 %v6958_v24, %v6926_v14  ;;  %v6960_v44 = vmax.f32 %v6832_v8, 0.0  ;;  %v6591_v51 = vmul.f32 %v11481_v34, %v6499_v13  ;;  %v6623_v5 = vmul.f32 %v11487_v11, %v6499_v13 }
 0x27e   : > { %9156 = vmatprep.subr.bf16.mxu1 %v9155_v21  ;;  %v6507_v7 = vrot.slane %v6347_v6, %v11343_v63  ;;  %v6495_v22 = vrot.slane %v6335_v61, %v11343_v63  ;;  %v6343_v20 = vrot.slane %v9518_v46, %v11343_v63  ;;  %v6655_v9 = vmul.f32 %v11527_v33, %v6499_v13 }
 0x27f   : > { %9150 = vmatpush1.bf16.msra.mxu0 %v9149_v47  ;;  %v9157_v2 = vpack.c.bf16 %v6960_v44, %v6928_v45  ;;  %v6739_v50 = vadd.f32 %v11504_v1, %v6591_v51  ;;  %v6771_v19 = vadd.f32 %v11513_v29, %v6623_v5  ;;  %v6687_v37 = vmul.f32 %v11539_v23, %v6499_v13 }
 0x280   : > { %v6593_v58 = vmul.f32 %v11481_v34, %v6507_v7  ;;  %v6625_v60 = vmul.f32 %v11487_v11, %v6507_v7  ;;  %v6590_v4 = vmul.f32 %v11481_v34, %v6495_v22  ;;  %v6622_v25 = vmul.f32 %v11487_v11, %v6495_v22 }
 0x281   : > { %9158 = vmatpush1.bf16.msra.mxu1 %v9157_v2  ;;  %v6867_v54 = vmax.f32 %v6739_v50, 0.0  ;;  %v6899_v17 = vmax.f32 %v6771_v19, 0.0  ;;  %v6503_v36 = vrot.slane %v6343_v20, %v11343_v63  ;;  %v6803_v3 = vadd.f32 %v11551_v31, %v6655_v9  ;;  %v9520_v9 = vld [vmem:[%s9879_s29 + $0x68] sm:$0xff] }
 0x282   : > { %v6741_v59 = vadd.f32 %v11504_v1, %v6593_v58  ;;  %v6773_v32 = vadd.f32 %v11513_v29, %v6625_v60  ;;  %8672 = vmatmul.mubr.msk.f32.vlgmr.msra.gmra.mrb[16].mxu0 %vm1748_vm0, %v11615_v38  ;;  %v6738_v43 = vadd.f32 %v11504_v1, %v6590_v4  ;;  %v6770_v40 = vadd.f32 %v11513_v29, %v6622_v25 }
 0x283   : > { %v9159_v35 = vpack.c.bf16 %v6899_v17, %v6867_v54  ;;  %v6592_v10 = vmul.f32 %v11481_v34, %v6503_v36  ;;  %v6624_v55 = vmul.f32 %v11487_v11, %v6503_v36  ;;  %v6835_v41 = vadd.f32 %v11560_v16, %v6687_v37  ;;  %7669 = vmatprep.mubr.f32.mxu0 %v12241_v52 }
 0x284   : > { %v6869_v30 = vmax.f32 %v6741_v59, 0.0  ;;  %v6901_v39 = vmax.f32 %v6773_v32, 0.0  ;;  %8674 = vmatmul.mubr.msk.f32.vlgmr.msra.gmra.mrb[16].mxu1 %vm1748_vm0, %v11615_v38  ;;  %v6866_v57 = vmax.f32 %v6738_v43, 0.0  ;;  %v6898_v48 = vmax.f32 %v6770_v40, 0.0  ;;  %v11888_v59 = vld [vmem:[%s9879_s29 + $0x70] sm:$0xff] }
 0x285   : > { %9160 = vmatprep.subr.bf16.mxu0 %v9159_v35  ;;  %v6740_v18 = vadd.f32 %v11504_v1, %v6592_v10  ;;  %v6772_v12 = vadd.f32 %v11513_v29, %v6624_v55  ;;  %v6931_v27 = vmax.f32 %v6803_v3, 0.0  ;;  %v6963_v62 = vmax.f32 %v6835_v41, 0.0  ;;  %7746 = vmatprep.mubr.f32.mxu1 %v12241_v52 }
 0x286   : > { %v9167_v49 = vpack.c.bf16 %v6901_v39, %v6869_v30  ;;  %v9161_v0 = vpack.c.bf16 %v6898_v48, %v6866_v57  ;;  %v6657_v26 = vmul.f32 %v11527_v33, %v6507_v7  ;;  %v6689_v42 = vmul.f32 %v11539_v23, %v6507_v7  ;;  %8673 = vmatmul.mubr.msk.f32.gmra.mrb[18].mxu0 %vm1748_vm0, %v11639_v56 }
 0x287   : > { %v6868_v28 = vmax.f32 %v6740_v18, 0.0  ;;  %v6900_v15 = vmax.f32 %v6772_v12, 0.0  ;;  %v9163_v14 = vpack.c.bf16 %v6963_v62, %v6931_v27  ;;  %v6654_v24 = vmul.f32 %v11527_v33, %v6495_v22  ;;  %7817 = vmatprep.mubr.f32.mxu0 %v12241_v52 }
 0x288   : > { %9168 = vmatprep.subr.bf16.mxu1 %v9167_v49  ;;  %9162 = vmatpush1.bf16.msra.mxu0 %v9161_v0  ;;  %v6805_v8 = vadd.f32 %v11551_v31, %v6657_v26  ;;  %v6837_v13 = vadd.f32 %v11560_v16, %v6689_v42  ;;  %v6686_v21 = vmul.f32 %v11539_v23, %v6495_v22  ;;  %v9519_v22 = vld [vmem:[%s9879_s29 + $0x60] sm:$0xff] }
 0x289   : > { %v9169_v45 = vpack.c.bf16 %v6900_v15, %v6868_v28  ;;  %9164 = vmatprep.subr.bf16.mxu0 %v9163_v14  ;;  %8675 = vmatmul.mubr.msk.f32.gmra.mrb[18].mxu1 %vm1748_vm0, %v11639_v56  ;;  %v6802_v46 = vadd.f32 %v11551_v31, %v6654_v24  ;;  %v6656_v6 = vmul.f32 %v11527_v33, %v6503_v36 }
 0x28a   : > { %v6933_v61 = vmax.f32 %v6805_v8, 0.0  ;;  %v6965_v47 = vmax.f32 %v6837_v13, 0.0  ;;  %v6834_v44 = vadd.f32 %v11560_v16, %v6686_v21  ;;  %v6688_v51 = vmul.f32 %v11539_v23, %v6503_v36  ;;  %7894 = vmatprep.mubr.f32.mxu1 %v12241_v52 }
 0x28b   : > { %9170 = vmatpush1.bf16.msra.mxu1 %v9169_v45  ;;  %v6930_v5 = vmax.f32 %v6802_v46, 0.0  ;;  %v6804_v7 = vadd.f32 %v11551_v31, %v6656_v6  ;;  %v6355_v20 = vrot.slane %v9519_v22, %v11459_v53  ;;  %v6363_v2 = vrot.slane %v9520_v9, %v11459_v53 }
 0x28c   : > { %v9171_v50 = vpack.c.bf16 %v6965_v47, %v6933_v61  ;;  %v6962_v19 = vmax.f32 %v6834_v44, 0.0  ;;  %v6836_v37 = vadd.f32 %v11560_v16, %v6688_v51  ;;  %v6351_v58 = vrot.slane %v9519_v22, %v11343_v63 }
 0x28d   : > { %v6932_v60 = vmax.f32 %v6804_v7, 0.0  ;;  %v6515_v4 = vrot.slane %v6355_v20, %v11343_v63  ;;  %v6523_v25 = vrot.slane %v6363_v2, %v11343_v63  ;;  %v6359_v54 = vrot.slane %v9520_v9, %v11343_v63 }
 0x28e   : > { %9172 = vmatprep.subr.bf16.mxu1 %v9171_v50  ;;  %v9165_v17 = vpack.c.bf16 %v6962_v19, %v6930_v5  ;;  %v6964_v36 = vmax.f32 %v6836_v37, 0.0  ;;  %v6511_v3 = vrot.slane %v6351_v58, %v11343_v63  ;;  %v6371_v32 = vrot.slane %v11888_v59, %v11459_v53 }
 0x28f   : > { %v6595_v43 = vmul.f32 %v11481_v34, %v6515_v4  ;;  %v6627_v40 = vmul.f32 %v11487_v11, %v6515_v4  ;;  %v6597_v35 = vmul.f32 %v11481_v34, %v6523_v25  ;;  %v6629_v10 = vmul.f32 %v11487_v11, %v6523_v25 }
 0x290   : > { %9166 = vmatpush1.bf16.msra.mxu0 %v9165_v17  ;;  %v9173_v55 = vpack.c.bf16 %v6964_v36, %v6932_v60  ;;  %v6594_v41 = vmul.f32 %v11481_v34, %v6511_v3  ;;  %v6626_v30 = vmul.f32 %v11487_v11, %v6511_v3  ;;  %v6519_v39 = vrot.slane %v6359_v54, %v11343_v63 }
 0x291   : > { %v6743_v57 = vadd.f32 %v11504_v1, %v6595_v43  ;;  %v6775_v48 = vadd.f32 %v11513_v29, %v6627_v40  ;;  %v6745_v18 = vadd.f32 %v11504_v1, %v6597_v35  ;;  %v6777_v12 = vadd.f32 %v11513_v29, %v6629_v10 }
 0x292   : > { %9174 = vmatpush1.bf16.msra.mxu1 %v9173_v55  ;;  %v6742_v27 = vadd.f32 %v11504_v1, %v6594_v41  ;;  %v6774_v62 = vadd.f32 %v11513_v29, %v6626_v30  ;;  %v6596_v49 = vmul.f32 %v11481_v34, %v6519_v39  ;;  %v6628_v0 = vmul.f32 %v11487_v11, %v6519_v39  ;;  %v9522_v41 = vld [vmem:[%s9879_s29 + $0x78] sm:$0xff] }
 0x293   : > { %v6871_v26 = vmax.f32 %v6743_v57, 0.0  ;;  %v6903_v42 = vmax.f32 %v6775_v48, 0.0  ;;  %v6873_v28 = vmax.f32 %v6745_v18, 0.0  ;;  %v6905_v15 = vmax.f32 %v6777_v12, 0.0  ;;  %8676 = vmatmul.mubr.msk.f32.vlgmr.msra.gmra.mrb[20].mxu0 %vm1748_vm0, %v11615_v38 }
 0x294   : > { %v6870_v14 = vmax.f32 %v6742_v27, 0.0  ;;  %v6902_v24 = vmax.f32 %v6774_v62, 0.0  ;;  %v6744_v8 = vadd.f32 %v11504_v1, %v6596_v49  ;;  %v6776_v13 = vadd.f32 %v11513_v29, %v6628_v0  ;;  %7823 = vmatprep.mubr.f32.mxu0 %v12241_v52 }
 0x295   : > { %v9175_v21 = vpack.c.bf16 %v6903_v42, %v6871_v26  ;;  %v9183_v45 = vpack.c.bf16 %v6905_v15, %v6873_v28  ;;  %8678 = vmatmul.mubr.msk.f32.vlgmr.msra.gmra.mrb[20].mxu1 %vm1748_vm0, %v11615_v38  ;;  %v6659_v46 = vmul.f32 %v11527_v33, %v6515_v4  ;;  %v6691_v6 = vmul.f32 %v11539_v23, %v6515_v4 }
 0x296   : > { %v9177_v61 = vpack.c.bf16 %v6902_v24, %v6870_v14  ;;  %v6872_v47 = vmax.f32 %v6744_v8, 0.0  ;;  %v6904_v44 = vmax.f32 %v6776_v13, 0.0  ;;  %v6661_v51 = vmul.f32 %v11527_v33, %v6523_v25  ;;  %7900 = vmatprep.mubr.f32.mxu1 %v12241_v52 }
 0x297   : > { %9176 = vmatprep.subr.bf16.mxu0 %v9175_v21  ;;  %9184 = vmatprep.subr.bf16.mxu1 %v9183_v45  ;;  %v6807_v5 = vadd.f32 %v11551_v31, %v6659_v46  ;;  %v6839_v7 = vadd.f32 %v11560_v16, %v6691_v6  ;;  %v6693_v22 = vmul.f32 %v11539_v23, %v6523_v25 }
 0x298   : > { %9178 = vmatpush1.bf16.msra.mxu0 %v9177_v61  ;;  %v9185_v20 = vpack.c.bf16 %v6904_v44, %v6872_v47  ;;  %v6809_v9 = vadd.f32 %v11551_v31, %v6661_v51  ;;  %v6658_v2 = vmul.f32 %v11527_v33, %v6511_v3  ;;  %v6690_v50 = vmul.f32 %v11539_v23, %v6511_v3 }
 0x299   : > { %v6935_v19 = vmax.f32 %v6807_v5, 0.0  ;;  %v6967_v37 = vmax.f32 %v6839_v7, 0.0  ;;  %v6841_v58 = vadd.f32 %v11560_v16, %v6693_v22  ;;  %8677 = vmatmul.mubr.msk.f32.gmra.mrb[22].mxu0 %vm1748_vm0, %v11639_v56  ;;  %8679 = vmatmul.mubr.msk.f32.gmra.mrb[22].mxu1 %vm1748_vm0, %v11639_v56  ;;  %v6660_v60 = vmul.f32 %v11527_v33, %v6519_v39 }
 0x29a   : > { %9186 = vmatpush1.bf16.msra.mxu1 %v9185_v20  ;;  %v6937_v4 = vmax.f32 %v6809_v9, 0.0  ;;  %v6806_v25 = vadd.f32 %v11551_v31, %v6658_v2  ;;  %v6838_v54 = vadd.f32 %v11560_v16, %v6690_v50  ;;  %v6692_v17 = vmul.f32 %v11539_v23, %v6519_v39  ;;  %7971 = vmatprep.mubr.f32.mxu0 %v12241_v52 }
 0x29b   : > { %v9179_v36 = vpack.c.bf16 %v6967_v37, %v6935_v19  ;;  %v6969_v3 = vmax.f32 %v6841_v58, 0.0  ;;  %v6808_v43 = vadd.f32 %v11551_v31, %v6660_v60  ;;  %v6531_v40 = vrot.slane %v6371_v32, %v11343_v63  ;;  %8048 = vmatprep.mubr.f32.mxu1 %v12241_v52 }
 0x29c   : > { %v6934_v35 = vmax.f32 %v6806_v25, 0.0  ;;  %v6966_v10 = vmax.f32 %v6838_v54, 0.0  ;;  %v6840_v55 = vadd.f32 %v11560_v16, %v6692_v17  ;;  %v6379_v30 = vrot.slane %v9522_v41, %v11459_v53 }
 0x29d   : > { %9180 = vmatprep.subr.bf16.mxu0 %v9179_v36  ;;  %v9187_v39 = vpack.c.bf16 %v6969_v3, %v6937_v4  ;;  %v6936_v57 = vmax.f32 %v6808_v43, 0.0  ;;  %v6599_v48 = vmul.f32 %v11481_v34, %v6531_v40  ;;  %v6631_v18 = vmul.f32 %v11487_v11, %v6531_v40 }
 0x29e   : > { %v9181_v12 = vpack.c.bf16 %v6966_v10, %v6934_v35  ;;  %v6968_v27 = vmax.f32 %v6840_v55, 0.0  ;;  %v6539_v32 = vrot.slane %v6379_v30, %v11343_v63  ;;  %v6367_v62 = vrot.slane %v11888_v59, %v11343_v63 }
 0x29f   : > { %9188 = vmatprep.subr.bf16.mxu1 %v9187_v39  ;;  %v6747_v49 = vadd.f32 %v11504_v1, %v6599_v48  ;;  %v6779_v0 = vadd.f32 %v11513_v29, %v6631_v18  ;;  %v6375_v53 = vrot.slane %v9522_v41, %v11343_v63  ;;  %v6663_v26 = vmul.f32 %v11527_v33, %v6531_v40 }
 0x2a0   : > { %9182 = vmatpush1.bf16.msra.mxu0 %v9181_v12  ;;  %v9189_v42 = vpack.c.bf16 %v6968_v27, %v6936_v57  ;;  %v6601_v28 = vmul.f32 %v11481_v34, %v6539_v32  ;;  %v6633_v15 = vmul.f32 %v11487_v11, %v6539_v32  ;;  %v6527_v14 = vrot.slane %v6367_v62, %v11343_v63  ;;  %v9523_v27 = vld [vmem:[#allocation2 + $0x30] sm:$0xff] }
 0x2a1   : > { %v6875_v24 = vmax.f32 %v6747_v49, 0.0  ;;  %v6907_v8 = vmax.f32 %v6779_v0, 0.0  ;;  %v6535_v59 = vrot.slane %v6375_v53, %v11343_v63  ;;  %v6695_v13 = vmul.f32 %v11539_v23, %v6531_v40 }
 0x2a2   : > { %9190 = vmatpush1.bf16.msra.mxu1 %v9189_v42  ;;  %v6749_v21 = vadd.f32 %v11504_v1, %v6601_v28  ;;  %v6781_v45 = vadd.f32 %v11513_v29, %v6633_v15  ;;  %v6598_v46 = vmul.f32 %v11481_v34, %v6527_v14  ;;  %v6630_v6 = vmul.f32 %v11487_v11, %v6527_v14  ;;  %v12012_v28 = vpop.permute.xlu1 %8288 }
 0x2a3   : > { %v9191_v61 = vpack.c.bf16 %v6907_v8, %v6875_v24  ;;  %8680 = vmatmul.mubr.msk.f32.vlgmr.msra.gmra.mrb[24].mxu0 %vm1748_vm0, %v11615_v38  ;;  %v6600_v47 = vmul.f32 %v11481_v34, %v6535_v59  ;;  %v6632_v44 = vmul.f32 %v11487_v11, %v6535_v59  ;;  %v6811_v63 = vadd.f32 %v11551_v31, %v6663_v26 }
 0x2a4   : > { %v6877_v51 = vmax.f32 %v6749_v21, 0.0  ;;  %v6909_v5 = vmax.f32 %v6781_v45, 0.0  ;;  %v6746_v7 = vadd.f32 %v11504_v1, %v6598_v46  ;;  %v6778_v22 = vadd.f32 %v11513_v29, %v6630_v6  ;;  %7977 = vmatprep.mubr.f32.mxu0 %v12241_v52 }
 0x2a5   : > { %9192 = vmatprep.subr.bf16.mxu0 %v9191_v61  ;;  %8682 = vmatmul.mubr.msk.f32.vlgmr.msra.gmra.mrb[24].mxu1 %vm1748_vm0, %v11615_v38  ;;  %v6748_v20 = vadd.f32 %v11504_v1, %v6600_v47  ;;  %v6780_v34 = vadd.f32 %v11513_v29, %v6632_v44  ;;  %v6843_v11 = vadd.f32 %v11560_v16, %v6695_v13  ;;  %v6939_v9 = vmax.f32 %v6811_v63, 0.0 }
 0x2a6   : > { %v9199_v2 = vpack.c.bf16 %v6909_v5, %v6877_v51  ;;  %v6874_v50 = vmax.f32 %v6746_v7, 0.0  ;;  %v6906_v19 = vmax.f32 %v6778_v22, 0.0  ;;  %v6665_v37 = vmul.f32 %v11527_v33, %v6539_v32  ;;  %8054 = vmatprep.mubr.f32.mxu1 %v12241_v52 }
 0x2a7   : > { %v6876_v58 = vmax.f32 %v6748_v20, 0.0  ;;  %v6908_v60 = vmax.f32 %v6780_v34, 0.0  ;;  %v6971_v4 = vmax.f32 %v6843_v11, 0.0  ;;  %v6697_v25 = vmul.f32 %v11539_v23, %v6539_v32  ;;  %8681 = vmatmul.mubr.msk.f32.gmra.mrb[26].mxu0 %vm1748_vm0, %v11639_v56 }
 0x2a8   : > { %9200 = vmatprep.subr.bf16.mxu1 %v9199_v2  ;;  %v9193_v1 = vpack.c.bf16 %v6906_v19, %v6874_v50  ;;  %v6813_v29 = vadd.f32 %v11551_v31, %v6665_v37  ;;  %v6662_v38 = vmul.f32 %v11527_v33, %v6527_v14  ;;  %v6694_v54 = vmul.f32 %v11539_v23, %v6527_v14 }
 0x2a9   : > { %v9201_v17 = vpack.c.bf16 %v6908_v60, %v6876_v58  ;;  %v9195_v36 = vpack.c.bf16 %v6971_v4, %v6939_v9  ;;  %v6845_v3 = vadd.f32 %v11560_v16, %v6697_v25  ;;  %8683 = vmatmul.mubr.msk.f32.gmra.mrb[26].mxu1 %vm1748_vm0, %v11639_v56  ;;  %v6664_v43 = vmul.f32 %v11527_v33, %v6535_v59 }
 0x2aa   : > { %9194 = vmatpush1.bf16.msra.mxu0 %v9193_v1  ;;  %v6941_v40 = vmax.f32 %v6813_v29, 0.0  ;;  %v6810_v35 = vadd.f32 %v11551_v31, %v6662_v38  ;;  %v6842_v10 = vadd.f32 %v11560_v16, %v6694_v54  ;;  %v6696_v55 = vmul.f32 %v11539_v23, %v6535_v59  ;;  %8125 = vmatprep.mubr.f32.mxu0 %v12241_v52 }
 0x2ab   : > { %9202 = vmatpush1.bf16.msra.mxu1 %v9201_v17  ;;  %9196 = vmatprep.subr.bf16.mxu0 %v9195_v36  ;;  %v6973_v41 = vmax.f32 %v6845_v3, 0.0  ;;  %v6812_v30 = vadd.f32 %v11551_v31, %v6664_v43  ;;  %v9524_v31 = vld [vmem:[#allocation2 + $0x38] sm:$0xff] }
 0x2ac   : > { %v6938_v39 = vmax.f32 %v6810_v35, 0.0  ;;  %v6970_v57 = vmax.f32 %v6842_v10, 0.0  ;;  %v6844_v56 = vadd.f32 %v11560_v16, %v6696_v55  ;;  %8202 = vmatprep.mubr.f32.mxu1 %v12241_v52  ;;  %v12002_v16 = vpop.permute.xlu0 %8283 }
 0x2ad   : > { %v9203_v33 = vpack.c.bf16 %v6973_v41, %v6941_v40  ;;  %v6940_v48 = vmax.f32 %v6812_v30, 0.0 }
 0x2ae   : > { %v9197_v18 = vpack.c.bf16 %v6970_v57, %v6938_v39  ;;  %v6972_v12 = vmax.f32 %v6844_v56, 0.0 }
 0x2af   : > { %9204 = vmatprep.subr.bf16.mxu1 %v9203_v33 }
 0x2b0   : > { %9198 = vmatpush1.bf16.msra.mxu0 %v9197_v18  ;;  %v9205_v23 = vpack.c.bf16 %v6972_v12, %v6940_v48 }
 0x2b2   : > { %9206 = vmatpush1.bf16.msra.mxu1 %v9205_v23 }
 0x2b3   : > { %8684 = vmatmul.mubr.msk.f32.vlgmr.msra.gmra.mrb[28].mxu0 %vm1748_vm0, %v9523_v27 }
 0x2b4   : > { %8131 = vmatprep.mubr.f32.mxu0 %v12241_v52 }
 0x2b5   : > { %8686 = vmatmul.mubr.msk.f32.vlgmr.msra.gmra.mrb[28].mxu1 %vm1748_vm0, %v9523_v27 }
 0x2b6   : > { %8208 = vmatprep.mubr.f32.mxu1 %v12241_v52 }
 0x2b7   : > { %8685 = vmatmul.mubr.msk.f32.gmra.mrb[30].mxu0 %vm1748_vm0, %v9524_v31 }
 0x2b9   : > { %8687 = vmatmul.mubr.msk.f32.gmra.mrb[30].mxu1 %vm1748_vm0, %v9524_v31 }
 0x315   : > { %v7049_v32 = vpop.f32.mrb[0].mxu0 }
 0x316   : > { %v8291_v62 = vadd.f32 %v12002_v16, %v7049_v32  ;;  %v7051_v49 = vpop.f32.mrb[1].mxu0 }
 0x317   : > { %v7126_v0 = vpop.f32.mrb[0].mxu1  ;;  %v8292_v53 = vadd.f32 %v12002_v16, %v7051_v49 }
 0x318   : > { %8355 = vst [vmem:[%s12006_s13] sm:$0xff] %v8291_v62  ;;  %v8293_v52 = vadd.f32 %v12002_v16, %v7126_v0  ;;  %v7128_v26 = vpop.f32.mrb[1].mxu1 }
 0x319   : > { %8356 = vst [vmem:[%s12006_s13 + $0x8] sm:$0xff] %v8292_v53  ;;  %v8294_v42 = vadd.f32 %v12002_v16, %v7128_v26 }
 0x31a   : > { %8357 = vst [vmem:[%s12006_s13 + $0x10] sm:$0xff] %v8293_v52 }
 0x31b   : > { %8358 = vst [vmem:[%s12006_s13 + $0x18] sm:$0xff] %v8294_v42  ;;  %v7055_v15 = vpop.f32.mrb[2].mxu0  ;;  %v7132_v14 = vpop.f32.mrb[2].mxu1 }
 0x31c   : > { %v8323_v24 = vadd.f32 %v12012_v28, %v7055_v15  ;;  %v8325_v8 = vadd.f32 %v12012_v28, %v7132_v14  ;;  %v7057_v59 = vpop.f32.mrb[3].mxu0  ;;  %v7134_v13 = vpop.f32.mrb[3].mxu1 }
 0x31d   : > { %v8324_v21 = vadd.f32 %v12012_v28, %v7057_v59  ;;  %v8326_v45 = vadd.f32 %v12012_v28, %v7134_v13 }
 0x31e   : > { %8387 = vst [vmem:[%s12006_s13 + $0x100] sm:$0xff] %v8323_v24  ;;  %8389 = vst [vmem:[%s12006_s13 + $0x110] sm:$0xff] %v8325_v8 }
 0x31f   : > { %8388 = vst [vmem:[%s12006_s13 + $0x108] sm:$0xff] %v8324_v21  ;;  %8390 = vst [vmem:[%s12006_s13 + $0x118] sm:$0xff] %v8326_v45 }
 0x325   : > { %v7203_v46 = vpop.f32.mrb[4].mxu0 }
 0x326   : > { %v8295_v6 = vadd.f32 %v12002_v16, %v7203_v46  ;;  %v7205_v61 = vpop.f32.mrb[5].mxu0 }
 0x327   : > { %v7280_v47 = vpop.f32.mrb[4].mxu1  ;;  %v8296_v44 = vadd.f32 %v12002_v16, %v7205_v61 }
 0x328   : > { %8359 = vst [vmem:[%s12006_s13 + $0x20] sm:$0xff] %v8295_v6  ;;  %v8297_v63 = vadd.f32 %v12002_v16, %v7280_v47  ;;  %v7282_v51 = vpop.f32.mrb[5].mxu1 }
 0x329   : > { %8360 = vst [vmem:[%s12006_s13 + $0x28] sm:$0xff] %v8296_v44  ;;  %v8298_v5 = vadd.f32 %v12002_v16, %v7282_v51  ;;  %v7209_v7 = vpop.f32.mrb[6].mxu0 }
 0x32a   : > { %8361 = vst [vmem:[%s12006_s13 + $0x30] sm:$0xff] %v8297_v63  ;;  %v8327_v22 = vadd.f32 %v12012_v28, %v7209_v7  ;;  %v7211_v20 = vpop.f32.mrb[7].mxu0 }
 0x32b   : > { %8362 = vst [vmem:[%s12006_s13 + $0x38] sm:$0xff] %v8298_v5  ;;  %v7286_v34 = vpop.f32.mrb[6].mxu1  ;;  %v8328_v11 = vadd.f32 %v12012_v28, %v7211_v20 }
 0x32c   : > { %8391 = vst [vmem:[%s12006_s13 + $0x120] sm:$0xff] %v8327_v22  ;;  %v8329_v9 = vadd.f32 %v12012_v28, %v7286_v34  ;;  %v7288_v2 = vpop.f32.mrb[7].mxu1 }
 0x32d   : > { %8392 = vst [vmem:[%s12006_s13 + $0x128] sm:$0xff] %v8328_v11  ;;  %v8330_v50 = vadd.f32 %v12012_v28, %v7288_v2 }
 0x32e   : > { %8393 = vst [vmem:[%s12006_s13 + $0x130] sm:$0xff] %v8329_v9 }
 0x32f   : > { %8394 = vst [vmem:[%s12006_s13 + $0x138] sm:$0xff] %v8330_v50 }
 0x335   : > { %v7357_v19 = vpop.f32.mrb[8].mxu0 }
 0x336   : > { %v8299_v37 = vadd.f32 %v12002_v16, %v7357_v19  ;;  %v7359_v58 = vpop.f32.mrb[9].mxu0 }
 0x337   : > { %v7434_v60 = vpop.f32.mrb[8].mxu1  ;;  %v8300_v4 = vadd.f32 %v12002_v16, %v7359_v58 }
 0x338   : > { %8363 = vst [vmem:[%s12006_s13 + $0x40] sm:$0xff] %v8299_v37  ;;  %v8301_v25 = vadd.f32 %v12002_v16, %v7434_v60  ;;  %v7436_v1 = vpop.f32.mrb[9].mxu1 }
 0x339   : > { %8364 = vst [vmem:[%s12006_s13 + $0x48] sm:$0xff] %v8300_v4  ;;  %v8302_v29 = vadd.f32 %v12002_v16, %v7436_v1 }
 0x33a   : > { %8365 = vst [vmem:[%s12006_s13 + $0x50] sm:$0xff] %v8301_v25 }
 0x33b   : > { %8366 = vst [vmem:[%s12006_s13 + $0x58] sm:$0xff] %v8302_v29  ;;  %v7363_v38 = vpop.f32.mrb[10].mxu0  ;;  %v7440_v54 = vpop.f32.mrb[10].mxu1 }
 0x33c   : > { %v8331_v17 = vadd.f32 %v12012_v28, %v7363_v38  ;;  %v8333_v36 = vadd.f32 %v12012_v28, %v7440_v54  ;;  %v7365_v3 = vpop.f32.mrb[11].mxu0  ;;  %v7442_v43 = vpop.f32.mrb[11].mxu1 }
 0x33d   : > { %v8332_v40 = vadd.f32 %v12012_v28, %v7365_v3  ;;  %v8334_v35 = vadd.f32 %v12012_v28, %v7442_v43 }
 0x33e   : > { %8395 = vst [vmem:[%s12006_s13 + $0x140] sm:$0xff] %v8331_v17  ;;  %8397 = vst [vmem:[%s12006_s13 + $0x150] sm:$0xff] %v8333_v36 }
 0x33f   : > { %8396 = vst [vmem:[%s12006_s13 + $0x148] sm:$0xff] %v8332_v40  ;;  %8398 = vst [vmem:[%s12006_s13 + $0x158] sm:$0xff] %v8334_v35 }
 0x345   : > { %v7511_v10 = vpop.f32.mrb[12].mxu0 }
 0x346   : > { %v8303_v55 = vadd.f32 %v12002_v16, %v7511_v10  ;;  %v7513_v41 = vpop.f32.mrb[13].mxu0 }
 0x347   : > { %v7588_v30 = vpop.f32.mrb[12].mxu1  ;;  %v8304_v39 = vadd.f32 %v12002_v16, %v7513_v41 }
 0x348   : > { %8367 = vst [vmem:[%s12006_s13 + $0x60] sm:$0xff] %v8303_v55  ;;  %v8305_v57 = vadd.f32 %v12002_v16, %v7588_v30  ;;  %v7590_v56 = vpop.f32.mrb[13].mxu1 }
 0x349   : > { %8368 = vst [vmem:[%s12006_s13 + $0x68] sm:$0xff] %v8304_v39  ;;  %v8306_v33 = vadd.f32 %v12002_v16, %v7590_v56 }
 0x34a   : > { %8369 = vst [vmem:[%s12006_s13 + $0x70] sm:$0xff] %v8305_v57  ;;  %v7517_v48 = vpop.f32.mrb[14].mxu0 }
 0x34b   : > { %8370 = vst [vmem:[%s12006_s13 + $0x78] sm:$0xff] %v8306_v33  ;;  %v8335_v18 = vadd.f32 %v12012_v28, %v7517_v48  ;;  %v7594_v12 = vpop.f32.mrb[14].mxu1  ;;  %v7519_v23 = vpop.f32.mrb[15].mxu0 }
 0x34c   : > { %v8337_v27 = vadd.f32 %v12012_v28, %v7594_v12  ;;  %v8336_v31 = vadd.f32 %v12012_v28, %v7519_v23  ;;  %v7596_v32 = vpop.f32.mrb[15].mxu1 }
 0x34d   : > { %8399 = vst [vmem:[%s12006_s13 + $0x160] sm:$0xff] %v8335_v18  ;;  %v8338_v62 = vadd.f32 %v12012_v28, %v7596_v32 }
 0x34e   : > { %8401 = vst [vmem:[%s12006_s13 + $0x170] sm:$0xff] %v8337_v27  ;;  %8400 = vst [vmem:[%s12006_s13 + $0x168] sm:$0xff] %v8336_v31 }
 0x34f   : > { %8402 = vst [vmem:[%s12006_s13 + $0x178] sm:$0xff] %v8338_v62 }
 0x355   : > { %v7665_v49 = vpop.f32.mrb[16].mxu0 }
 0x356   : > { %v8307_v0 = vadd.f32 %v12002_v16, %v7665_v49  ;;  %v7667_v53 = vpop.f32.mrb[17].mxu0 }
 0x357   : > { %v7742_v52 = vpop.f32.mrb[16].mxu1  ;;  %v8308_v26 = vadd.f32 %v12002_v16, %v7667_v53 }
 0x358   : > { %8371 = vst [vmem:[%s12006_s13 + $0x80] sm:$0xff] %v8307_v0  ;;  %v8309_v42 = vadd.f32 %v12002_v16, %v7742_v52  ;;  %v7744_v15 = vpop.f32.mrb[17].mxu1 }
 0x359   : > { %8372 = vst [vmem:[%s12006_s13 + $0x88] sm:$0xff] %v8308_v26  ;;  %v8310_v14 = vadd.f32 %v12002_v16, %v7744_v15  ;;  %v7671_v24 = vpop.f32.mrb[18].mxu0 }
 0x35a   : > { %8373 = vst [vmem:[%s12006_s13 + $0x90] sm:$0xff] %v8309_v42  ;;  %v8339_v8 = vadd.f32 %v12012_v28, %v7671_v24  ;;  %v7673_v59 = vpop.f32.mrb[19].mxu0 }
 0x35b   : > { %8374 = vst [vmem:[%s12006_s13 + $0x98] sm:$0xff] %v8310_v14  ;;  %v8340_v13 = vadd.f32 %v12012_v28, %v7673_v59 }
 0x35c   : > { %8403 = vst [vmem:[%s12006_s13 + $0x180] sm:$0xff] %v8339_v8  ;;  %v7748_v21 = vpop.f32.mrb[18].mxu1 }
 0x35d   : > { %v8341_v45 = vadd.f32 %v12012_v28, %v7748_v21  ;;  %8404 = vst [vmem:[%s12006_s13 + $0x188] sm:$0xff] %v8340_v13  ;;  %v7750_v46 = vpop.f32.mrb[19].mxu1 }
 0x35e   : > { %v8342_v6 = vadd.f32 %v12012_v28, %v7750_v46 }
 0x35f   : > { %8405 = vst [vmem:[%s12006_s13 + $0x190] sm:$0xff] %v8341_v45 }
 0x360   : > { %8406 = vst [vmem:[%s12006_s13 + $0x198] sm:$0xff] %v8342_v6 }
 0x366   : > { %v7819_v61 = vpop.f32.mrb[20].mxu0 }
 0x367   : > { %v8311_v47 = vadd.f32 %v12002_v16, %v7819_v61  ;;  %v7821_v44 = vpop.f32.mrb[21].mxu0 }
 0x368   : > { %v7896_v63 = vpop.f32.mrb[20].mxu1  ;;  %v8312_v51 = vadd.f32 %v12002_v16, %v7821_v44 }
 0x369   : > { %8375 = vst [vmem:[%s12006_s13 + $0xa0] sm:$0xff] %v8311_v47  ;;  %v8313_v5 = vadd.f32 %v12002_v16, %v7896_v63  ;;  %v7898_v7 = vpop.f32.mrb[21].mxu1 }
 0x36a   : > { %8376 = vst [vmem:[%s12006_s13 + $0xa8] sm:$0xff] %v8312_v51  ;;  %v8314_v22 = vadd.f32 %v12002_v16, %v7898_v7 }
 0x36b   : > { %8377 = vst [vmem:[%s12006_s13 + $0xb0] sm:$0xff] %v8313_v5 }
 0x36c   : > { %8378 = vst [vmem:[%s12006_s13 + $0xb8] sm:$0xff] %v8314_v22  ;;  %v7825_v20 = vpop.f32.mrb[22].mxu0  ;;  %v7902_v34 = vpop.f32.mrb[22].mxu1 }
 0x36d   : > { %v8343_v11 = vadd.f32 %v12012_v28, %v7825_v20  ;;  %v8345_v9 = vadd.f32 %v12012_v28, %v7902_v34  ;;  %v7827_v2 = vpop.f32.mrb[23].mxu0  ;;  %v7904_v50 = vpop.f32.mrb[23].mxu1 }
 0x36e   : > { %v8344_v19 = vadd.f32 %v12012_v28, %v7827_v2  ;;  %v8346_v37 = vadd.f32 %v12012_v28, %v7904_v50 }
 0x36f   : > { %8407 = vst [vmem:[%s12006_s13 + $0x1a0] sm:$0xff] %v8343_v11  ;;  %8409 = vst [vmem:[%s12006_s13 + $0x1b0] sm:$0xff] %v8345_v9 }
 0x370   : > { %8408 = vst [vmem:[%s12006_s13 + $0x1a8] sm:$0xff] %v8344_v19  ;;  %8410 = vst [vmem:[%s12006_s13 + $0x1b8] sm:$0xff] %v8346_v37 }
 0x376   : > { %v7973_v58 = vpop.f32.mrb[24].mxu0 }
 0x377   : > { %v8315_v60 = vadd.f32 %v12002_v16, %v7973_v58  ;;  %v7975_v4 = vpop.f32.mrb[25].mxu0 }
 0x378   : > { %v8050_v25 = vpop.f32.mrb[24].mxu1  ;;  %v8316_v1 = vadd.f32 %v12002_v16, %v7975_v4 }
 0x379   : > { %8379 = vst [vmem:[%s12006_s13 + $0xc0] sm:$0xff] %v8315_v60  ;;  %v8317_v29 = vadd.f32 %v12002_v16, %v8050_v25  ;;  %v8052_v38 = vpop.f32.mrb[25].mxu1 }
 0x37a   : > { %8380 = vst [vmem:[%s12006_s13 + $0xc8] sm:$0xff] %v8316_v1  ;;  %v8318_v54 = vadd.f32 %v12002_v16, %v8052_v38  ;;  %v7979_v17 = vpop.f32.mrb[26].mxu0 }
 0x37b   : > { %8381 = vst [vmem:[%s12006_s13 + $0xd0] sm:$0xff] %v8317_v29  ;;  %v8347_v36 = vadd.f32 %v12012_v28, %v7979_v17  ;;  %v7981_v3 = vpop.f32.mrb[27].mxu0 }
 0x37c   : > { %8382 = vst [vmem:[%s12006_s13 + $0xd8] sm:$0xff] %v8318_v54  ;;  %v8056_v43 = vpop.f32.mrb[26].mxu1  ;;  %v8348_v40 = vadd.f32 %v12012_v28, %v7981_v3 }
 0x37d   : > { %8411 = vst [vmem:[%s12006_s13 + $0x1c0] sm:$0xff] %v8347_v36  ;;  %v8349_v35 = vadd.f32 %v12012_v28, %v8056_v43  ;;  %v8058_v10 = vpop.f32.mrb[27].mxu1 }
 0x37e   : > { %8412 = vst [vmem:[%s12006_s13 + $0x1c8] sm:$0xff] %v8348_v40  ;;  %v8350_v55 = vadd.f32 %v12012_v28, %v8058_v10 }
 0x37f   : > { %8413 = vst [vmem:[%s12006_s13 + $0x1d0] sm:$0xff] %v8349_v35 }
 0x380   : > { %8414 = vst [vmem:[%s12006_s13 + $0x1d8] sm:$0xff] %v8350_v55 }
 0x386   : > { %v8127_v41 = vpop.f32.mrb[28].mxu0 }
 0x387   : > { %v8319_v30 = vadd.f32 %v12002_v16, %v8127_v41  ;;  %v8129_v39 = vpop.f32.mrb[29].mxu0 }
 0x388   : > { %v8204_v57 = vpop.f32.mrb[28].mxu1  ;;  %v8320_v56 = vadd.f32 %v12002_v16, %v8129_v39 }
 0x389   : > { %8383 = vst [vmem:[%s12006_s13 + $0xe0] sm:$0xff] %v8319_v30  ;;  %v8321_v33 = vadd.f32 %v12002_v16, %v8204_v57  ;;  %v8206_v48 = vpop.f32.mrb[29].mxu1 }
 0x38a   : > { %8384 = vst [vmem:[%s12006_s13 + $0xe8] sm:$0xff] %v8320_v56  ;;  %v8322_v18 = vadd.f32 %v12002_v16, %v8206_v48  ;;  %v8133_v12 = vpop.f32.mrb[30].mxu0 }
 0x38b   : > { %8385 = vst [vmem:[%s12006_s13 + $0xf0] sm:$0xff] %v8321_v33  ;;  %v8351_v23 = vadd.f32 %v12012_v28, %v8133_v12  ;;  %v8135_v27 = vpop.f32.mrb[31].mxu0 }
 0x38c   : > { %8386 = vst [vmem:[%s12006_s13 + $0xf8] sm:$0xff] %v8322_v18  ;;  %v8210_v31 = vpop.f32.mrb[30].mxu1  ;;  %v8352_v32 = vadd.f32 %v12012_v28, %v8135_v27 }
 0x38d   : > { %8415 = vst [vmem:[%s12006_s13 + $0x1e0] sm:$0xff] %v8351_v23  ;;  %v8353_v62 = vadd.f32 %v12012_v28, %v8210_v31  ;;  %v8212_v49 = vpop.f32.mrb[31].mxu1 }
 0x38e   : > { %8416 = vst [vmem:[%s12006_s13 + $0x1e8] sm:$0xff] %v8352_v32  ;;  %v8354_v16 = vadd.f32 %v12012_v28, %v8212_v49 }
 0x38f   : > { %8417 = vst [vmem:[%s12006_s13 + $0x1f0] sm:$0xff] %v8353_v62 }
 0x390   : > { %8418 = vst [vmem:[%s12006_s13 + $0x1f8] sm:$0xff] %v8354_v16 }
 0x391   : > { %9566 = shalt.err (!%p9563_p6)
}
 0x392   : > { %s9567_s25 = scalar_lea.hbm %s12137_s21, 8192  ;;  %s9571_s9 = scalar_lea.hbm %s12198_s5, 16384 }
 0x393   : > { %p9568_p7 = scmp.ne.s32.totalorder %s12137_s21, %s9567_s25  ;;  %p9572_p0 = scmp.lt.u32.totalorder %s12137_s21, %s12198_s5 }
 0x394   : > { %p9573_p2 = scmp.lt.u32.totalorder %s9571_s9, %s9567_s25  ;;  %p9575_p8 = scmp.lt.u32.totalorder %s9567_s25, %s12137_s21 }
 0x395   : > { %p9569_p9 = pnand %p9568_p7, %p12256_p10 }
 0x396   : > { %p9574_p4 = por %p9573_p2, %p9572_p0 }
 0x397   : > { %p9570_p12 = pneg %p9569_p9 }
 0x398   : > { %p9576_p11 = por %p9575_p8, %p9574_p4 }
 0x39a   : > { %p9577_p13 = pnand %p9576_p11, %p9570_p12 }
 0x39c   : > { %9580 = shalt.err (!%p9577_p13)
}
 0x39d   : > { %s9643_s14 = smov 4096   ;;  %s9644_s15 = smov 256  }
 0x39e   : > { %9403 = dma.vmem_to_hbm [thread:$0]  (%p12256_p10), %s12139_s11, 8192, %s12137_s21, %s12147_s10, %s9643_s14, %s9643_s14, %s9644_s15  }
 0x39f PF: > { %p9415_p1 = scmp.ge.s32.totalorder %s9635_s23, 2  ;;  %s8450_s7 = sand.u32 1, %s9615_s18  }
 0x3a0   : > { %p12257_p3 = scmp.ne.s32.totalorder %s12222_s30, 0  ;;  %s8451_s16 = scalar_lea.sflag [#allocation4], %s8450_s7 }
 0x3a2   : > { %p9410_p5 = pnand %p9415_p1, %p12257_p3 }
 0x3a4   : > { %9610 = dma.done.wait (!%p9410_p5), %s8451_s16, 8192  }
 0x3a5   : > { %9612 = vsyncadd (!%p9410_p5), %s8451_s16, 4294959104  ;;  %s19_s23 = sadd.s32 1, %s9635_s23   ;;  %s12258_s18 = smov %s9619_s19 }
 0x3a6   : > { %p16_p6 = scmp.ge.s32.totalorder %s19_s23, 4   ;;  %s12259_s19 = smov %s9623_s20 }
 0x3a7   : > { %s12260_s20 = smov %s9728_s6  ;;  %s12261_s21 = smov %s9631_s22 }
 0x3a8   : > { %s12262_s22 = smov %s12264_s26  ;;  %18 = sbr.rel (!%p16_p6) target bundleno = 5 (0x5), region = 89 }
 0x3af   :  { %8456 = vsyncpa [#allocation3], 1 }
 0x3b0   :  { %8458 = vsyncpa [#allocation3 + $0x1], 1 }
 0x3b1   :  { %8459 = vsyncpa [#allocation4], 1 }
 0x3b2   :  { %8461 = vsyncpa [#allocation4 + $0x1], 1 }

</bundles_post_ra>
